<compile_context>
chip_gen: v5e
topology: v5e:2x2
jax: 0.10.0
libtpu: 0.0.40
codegen_flags: <defaults>
</compile_context>

<pallas_src>
import functools

import jax
import jax.numpy as jnp
from jax import lax
from jax.experimental import pallas as pl
from jax.experimental.pallas import tpu as pltpu

BN_EPS = 1e-5      # PyTorch BatchNorm2d default eps
C_REAL = 32        # real channel count of both conv layers
CP = 128           # channels zero-padded to one full lane register (lane-dense everywhere)


# ----------------------------------------------------------------------------
# In-kernel helpers
# ----------------------------------------------------------------------------
def _bn_relu(y, gamma, beta):
    """Training-mode BatchNorm (biased batch stats over all leading axes) + ReLU.

    One-pass statistics (sum and sum-of-squares), folded into a single scale/shift FMA.
    y: [..., CP] f32, gamma/beta: [1, CP] (zero in the padded channels -> output 0 there).
    """
    axes = tuple(range(y.ndim - 1))
    count = 1
    for a in axes:
        count *= y.shape[a]
    inv = 1.0 / count
    s = jnp.sum(y, axis=axes, keepdims=True)
    s2 = jnp.sum(y * y, axis=axes, keepdims=True)
    mean = s * inv
    var = jnp.maximum(s2 * inv - mean * mean, 0.0)   # biased variance, like PyTorch
    scale = gamma * lax.rsqrt(var + BN_EPS)
    shift = beta - mean * scale
    return jnp.maximum(y * scale + shift, 0.0)


def _pool2x2_merged(y, n):
    """MaxPool2d(kernel=2, stride=2, floor) on a [H, W*n, C] value whose middle dim is the
    (W major, batch minor) merge.  Returns [H//2, (W//2)*n, C]."""
    Hn, WN, C = y.shape
    Wn = WN // n
    Hp, Wp = Hn // 2, Wn // 2
    y = y[:2 * Hp, :2 * Wp * n]
    y = y.reshape(Hp, 2, Wp, 2, n, C)
    y = jnp.max(y, axis=(1, 3))                      # pool H and W
    return y.reshape(Hp, Wp * n, C)


# ----------------------------------------------------------------------------
# Fused encoder kernel
# ----------------------------------------------------------------------------
def encoder_kernel(x_ref, w1_ref, w2_ref, gb_ref, o_ref, *, n):
    """Fused CNNEncoder forward (conv3x3 -> BN(batch stats) -> ReLU -> maxpool2x2, twice).

    x_ref : [H, W*n, 1]        f32   input, batch merged onto sublanes (W major, n minor)
    w1_ref: [3, 3, CP]         f32   layer-1 weights, tap -> padded out-channel lane vector
    w2_ref: [9*CP, CP]         bf16  layer-2 weights, rows = (tap major, in-channel minor)
    gb_ref: [4, CP]            f32   rows = gamma1, beta1, gamma2, beta2 (zero-padded)
    o_ref : [Hp2*Wp2*n, CP]    f32   pooled layer-2 output, fully dense lane/sublane slab
    """
    H, WN, _ = x_ref.shape
    W = WN // n
    CPk = w1_ref.shape[-1]

    w1 = w1_ref[...]
    gb = gb_ref[...]

    # -------- layer 1: conv3x3 (Cin=1) as 9 shifted VPU FMAs ---------------------------
    # Hoisted single lane-broadcast of the Cin=1 input (JAX does not CSE broadcasts).
    xb = jnp.broadcast_to(x_ref[...], (H, WN, CPk))          # [H, W*n, CP]
    Ho, Wo = H - 2, W - 2
    y = xb[0:Ho, 0:Wo * n] * w1[0, 0:1]                      # [Ho, Wo*n, CP]
    for di in range(3):
        for dj in range(3):
            if di == 0 and dj == 0:
                continue
            y = y + xb[di:di + Ho, dj * n:dj * n + Wo * n] * w1[di, dj:dj + 1]
    # Conv bias intentionally omitted: it cancels exactly under batch-statistics BN.

    y = _bn_relu(y, gb[0:1], gb[1:2])                        # BN1 + ReLU (one FMA)
    y = _pool2x2_merged(y, n)                                # [Hp, Wp*n, CP]

    # -------- layer 2: conv3x3 (Cin=CP) as ONE fused im2col MXU matmul ------------------
    Hp, WpN = y.shape[0], y.shape[1]
    Wp = WpN // n
    Ho2, Wo2 = Hp - 2, Wp - 2
    rows = Ho2 * Wo2 * n                                     # spatial x batch rows
    taps = []
    for di in range(3):
        for dj in range(3):
            t = y[di:di + Ho2, dj * n:dj * n + Wo2 * n]      # [Ho2, Wo2*n, CP]
            taps.append(t.reshape(rows, CPk).astype(w2_ref.dtype))
    patches = jnp.concatenate(taps, axis=-1)                 # [rows, 9*CP]  (VMEM im2col)
    acc = jnp.dot(patches, w2_ref[...],
                  preferred_element_type=jnp.float32)        # [rows, CP], f32 accumulation

    acc = _bn_relu(acc, gb[2:3], gb[3:4])                    # BN2 + ReLU
    acc = acc.reshape(Ho2, Wo2 * n, CPk)
    acc = _pool2x2_merged(acc, n)                            # [Hp2, Wp2*n, CP]
    o_ref[...] = acc.reshape(o_ref.shape)                    # dense lane+sublane store


# ----------------------------------------------------------------------------
# Host wrapper (layout plumbing + channel padding only)
# ----------------------------------------------------------------------------
def _pad_c(a, target=CP):
    pad = [(0, 0)] * (a.ndim - 1) + [(0, target - a.shape[-1])]
    return jnp.pad(a, pad)


def _vmem_limit_bytes():
    """Per-generation VMEM budget: ~3/4 of physical, capped below 100 MiB.
    v5e/v6e (128 MiB physical) -> 96 MiB; v7x (64 MiB) -> 48 MiB."""
    try:
        cap = pltpu.get_tpu_info().vmem_capacity_bytes
    except Exception:
        cap = 128 * 1024 * 1024
    return int(min(cap * 3 // 4, 100 * 1024 * 1024))


def cnn_encoder_forward(x_nchw, params):
    """CNNEncoder.forward.  x: [N, 1, H, W] f32 (NCHW) -> [N, 32, H', W'] (NCHW)."""
    N, Cin, H, W = x_nchw.shape
    assert Cin == 1, "CNNEncoder expects a single input channel"
    Ho1, Wo1 = H - 2, W - 2
    Hp1, Wp1 = Ho1 // 2, Wo1 // 2
    Ho2, Wo2 = Hp1 - 2, Wp1 - 2
    Hp2, Wp2 = Ho2 // 2, Wo2 // 2
    rows_out = Hp2 * Wp2 * N

    # Input: [N,1,H,W] -> [H, W, N] -> [H, W*N, 1]  (batch folded onto sublanes, W major).
    x_in = jnp.transpose(x_nchw.astype(jnp.float32)[:, 0], (1, 2, 0)).reshape(H, W * N, 1)

    # Layer-1 weights [32,1,3,3] (OIHW) -> [3,3,32] -> pad channels to CP.
    w1 = _pad_c(jnp.transpose(params["w1"][:, 0], (1, 2, 0)).astype(jnp.float32))
    # Layer-2 weights [32,32,3,3] (OIHW) -> HWIO [3,3,32,32] -> pad -> [9*CP, CP] bf16.
    w2 = jnp.transpose(params["w2"], (2, 3, 1, 0)).astype(jnp.float32)
    w2 = jnp.pad(w2, ((0, 0), (0, 0), (0, CP - C_REAL), (0, CP - C_REAL)))
    w2 = w2.reshape(9 * CP, CP).astype(jnp.bfloat16)   # MXU input dtype; f32 accumulation

    # BatchNorm affine params as one stacked, channel-padded operand.
    gb = jnp.stack([_pad_c(params["g1"].astype(jnp.float32)),
                    _pad_c(params["be1"].astype(jnp.float32)),
                    _pad_c(params["g2"].astype(jnp.float32)),
                    _pad_c(params["be2"].astype(jnp.float32))])             # [4, CP]
    # Conv biases b1/b2 are deliberately not passed: training-mode BN removes any
    # per-channel constant shift exactly.

    kernel = functools.partial(encoder_kernel, n=N)
    out = pl.pallas_call(
        kernel,
        out_shape=jax.ShapeDtypeStruct((rows_out, CP), jnp.float32),
        in_specs=[
            pl.BlockSpec((H, W * N, 1), lambda: (0, 0, 0)),
            pl.BlockSpec((3, 3, CP), lambda: (0, 0, 0)),
            pl.BlockSpec((9 * CP, CP), lambda: (0, 0)),
            pl.BlockSpec((4, CP), lambda: (0, 0)),
        ],
        out_specs=pl.BlockSpec((rows_out, CP), lambda: (0, 0)),
        compiler_params=pltpu.CompilerParams(vmem_limit_bytes=_vmem_limit_bytes()),
    )(x_in, w1, w2, gb)

    # Un-flatten the dense output slab, drop channel padding, return NCHW.
    out = out.reshape(Hp2, Wp2, N, CP)[..., :C_REAL]
    return jnp.transpose(out, (2, 3, 0, 1))


def init_params(key):
    k1, k2, k3, k4 = jax.random.split(key, 4)
    return {
        # Conv2d(1, 32, kernel_size=3): weight [32, 1, 3, 3], bias [32]
        "w1": jax.random.normal(k1, (32, 1, 3, 3), jnp.float32) * 0.1,
        "b1": jax.random.normal(k2, (32,), jnp.float32) * 0.1,   # unused: cancels under BN
        # BatchNorm2d(32): gamma=1, beta=0 (PyTorch default init)
        "g1": jnp.ones((32,), jnp.float32),
        "be1": jnp.zeros((32,), jnp.float32),
        # Conv2d(32, 32, kernel_size=3): weight [32, 32, 3, 3], bias [32]
        "w2": jax.random.normal(k3, (32, 32, 3, 3), jnp.float32) * 0.05,
        "b2": jax.random.normal(k4, (32,), jnp.float32) * 0.1,   # unused: cancels under BN
        "g2": jnp.ones((32,), jnp.float32),
        "be2": jnp.zeros((32,), jnp.float32),
    }


if __name__ == "__main__":
    key = jax.random.PRNGKey(0)
    kx, kp = jax.random.split(key)
    params = init_params(kp)

    # x: [N=2, C=1, H=16, W=16]  (NCHW; conv1 of the module requires 1 input channel)
    x = jax.random.normal(kx, (2, 1, 16, 16), jnp.float32)

    out = jax.block_until_ready(jax.jit(cnn_encoder_forward)(x, params))

    # 16 -conv3-> 14 -pool-> 7 -conv3-> 5 -pool-> 2
    assert out.shape == (2, 32, 2, 2), out.shape
    assert out.dtype == jnp.float32
    assert bool(jnp.all(jnp.isfinite(out)))
    print("KERNEL_OK")
</pallas_src>

<mosaic_0001>
module attributes {stable_mosaic.version = 11 : i64} {
  func.func @encoder_kernel(%arg0: memref<16x32x1xf32, #tpu.memory_space<vmem>>, %arg1: memref<3x3x128xf32, #tpu.memory_space<vmem>>, %arg2: memref<1152x128xbf16, #tpu.memory_space<vmem>>, %arg3: memref<4x128xf32, #tpu.memory_space<vmem>>, %arg4: memref<8x128xf32, #tpu.memory_space<vmem>>) attributes {dimension_semantics = [], scalar_prefetch = 0 : i64, scratch_operands = 0 : i64, tpu.core_type = #tpu.core_type<tc>} {
    %c0 = arith.constant 0 : index
    %c0_0 = arith.constant 0 : index
    %c0_1 = arith.constant 0 : index
    %0 = vector.load %arg1[%c0, %c0_0, %c0_1] : memref<3x3x128xf32, #tpu.memory_space<vmem>>, vector<3x3x128xf32>
    %c0_2 = arith.constant 0 : index
    %c0_3 = arith.constant 0 : index
    %1 = vector.load %arg3[%c0_2, %c0_3] : memref<4x128xf32, #tpu.memory_space<vmem>>, vector<4x128xf32>
    %c0_4 = arith.constant 0 : index
    %c0_5 = arith.constant 0 : index
    %c0_6 = arith.constant 0 : index
    %2 = vector.load %arg0[%c0_4, %c0_5, %c0_6] : memref<16x32x1xf32, #tpu.memory_space<vmem>>, vector<16x32x1xf32>
    %3 = vector.shape_cast %2 : vector<16x32x1xf32> to vector<16x32x1xf32>
    %4 = vector.broadcast %3 : vector<16x32x1xf32> to vector<16x32x128xf32>
    %5 = vector.extract_strided_slice %4 {offsets = [0, 0, 0], sizes = [14, 28, 128], strides = [1, 1, 1]} : vector<16x32x128xf32> to vector<14x28x128xf32>
    %6 = vector.extract_strided_slice %0 {offsets = [0, 0, 0], sizes = [1, 1, 128], strides = [1, 1, 1]} : vector<3x3x128xf32> to vector<1x1x128xf32>
    %7 = vector.shape_cast %6 : vector<1x1x128xf32> to vector<1x128xf32>
    %8 = vector.shape_cast %7 : vector<1x128xf32> to vector<1x1x128xf32>
    %9 = vector.broadcast %8 : vector<1x1x128xf32> to vector<14x28x128xf32>
    %10 = arith.mulf %5, %9 : vector<14x28x128xf32>
    %11 = vector.extract_strided_slice %4 {offsets = [0, 2, 0], sizes = [14, 28, 128], strides = [1, 1, 1]} : vector<16x32x128xf32> to vector<14x28x128xf32>
    %12 = vector.extract_strided_slice %0 {offsets = [0, 1, 0], sizes = [1, 1, 128], strides = [1, 1, 1]} : vector<3x3x128xf32> to vector<1x1x128xf32>
    %13 = vector.shape_cast %12 : vector<1x1x128xf32> to vector<1x128xf32>
    %14 = vector.shape_cast %13 : vector<1x128xf32> to vector<1x1x128xf32>
    %15 = vector.broadcast %14 : vector<1x1x128xf32> to vector<14x28x128xf32>
    %16 = arith.mulf %11, %15 : vector<14x28x128xf32>
    %17 = arith.addf %10, %16 : vector<14x28x128xf32>
    %18 = vector.extract_strided_slice %4 {offsets = [0, 4, 0], sizes = [14, 28, 128], strides = [1, 1, 1]} : vector<16x32x128xf32> to vector<14x28x128xf32>
    %19 = vector.extract_strided_slice %0 {offsets = [0, 2, 0], sizes = [1, 1, 128], strides = [1, 1, 1]} : vector<3x3x128xf32> to vector<1x1x128xf32>
    %20 = vector.shape_cast %19 : vector<1x1x128xf32> to vector<1x128xf32>
    %21 = vector.shape_cast %20 : vector<1x128xf32> to vector<1x1x128xf32>
    %22 = vector.broadcast %21 : vector<1x1x128xf32> to vector<14x28x128xf32>
    %23 = arith.mulf %18, %22 : vector<14x28x128xf32>
    %24 = arith.addf %17, %23 : vector<14x28x128xf32>
    %25 = vector.extract_strided_slice %4 {offsets = [1, 0, 0], sizes = [14, 28, 128], strides = [1, 1, 1]} : vector<16x32x128xf32> to vector<14x28x128xf32>
    %26 = vector.extract_strided_slice %0 {offsets = [1, 0, 0], sizes = [1, 1, 128], strides = [1, 1, 1]} : vector<3x3x128xf32> to vector<1x1x128xf32>
    %27 = vector.shape_cast %26 : vector<1x1x128xf32> to vector<1x128xf32>
    %28 = vector.shape_cast %27 : vector<1x128xf32> to vector<1x1x128xf32>
    %29 = vector.broadcast %28 : vector<1x1x128xf32> to vector<14x28x128xf32>
    %30 = arith.mulf %25, %29 : vector<14x28x128xf32>
    %31 = arith.addf %24, %30 : vector<14x28x128xf32>
    %32 = vector.extract_strided_slice %4 {offsets = [1, 2, 0], sizes = [14, 28, 128], strides = [1, 1, 1]} : vector<16x32x128xf32> to vector<14x28x128xf32>
    %33 = vector.extract_strided_slice %0 {offsets = [1, 1, 0], sizes = [1, 1, 128], strides = [1, 1, 1]} : vector<3x3x128xf32> to vector<1x1x128xf32>
    %34 = vector.shape_cast %33 : vector<1x1x128xf32> to vector<1x128xf32>
    %35 = vector.shape_cast %34 : vector<1x128xf32> to vector<1x1x128xf32>
    %36 = vector.broadcast %35 : vector<1x1x128xf32> to vector<14x28x128xf32>
    %37 = arith.mulf %32, %36 : vector<14x28x128xf32>
    %38 = arith.addf %31, %37 : vector<14x28x128xf32>
    %39 = vector.extract_strided_slice %4 {offsets = [1, 4, 0], sizes = [14, 28, 128], strides = [1, 1, 1]} : vector<16x32x128xf32> to vector<14x28x128xf32>
    %40 = vector.extract_strided_slice %0 {offsets = [1, 2, 0], sizes = [1, 1, 128], strides = [1, 1, 1]} : vector<3x3x128xf32> to vector<1x1x128xf32>
    %41 = vector.shape_cast %40 : vector<1x1x128xf32> to vector<1x128xf32>
    %42 = vector.shape_cast %41 : vector<1x128xf32> to vector<1x1x128xf32>
    %43 = vector.broadcast %42 : vector<1x1x128xf32> to vector<14x28x128xf32>
    %44 = arith.mulf %39, %43 : vector<14x28x128xf32>
    %45 = arith.addf %38, %44 : vector<14x28x128xf32>
    %46 = vector.extract_strided_slice %4 {offsets = [2, 0, 0], sizes = [14, 28, 128], strides = [1, 1, 1]} : vector<16x32x128xf32> to vector<14x28x128xf32>
    %47 = vector.extract_strided_slice %0 {offsets = [2, 0, 0], sizes = [1, 1, 128], strides = [1, 1, 1]} : vector<3x3x128xf32> to vector<1x1x128xf32>
    %48 = vector.shape_cast %47 : vector<1x1x128xf32> to vector<1x128xf32>
    %49 = vector.shape_cast %48 : vector<1x128xf32> to vector<1x1x128xf32>
    %50 = vector.broadcast %49 : vector<1x1x128xf32> to vector<14x28x128xf32>
    %51 = arith.mulf %46, %50 : vector<14x28x128xf32>
    %52 = arith.addf %45, %51 : vector<14x28x128xf32>
    %53 = vector.extract_strided_slice %4 {offsets = [2, 2, 0], sizes = [14, 28, 128], strides = [1, 1, 1]} : vector<16x32x128xf32> to vector<14x28x128xf32>
    %54 = vector.extract_strided_slice %0 {offsets = [2, 1, 0], sizes = [1, 1, 128], strides = [1, 1, 1]} : vector<3x3x128xf32> to vector<1x1x128xf32>
    %55 = vector.shape_cast %54 : vector<1x1x128xf32> to vector<1x128xf32>
    %56 = vector.shape_cast %55 : vector<1x128xf32> to vector<1x1x128xf32>
    %57 = vector.broadcast %56 : vector<1x1x128xf32> to vector<14x28x128xf32>
    %58 = arith.mulf %53, %57 : vector<14x28x128xf32>
    %59 = arith.addf %52, %58 : vector<14x28x128xf32>
    %60 = vector.extract_strided_slice %4 {offsets = [2, 4, 0], sizes = [14, 28, 128], strides = [1, 1, 1]} : vector<16x32x128xf32> to vector<14x28x128xf32>
    %61 = vector.extract_strided_slice %0 {offsets = [2, 2, 0], sizes = [1, 1, 128], strides = [1, 1, 1]} : vector<3x3x128xf32> to vector<1x1x128xf32>
    %62 = vector.shape_cast %61 : vector<1x1x128xf32> to vector<1x128xf32>
    %63 = vector.shape_cast %62 : vector<1x128xf32> to vector<1x1x128xf32>
    %64 = vector.broadcast %63 : vector<1x1x128xf32> to vector<14x28x128xf32>
    %65 = arith.mulf %60, %64 : vector<14x28x128xf32>
    %66 = arith.addf %59, %65 : vector<14x28x128xf32>
    %67 = vector.extract_strided_slice %1 {offsets = [0, 0], sizes = [1, 128], strides = [1, 1]} : vector<4x128xf32> to vector<1x128xf32>
    %68 = vector.extract_strided_slice %1 {offsets = [1, 0], sizes = [1, 128], strides = [1, 1]} : vector<4x128xf32> to vector<1x128xf32>
    %cst = arith.constant dense<0.000000e+00> : vector<128xf32>
    %69 = vector.multi_reduction <add>, %66, %cst [0, 1] : vector<14x28x128xf32> to vector<128xf32>
    %70 = vector.shape_cast %69 : vector<128xf32> to vector<1x1x128xf32>
    %71 = arith.mulf %66, %66 : vector<14x28x128xf32>
    %cst_7 = arith.constant dense<0.000000e+00> : vector<128xf32>
    %72 = vector.multi_reduction <add>, %71, %cst_7 [0, 1] : vector<14x28x128xf32> to vector<128xf32>
    %73 = vector.shape_cast %72 : vector<128xf32> to vector<1x1x128xf32>
    %cst_8 = arith.constant 0.00255102036 : f32
    %74 = vector.broadcast %cst_8 : f32 to vector<1x1x128xf32>
    %75 = arith.mulf %70, %74 : vector<1x1x128xf32>
    %cst_9 = arith.constant 0.00255102036 : f32
    %76 = vector.broadcast %cst_9 : f32 to vector<1x1x128xf32>
    %77 = arith.mulf %73, %76 : vector<1x1x128xf32>
    %78 = arith.mulf %75, %75 : vector<1x1x128xf32>
    %79 = arith.subf %77, %78 : vector<1x1x128xf32>
    %cst_10 = arith.constant 0.000000e+00 : f32
    %80 = vector.broadcast %cst_10 : f32 to vector<1x1x128xf32>
    %81 = arith.maximumf %79, %80 : vector<1x1x128xf32>
    %cst_11 = arith.constant 9.99999974E-6 : f32
    %82 = vector.broadcast %cst_11 : f32 to vector<1x1x128xf32>
    %83 = arith.addf %81, %82 : vector<1x1x128xf32>
    %84 = math.rsqrt %83 : vector<1x1x128xf32>
    %85 = vector.shape_cast %67 : vector<1x128xf32> to vector<1x1x128xf32>
    %86 = arith.mulf %85, %84 : vector<1x1x128xf32>
    %87 = arith.mulf %75, %86 : vector<1x1x128xf32>
    %88 = vector.shape_cast %68 : vector<1x128xf32> to vector<1x1x128xf32>
    %89 = arith.subf %88, %87 : vector<1x1x128xf32>
    %90 = vector.broadcast %86 : vector<1x1x128xf32> to vector<14x28x128xf32>
    %91 = arith.mulf %66, %90 : vector<14x28x128xf32>
    %92 = vector.broadcast %89 : vector<1x1x128xf32> to vector<14x28x128xf32>
    %93 = arith.addf %91, %92 : vector<14x28x128xf32>
    %cst_12 = arith.constant 0.000000e+00 : f32
    %94 = vector.broadcast %cst_12 : f32 to vector<14x28x128xf32>
    %95 = arith.maximumf %93, %94 : vector<14x28x128xf32>
    %96 = vector.shape_cast %95 : vector<14x28x128xf32> to vector<7x2x7x2x2x128xf32>
    %cst_13 = arith.constant dense<0xFF800000> : vector<7x7x2x128xf32>
    %97 = vector.multi_reduction <maximumf>, %96, %cst_13 [1, 3] : vector<7x2x7x2x2x128xf32> to vector<7x7x2x128xf32>
    %98 = vector.shape_cast %97 : vector<7x7x2x128xf32> to vector<7x14x128xf32>
    %99 = vector.extract_strided_slice %98 {offsets = [0, 0, 0], sizes = [5, 10, 128], strides = [1, 1, 1]} : vector<7x14x128xf32> to vector<5x10x128xf32>
    %100 = vector.shape_cast %99 : vector<5x10x128xf32> to vector<50x128xf32>
    %101 = arith.truncf %100 : vector<50x128xf32> to vector<50x128xbf16>
    %102 = vector.extract_strided_slice %98 {offsets = [0, 2, 0], sizes = [5, 10, 128], strides = [1, 1, 1]} : vector<7x14x128xf32> to vector<5x10x128xf32>
    %103 = vector.shape_cast %102 : vector<5x10x128xf32> to vector<50x128xf32>
    %104 = arith.truncf %103 : vector<50x128xf32> to vector<50x128xbf16>
    %105 = vector.extract_strided_slice %98 {offsets = [0, 4, 0], sizes = [5, 10, 128], strides = [1, 1, 1]} : vector<7x14x128xf32> to vector<5x10x128xf32>
    %106 = vector.shape_cast %105 : vector<5x10x128xf32> to vector<50x128xf32>
    %107 = arith.truncf %106 : vector<50x128xf32> to vector<50x128xbf16>
    %108 = vector.extract_strided_slice %98 {offsets = [1, 0, 0], sizes = [5, 10, 128], strides = [1, 1, 1]} : vector<7x14x128xf32> to vector<5x10x128xf32>
    %109 = vector.shape_cast %108 : vector<5x10x128xf32> to vector<50x128xf32>
    %110 = arith.truncf %109 : vector<50x128xf32> to vector<50x128xbf16>
    %111 = vector.extract_strided_slice %98 {offsets = [1, 2, 0], sizes = [5, 10, 128], strides = [1, 1, 1]} : vector<7x14x128xf32> to vector<5x10x128xf32>
    %112 = vector.shape_cast %111 : vector<5x10x128xf32> to vector<50x128xf32>
    %113 = arith.truncf %112 : vector<50x128xf32> to vector<50x128xbf16>
    %114 = vector.extract_strided_slice %98 {offsets = [1, 4, 0], sizes = [5, 10, 128], strides = [1, 1, 1]} : vector<7x14x128xf32> to vector<5x10x128xf32>
    %115 = vector.shape_cast %114 : vector<5x10x128xf32> to vector<50x128xf32>
    %116 = arith.truncf %115 : vector<50x128xf32> to vector<50x128xbf16>
    %117 = vector.extract_strided_slice %98 {offsets = [2, 0, 0], sizes = [5, 10, 128], strides = [1, 1, 1]} : vector<7x14x128xf32> to vector<5x10x128xf32>
    %118 = vector.shape_cast %117 : vector<5x10x128xf32> to vector<50x128xf32>
    %119 = arith.truncf %118 : vector<50x128xf32> to vector<50x128xbf16>
    %120 = vector.extract_strided_slice %98 {offsets = [2, 2, 0], sizes = [5, 10, 128], strides = [1, 1, 1]} : vector<7x14x128xf32> to vector<5x10x128xf32>
    %121 = vector.shape_cast %120 : vector<5x10x128xf32> to vector<50x128xf32>
    %122 = arith.truncf %121 : vector<50x128xf32> to vector<50x128xbf16>
    %123 = vector.extract_strided_slice %98 {offsets = [2, 4, 0], sizes = [5, 10, 128], strides = [1, 1, 1]} : vector<7x14x128xf32> to vector<5x10x128xf32>
    %124 = vector.shape_cast %123 : vector<5x10x128xf32> to vector<50x128xf32>
    %125 = arith.truncf %124 : vector<50x128xf32> to vector<50x128xbf16>
    %126 = tpu.concatenate %101, %104, %107, %110, %113, %116, %119, %122, %125 in 1 : vector<50x128xbf16>, vector<50x128xbf16>, vector<50x128xbf16>, vector<50x128xbf16>, vector<50x128xbf16>, vector<50x128xbf16>, vector<50x128xbf16>, vector<50x128xbf16>, vector<50x128xbf16> -> vector<50x1152xbf16>
    %c0_14 = arith.constant 0 : index
    %c0_15 = arith.constant 0 : index
    %127 = vector.load %arg2[%c0_14, %c0_15] : memref<1152x128xbf16, #tpu.memory_space<vmem>>, vector<1152x128xbf16>
    %cst_16 = arith.constant dense<0.000000e+00> : vector<50x128xf32>
    %128 = tpu.matmul %126, %127, %cst_16 {dimension_numbers = #tpu.dot_dimension_numbers<[1], [0], [0], [1], [0, 0, 1, 1], [], []>} : vector<50x1152xbf16>, vector<1152x128xbf16>, vector<50x128xf32> -> vector<50x128xf32>
    %129 = vector.extract_strided_slice %1 {offsets = [2, 0], sizes = [1, 128], strides = [1, 1]} : vector<4x128xf32> to vector<1x128xf32>
    %130 = vector.extract_strided_slice %1 {offsets = [3, 0], sizes = [1, 128], strides = [1, 1]} : vector<4x128xf32> to vector<1x128xf32>
    %cst_17 = arith.constant dense<0.000000e+00> : vector<128xf32>
    %131 = vector.multi_reduction <add>, %128, %cst_17 [0] : vector<50x128xf32> to vector<128xf32>
    %132 = vector.shape_cast %131 : vector<128xf32> to vector<1x128xf32>
    %133 = arith.mulf %128, %128 : vector<50x128xf32>
    %cst_18 = arith.constant dense<0.000000e+00> : vector<128xf32>
    %134 = vector.multi_reduction <add>, %133, %cst_18 [0] : vector<50x128xf32> to vector<128xf32>
    %135 = vector.shape_cast %134 : vector<128xf32> to vector<1x128xf32>
    %cst_19 = arith.constant 2.000000e-02 : f32
    %136 = vector.broadcast %cst_19 : f32 to vector<1x128xf32>
    %137 = arith.mulf %132, %136 : vector<1x128xf32>
    %cst_20 = arith.constant 2.000000e-02 : f32
    %138 = vector.broadcast %cst_20 : f32 to vector<1x128xf32>
    %139 = arith.mulf %135, %138 : vector<1x128xf32>
    %140 = arith.mulf %137, %137 : vector<1x128xf32>
    %141 = arith.subf %139, %140 : vector<1x128xf32>
    %cst_21 = arith.constant 0.000000e+00 : f32
    %142 = vector.broadcast %cst_21 : f32 to vector<1x128xf32>
    %143 = arith.maximumf %141, %142 : vector<1x128xf32>
    %cst_22 = arith.constant 9.99999974E-6 : f32
    %144 = vector.broadcast %cst_22 : f32 to vector<1x128xf32>
    %145 = arith.addf %143, %144 : vector<1x128xf32>
    %146 = math.rsqrt %145 : vector<1x128xf32>
    %147 = arith.mulf %129, %146 : vector<1x128xf32>
    %148 = arith.mulf %137, %147 : vector<1x128xf32>
    %149 = arith.subf %130, %148 : vector<1x128xf32>
    %150 = vector.broadcast %147 : vector<1x128xf32> to vector<50x128xf32>
    %151 = arith.mulf %128, %150 : vector<50x128xf32>
    %152 = vector.broadcast %149 : vector<1x128xf32> to vector<50x128xf32>
    %153 = arith.addf %151, %152 : vector<50x128xf32>
    %cst_23 = arith.constant 0.000000e+00 : f32
    %154 = vector.broadcast %cst_23 : f32 to vector<50x128xf32>
    %155 = arith.maximumf %153, %154 : vector<50x128xf32>
    %156 = vector.shape_cast %155 : vector<50x128xf32> to vector<5x10x128xf32>
    %157 = vector.extract_strided_slice %156 {offsets = [0, 0, 0], sizes = [4, 8, 128], strides = [1, 1, 1]} : vector<5x10x128xf32> to vector<4x8x128xf32>
    %158 = vector.shape_cast %157 : vector<4x8x128xf32> to vector<2x2x2x2x2x128xf32>
    %cst_24 = arith.constant dense<0xFF800000> : vector<2x2x2x128xf32>
    %159 = vector.multi_reduction <maximumf>, %158, %cst_24 [1, 3] : vector<2x2x2x2x2x128xf32> to vector<2x2x2x128xf32>
    %160 = vector.shape_cast %159 : vector<2x2x2x128xf32> to vector<2x4x128xf32>
    %161 = vector.shape_cast %160 : vector<2x4x128xf32> to vector<8x128xf32>
    %c0_25 = arith.constant 0 : index
    %c0_26 = arith.constant 0 : index
    %162 = vector.load %arg4[%c0_25, %c0_26] : memref<8x128xf32, #tpu.memory_space<vmem>>, vector<8x128xf32>
    tpu.vector_store %arg4[%c0_25, %c0_26], %161 {strides = array<i32>} : memref<8x128xf32, #tpu.memory_space<vmem>>, vector<8x128xf32>,
    return
  }
}

</mosaic_0001>

<bundles_post_ra>
// kernel: cnn_encoder_forward.1
= control target key start
LH: loop header
LB: loop body
LE: loop exit
PB: predicated region body
PF: predicated region fallthrough
CT: control target
= control target key end

     0   :  { %v5790_v0 = vmov 0   ;;  %vm535_vm0 = vcmask 1045504   ;;  %vm859_vm1 = vcmask 1043456   ;;  %vm3362_vm5 = vcmask 1041408   ;;  %s10547_s0 = inlined_call_operand.vmem [shape: f32[16,32,1], index: 0, kind: input, shape index: {}]   ;;  %s10548_s1 = inlined_call_operand.vmem [shape: f32[3,3,128], index: 1, kind: input, shape index: {}]   ;;  %s10549_s3 = inlined_call_operand.vmem [shape: f32[4,128], index: 3, kind: input, shape index: {}]   ;;  %s10550_s2 = inlined_call_operand.vmem [shape: bf16[1152,128], index: 2, kind: input, shape index: {}]   ;;  %s10551_s4 = inlined_call_operand.vmem [shape: f32[8,128], index: 4, kind: output, shape index: {}]  }
   0x1   :  { %5784 = vset.pattern.permute.xlu2 %v5790_v0  ;;  %5783 = vset.pattern.permute.xlu1 %v5790_v0  ;;  %v25_v1 = vld [vmem:[%s10547_s0 + $0x20] sm:$0xff]  ;;  %v23_v2 = vld [vmem:[%s10547_s0 + $0x10] sm:$0xff]  ;;  %v26_v4 = vld [vmem:[%s10547_s0 + $0x28] sm:$0xff] }
   0x2   :  { %v21_v3 = vld [vmem:[%s10547_s0] sm:$0xff]  ;;  %5782 = vset.pattern.permute.xlu0 %v5790_v0  ;;  %107 = vperm.xlu2 %5784, %v25_v1   ;;  %v24_v5 = vld [vmem:[%s10547_s0 + $0x18] sm:$0xff]  ;;  %v22_v6 = vld [vmem:[%s10547_s0 + $0x8] sm:$0xff] }
   0x3   :  { %97 = vperm.xlu1 %5783, %v23_v2   ;;  %87 = vperm.xlu0 %5782, %v21_v3   ;;  %v29_v7 = vld [vmem:[%s10547_s0 + $0x40] sm:$0xff]  ;;  %v28_v8 = vld [vmem:[%s10547_s0 + $0x38] sm:$0xff]  ;;  %v27_v9 = vld [vmem:[%s10547_s0 + $0x30] sm:$0xff] }
   0x4   :  { %v32_v10 = vld [vmem:[%s10547_s0 + $0x58] sm:$0xff]  ;;  %v31_v11 = vld [vmem:[%s10547_s0 + $0x50] sm:$0xff]  ;;  %v30_v12 = vld [vmem:[%s10547_s0 + $0x48] sm:$0xff] }
   0x5   :  { %v35_v13 = vld [vmem:[%s10547_s0 + $0x70] sm:$0xff]  ;;  %v34_v14 = vld [vmem:[%s10547_s0 + $0x68] sm:$0xff]  ;;  %v33_v15 = vld [vmem:[%s10547_s0 + $0x60] sm:$0xff] }
   0x6   :  { %v38_v16 = vld [vmem:[%s10547_s0 + $0x88] sm:$0xff]  ;;  %v37_v17 = vld [vmem:[%s10547_s0 + $0x80] sm:$0xff]  ;;  %v36_v18 = vld [vmem:[%s10547_s0 + $0x78] sm:$0xff] }
   0x7   :  { %v41_v19 = vld [vmem:[%s10547_s0 + $0xa0] sm:$0xff]  ;;  %v40_v20 = vld [vmem:[%s10547_s0 + $0x98] sm:$0xff]  ;;  %v39_v21 = vld [vmem:[%s10547_s0 + $0x90] sm:$0xff] }
   0x8   :  { %v44_v22 = vld [vmem:[%s10547_s0 + $0xb8] sm:$0xff]  ;;  %v43_v23 = vld [vmem:[%s10547_s0 + $0xb0] sm:$0xff]  ;;  %v42_v24 = vld [vmem:[%s10547_s0 + $0xa8] sm:$0xff] }
   0x9   :  { %v47_v25 = vld [vmem:[%s10547_s0 + $0xd0] sm:$0xff]  ;;  %v46_v26 = vld [vmem:[%s10547_s0 + $0xc8] sm:$0xff]  ;;  %v45_v27 = vld [vmem:[%s10547_s0 + $0xc0] sm:$0xff] }
   0xa   :  { %112 = vperm.xlu2 %5784, %v26_v4   ;;  %v50_v28 = vld [vmem:[%s10547_s0 + $0xe8] sm:$0xff]  ;;  %v49_v29 = vld [vmem:[%s10547_s0 + $0xe0] sm:$0xff]  ;;  %v48_v30 = vld [vmem:[%s10547_s0 + $0xd8] sm:$0xff] }
   0xb   :  { %102 = vperm.xlu1 %5783, %v24_v5   ;;  %92 = vperm.xlu0 %5782, %v22_v6   ;;  %v53_v31 = vld [vmem:[%s10547_s0 + $0x100] sm:$0xff]  ;;  %v52_v32 = vld [vmem:[%s10547_s0 + $0xf8] sm:$0xff]  ;;  %v51_v33 = vld [vmem:[%s10547_s0 + $0xf0] sm:$0xff] }
   0xc   :  { %v56_v34 = vld [vmem:[%s10547_s0 + $0x118] sm:$0xff]  ;;  %v55_v35 = vld [vmem:[%s10547_s0 + $0x110] sm:$0xff]  ;;  %v54_v36 = vld [vmem:[%s10547_s0 + $0x108] sm:$0xff] }
   0xd   :  { %v59_v38 = vld [vmem:[%s10547_s0 + $0x130] sm:$0xff]  ;;  %v17_v39 = vld [vmem:[%s10548_s1] sm:$0x7]  ;;  %v58_v40 = vld [vmem:[%s10547_s0 + $0x128] sm:$0xff] }
   0xe   :  { %v57_v41 = vld [vmem:[%s10547_s0 + $0x120] sm:$0xff]  ;;  %v5936_v42 = vperm.slane %v17_v39, 1  ;;  %v5938_v44 = vperm.slane %v17_v39, 2  ;;  %v62_v48 = vld [vmem:[%s10547_s0 + $0x148] sm:$0xff]  ;;  %v60_v50 = vld [vmem:[%s10547_s0 + $0x138] sm:$0xff]  ;;  %v5965_v57 = vperm.slane %v17_v39, 0 }
   0xf   :  { %v18_v45 = vld [vmem:[%s10548_s1 + $0x4] sm:$0x7]  ;;  %v64_v4 = vld [vmem:[%s10547_s0 + $0x158] sm:$0xff]  ;;  %v63_v5 = vld [vmem:[%s10547_s0 + $0x150] sm:$0xff] }
  0x10   :  { %v61_v49 = vld [vmem:[%s10547_s0 + $0x140] sm:$0xff]  ;;  %v5956_v51 = vperm.slane %v18_v45, 1  ;;  %v5958_v52 = vperm.slane %v18_v45, 2  ;;  %v5989_v6 = vperm.slane %v18_v45, 0 }
  0x11   :  { %v65_v3 = vld [vmem:[%s10547_s0 + $0x160] sm:$0xff] }
  0x12   :  { %127 = vperm.xlu2 %5784, %v29_v7   ;;  %10755 = vst [vmem:[#allocation2_spill] sm:$0xff] %v5956_v51  ;;  %v19_v7 = vld [vmem:[%s10548_s1 + $0x8] sm:$0x7] }
  0x13   :  { %122 = vperm.xlu1 %5783, %v28_v8   ;;  %117 = vperm.xlu0 %5782, %v27_v9  }
  0x1a   :  { %142 = vperm.xlu2 %5784, %v32_v10  }
  0x1b   :  { %137 = vperm.xlu1 %5783, %v31_v11   ;;  %132 = vperm.xlu0 %5782, %v30_v12  }
  0x22   :  { %157 = vperm.xlu2 %5784, %v35_v13  }
  0x23   :  { %152 = vperm.xlu1 %5783, %v34_v14   ;;  %147 = vperm.xlu0 %5782, %v33_v15   ;;  %v5999_v14 = vperm.slane %v19_v7, 1  ;;  %v6001_v15 = vperm.slane %v19_v7, 2 }
  0x2a   :  { %172 = vperm.xlu2 %5784, %v38_v16  }
  0x2b   :  { %167 = vperm.xlu1 %5783, %v37_v17   ;;  %162 = vperm.xlu0 %5782, %v36_v18   ;;  %v6003_v17 = vperm.slane %v19_v7, 0 }
  0x32   :  { %187 = vperm.xlu2 %5784, %v41_v19  }
  0x33   :  { %182 = vperm.xlu1 %5783, %v40_v20   ;;  %177 = vperm.xlu0 %5782, %v39_v21  }
  0x3a   :  { %202 = vperm.xlu2 %5784, %v44_v22  }
  0x3b   :  { %197 = vperm.xlu1 %5783, %v43_v23   ;;  %192 = vperm.xlu0 %5782, %v42_v24  }
  0x42   :  { %217 = vperm.xlu2 %5784, %v47_v25  }
  0x43   :  { %212 = vperm.xlu1 %5783, %v46_v26   ;;  %207 = vperm.xlu0 %5782, %v45_v27  }
  0x4a   :  { %232 = vperm.xlu2 %5784, %v50_v28  }
  0x4b   :  { %227 = vperm.xlu1 %5783, %v49_v29   ;;  %222 = vperm.xlu0 %5782, %v48_v30   ;;  %v68_v29 = vld [vmem:[%s10547_s0 + $0x178] sm:$0xff] }
  0x52   :  { %247 = vperm.xlu2 %5784, %v53_v31  }
  0x53   :  { %242 = vperm.xlu1 %5783, %v52_v32   ;;  %237 = vperm.xlu0 %5782, %v51_v33  }
  0x5a   :  { %262 = vperm.xlu2 %5784, %v56_v34  }
  0x5b   :  { %257 = vperm.xlu1 %5783, %v55_v35   ;;  %252 = vperm.xlu0 %5782, %v54_v36  }
  0x5c   :  { %v108_v37 = vpop.permute.xlu2 %107 }
  0x5d   :  { %v427_v46 = vmul.f32 %v5936_v42, %v108_v37  ;;  %v751_v53 = vmul.f32 %v5938_v44, %v108_v37  ;;  %v370_v59 = vmul.f32 %v5965_v57, %v108_v37  ;;  %v1204_v61 = vmul.f32 %v5956_v51, %v108_v37 }
  0x5e   :  { %v1527_v62 = vmul.f32 %v5958_v52, %v108_v37  ;;  %v6006_v18 = vmul.f32 %v5989_v6, %v108_v37  ;;  %v67_v37 = vld [vmem:[%s10547_s0 + $0x170] sm:$0xff] }
  0x5f   :  { %v543_v54 = vrot.slane %v427_v46, 2  ;;  %v867_v60 = vrot.slane %v751_v53, 4  ;;  %v1316_v8 = vrot.slane %v1204_v61, 2 }
  0x60   :  { %v1639_v10 = vrot.slane %v1527_v62, 4 }
  0x62   :  { %277 = vperm.xlu2 %5784, %v59_v38   ;;  %v66_v38 = vld [vmem:[%s10547_s0 + $0x168] sm:$0xff] }
  0x63   :  { %272 = vperm.xlu1 %5783, %v58_v40   ;;  %267 = vperm.xlu0 %5782, %v57_v41  }
  0x64   :  { %v113_v43 = vpop.permute.xlu2 %112 }
  0x65   :  { %v5945_v47 = vmul.f32 %v5936_v42, %v113_v43  ;;  %v5963_v56 = vmul.f32 %v5938_v44, %v113_v43  ;;  %v5975_v1 = vmul.f32 %v5956_v51, %v113_v43  ;;  %v5978_v2 = vmul.f32 %v5958_v52, %v113_v43 }
  0x66   :  { %v6018_v24 = vmul.f32 %v5965_v57, %v113_v43  ;;  %v6031_v30 = vmul.f32 %v5989_v6, %v113_v43 }
  0x67   :  { %v10557_v55 = vrot.slane %v5945_v47, 2  ;;  %v10555_v0 = vrot.slane %v5963_v56, 4  ;;  %v10556_v12 = vrot.slane %v5975_v1, 2  ;;  %v10554_v13 = vrot.slane %v5978_v2, 4 }
  0x69   :  { %v545_v63 = vsel %vm535_vm0, %v543_v54, %v10557_v55  ;;  %v869_v11 = vsel %vm859_vm1, %v867_v60, %v10555_v0  ;;  %v6036_v31 = vsel %vm535_vm0, %v1316_v8, %v10556_v12  ;;  %v6041_v32 = vsel %vm859_vm1, %v1639_v10, %v10554_v13 }
  0x6a   :  { %292 = vperm.xlu2 %5784, %v62_v48   ;;  %v694_v9 = vadd.f32 %v545_v63, %v370_v59 }
  0x6b   :  { %287 = vperm.xlu1 %5783, %v61_v49   ;;  %282 = vperm.xlu0 %5782, %v60_v50  }
  0x6c   :  { %v128_v58 = vpop.permute.xlu2 %127  ;;  %v1018_v25 = vadd.f32 %v869_v11, %v694_v9 }
  0x6d   :  { %v6009_v19 = vmul.f32 %v5936_v42, %v128_v58  ;;  %v6012_v20 = vmul.f32 %v5938_v44, %v128_v58  ;;  %v1095_v26 = vmul.f32 %v5989_v6, %v128_v58  ;;  %v6022_v27 = vmul.f32 %v5956_v51, %v128_v58 }
  0x6e   :  { %v6025_v28 = vmul.f32 %v5958_v52, %v128_v58  ;;  %v6044_v33 = vmul.f32 %v5965_v57, %v128_v58  ;;  %v6060_v41 = vmul.f32 %v5999_v14, %v128_v58  ;;  %v6063_v43 = vmul.f32 %v6001_v15, %v128_v58 }
  0x6f   :  { %10756 = vst [vmem:[#allocation3_spill] sm:$0xff] %v6012_v20  ;;  %v6065_v45 = vadd.f32 %v1095_v26, %v1018_v25  ;;  %v6070_v49 = vmul.f32 %v6003_v17, %v128_v58 }
  0x70   :  { %10757 = vst [vmem:[#allocation4_spill] sm:$0xff] %v6025_v28 }
  0x71   :  { %10758 = vst [vmem:[#allocation5_spill] sm:$0xff] %v6044_v33 }
  0x72   :  { %307 = vperm.xlu2 %5784, %v65_v3  }
  0x73   :  { %302 = vperm.xlu1 %5783, %v64_v4   ;;  %297 = vperm.xlu0 %5782, %v63_v5  }
  0x74   :  { %v143_v16 = vpop.permute.xlu2 %142 }
  0x75   :  { %v6015_v21 = vmul.f32 %v5936_v42, %v143_v16  ;;  %v98_v22 = vpop.permute.xlu1 %97  ;;  %v88_v23 = vpop.permute.xlu0 %87  ;;  %v377_v34 = vmul.f32 %v5965_v57, %v143_v16  ;;  %v6049_v36 = vmul.f32 %v5938_v44, %v143_v16  ;;  %v6082_v58 = vmul.f32 %v5956_v51, %v143_v16 }
  0x76   :  { %v425_v48 = vmul.f32 %v5936_v42, %v98_v22  ;;  %v6074_v53 = vmul.f32 %v5938_v44, %v98_v22  ;;  %v423_v54 = vmul.f32 %v5936_v42, %v88_v23  ;;  %v747_v59 = vmul.f32 %v5938_v44, %v88_v23 }
  0x77   :  { %v10553_v35 = vrot.slane %v6015_v21, 2  ;;  %v10552_v61 = vrot.slane %v6049_v36, 4  ;;  %v6085_v63 = vmul.f32 %v5958_v52, %v143_v16  ;;  %v6090_v7 = vmul.f32 %v5999_v14, %v143_v16 }
  0x78   :  { %v6093_v8 = vmul.f32 %v6001_v15, %v143_v16  ;;  %v368_v9 = vmul.f32 %v5965_v57, %v98_v22  ;;  %v539_v10 = vrot.slane %v425_v48, 2  ;;  %v366_v11 = vmul.f32 %v5965_v57, %v88_v23  ;;  %v70_v48 = vld [vmem:[%s10547_s0 + $0x188] sm:$0xff] }
  0x79   :  { %v701_v60 = vadd.f32 %v10553_v35, %v377_v34  ;;  %v6098_v26 = vmul.f32 %v5989_v6, %v143_v16  ;;  %v536_v34 = vrot.slane %v423_v54, 2  ;;  %v6105_v40 = vmul.f32 %v6003_v17, %v143_v16 }
  0x7a   :  { %322 = vperm.xlu2 %5784, %v68_v29   ;;  %v863_v29 = vrot.slane %v6074_v53, 4  ;;  %v69_v53 = vld [vmem:[%s10547_s0 + $0x180] sm:$0xff] }
  0x7b   :  { %317 = vperm.xlu1 %5783, %v67_v37   ;;  %312 = vperm.xlu0 %5782, %v66_v38   ;;  %v860_v37 = vrot.slane %v747_v59, 4  ;;  %v71_v38 = vld [vmem:[%s10547_s0 + $0x190] sm:$0xff]  ;;  %v6109_v22 = vadd.f32 %v10552_v61, %v701_v60 }
  0x7c   :  { %v158_v62 = vpop.permute.xlu2 %157 }
  0x7d   :  { %v103_v5 = vpop.permute.xlu1 %102  ;;  %v93_v25 = vpop.permute.xlu0 %92  ;;  %10759 = vst [vmem:[#allocation6_spill] sm:$0xff] %v6109_v22  ;;  %v6125_v4 = vmul.f32 %v5965_v57, %v158_v62  ;;  %v6128_v39 = vmul.f32 %v5936_v42, %v158_v62  ;;  %v6132_v35 = vmul.f32 %v5938_v44, %v158_v62  ;;  %v6135_v13 = vmul.f32 %v5956_v51, %v158_v62 }
  0x7e   :  { %v426_v23 = vmul.f32 %v5936_v42, %v103_v5  ;;  %v750_v16 = vmul.f32 %v5938_v44, %v103_v5  ;;  %v424_v50 = vmul.f32 %v5936_v42, %v93_v25  ;;  %v748_v61 = vmul.f32 %v5938_v44, %v93_v25 }
  0x7f   :  { %10760 = vst [vmem:[#allocation7_spill] sm:$0xff] %v6125_v4  ;;  %v6138_v59 = vmul.f32 %v5958_v52, %v158_v62  ;;  %v6141_v0 = vmul.f32 %v5999_v14, %v158_v62  ;;  %v367_v12 = vmul.f32 %v5965_v57, %v93_v25 }
  0x80   :  { %v541_v3 = vrot.slane %v426_v23, 2  ;;  %10761 = vst [vmem:[#allocation8_spill] sm:$0xff] %v6132_v35  ;;  %v537_v46 = vrot.slane %v424_v50, 2  ;;  %v369_v23 = vmul.f32 %v5965_v57, %v103_v5  ;;  %v865_v54 = vrot.slane %v750_v16, 4 }
  0x81   :  { %10762 = vst [vmem:[#allocation9_spill] sm:$0xff] %v6138_v59  ;;  %v6151_v50 = vmul.f32 %v5989_v6, %v158_v62  ;;  %v6154_v5 = vmul.f32 %v6003_v17, %v158_v62 }
  0x82   :  { %337 = vperm.xlu2 %5784, %v71_v38   ;;  %v542_v60 = vsel %vm535_vm0, %v539_v10, %v541_v3  ;;  %v861_v38 = vrot.slane %v748_v61, 4  ;;  %v538_v55 = vsel %vm535_vm0, %v536_v34, %v537_v46  ;;  %v540_v4 = vsel %vm535_vm0, %v537_v46, %v539_v10  ;;  %v74_v46 = vld [vmem:[%s10547_s0 + $0x1a8] sm:$0xff] }
  0x83   :  { %332 = vperm.xlu1 %5783, %v70_v48   ;;  %327 = vperm.xlu0 %5782, %v69_v53   ;;  %v692_v48 = vadd.f32 %v542_v60, %v368_v9  ;;  %v693_v53 = vadd.f32 %v541_v3, %v369_v23  ;;  %v690_v20 = vadd.f32 %v538_v55, %v366_v11 }
  0x84   :  { %v6148_v22 = vpop.permute.xlu2 %172  ;;  %10763 = vst [vmem:[#allocation10_spill] sm:$0xff] %v6154_v5  ;;  %v6157_v61 = vmul.f32 %v6001_v15, %v158_v62  ;;  %v691_v16 = vadd.f32 %v540_v4, %v367_v12  ;;  %v862_v25 = vsel %vm859_vm1, %v860_v37, %v861_v38  ;;  %v73_v62 = vld [vmem:[%s10547_s0 + $0x1a0] sm:$0xff]  ;;  %v72_v12 = vld [vmem:[%s10547_s0 + $0x198] sm:$0xff] }
  0x85   :  { %v1014_v9 = vadd.f32 %v862_v25, %v690_v20  ;;  %v6167_v55 = vmul.f32 %v5936_v42, %v6148_v22  ;;  %v866_v20 = vsel %vm859_vm1, %v863_v29, %v865_v54  ;;  %v123_v37 = vpop.permute.xlu1 %122  ;;  %v1017_v23 = vadd.f32 %v865_v54, %v693_v53  ;;  %v118_v53 = vpop.permute.xlu0 %117 }
  0x86   :  { %10764 = vst [vmem:[#allocation11_spill] sm:$0xff] %v6157_v61  ;;  %v1016_v60 = vadd.f32 %v866_v20, %v692_v48  ;;  %v864_v25 = vsel %vm859_vm1, %v861_v38, %v863_v29  ;;  %v6182_v34 = vmul.f32 %v5965_v57, %v6148_v22  ;;  %v6188_v4 = vmul.f32 %v5938_v44, %v6148_v22 }
  0x87   :  { %10765 = vst [vmem:[#allocation12_spill] sm:$0xff] %v6167_v55  ;;  %v1015_v5 = vadd.f32 %v864_v25, %v691_v16  ;;  %v1147_v3 = vadd.f32 %v6006_v18, %v1014_v9  ;;  %v6193_v29 = vmul.f32 %v5989_v6, %v6148_v22  ;;  %v430_v38 = vmul.f32 %v5936_v42, %v123_v37  ;;  %v77_v55 = vld [vmem:[%s10547_s0 + $0x1c0] sm:$0xff] }
  0x88   :  { %10766 = vst [vmem:[#allocation13_spill] sm:$0xff] %v6182_v34  ;;  %v6197_v48 = vmul.f32 %v5938_v44, %v123_v37  ;;  %v6201_v18 = vmul.f32 %v5956_v51, %v6148_v22  ;;  %v1094_v16 = vmul.f32 %v5989_v6, %v123_v37  ;;  %v6206_v9 = vmul.f32 %v5958_v52, %v123_v37 }
  0x89   :  { %10767 = vst [vmem:[#allocation14_spill] sm:$0xff] %v6188_v4  ;;  %v373_v20 = vmul.f32 %v5965_v57, %v123_v37  ;;  %v548_v25 = vrot.slane %v430_v38, 2  ;;  %v1470_v54 = vadd.f32 %v6036_v31, %v1147_v3  ;;  %v429_v34 = vmul.f32 %v5936_v42, %v118_v53  ;;  %v75_v31 = vld [vmem:[%s10547_s0 + $0x1b0] sm:$0xff] }
  0x8a   :  { %352 = vperm.xlu2 %5784, %v74_v46   ;;  %10768 = vst [vmem:[#allocation15_spill] sm:$0xff] %v6193_v29  ;;  %v1207_v46 = vmul.f32 %v5956_v51, %v123_v37  ;;  %v1150_v10 = vadd.f32 %v1094_v16, %v1017_v23  ;;  %v872_v61 = vrot.slane %v6197_v48, 4  ;;  %v1644_v59 = vrot.slane %v6206_v9, 4  ;;  %v76_v37 = vld [vmem:[%s10547_s0 + $0x1b8] sm:$0xff] }
  0x8b   :  { %347 = vperm.xlu1 %5783, %v73_v62   ;;  %342 = vperm.xlu0 %5782, %v72_v12   ;;  %v6210_v62 = vmul.f32 %v5958_v52, %v6148_v22  ;;  %v6214_v12 = vmul.f32 %v6003_v17, %v6148_v22  ;;  %v697_v29 = vadd.f32 %v548_v25, %v373_v20  ;;  %v546_v23 = vrot.slane %v429_v34, 2 }
  0x8c   :  { %v1321_v11 = vrot.slane %v1207_v46, 2  ;;  %v1093_v38 = vmul.f32 %v5989_v6, %v118_v53  ;;  %v1206_v16 = vmul.f32 %v5956_v51, %v118_v53  ;;  %v1148_v48 = vadd.f32 %v6031_v30, %v1015_v5 }
  0x8d   :  { %10769 = vst [vmem:[#allocation16_spill] sm:$0xff] %v6214_v12  ;;  %v753_v12 = vmul.f32 %v5938_v44, %v118_v53  ;;  %v6237_v9 = vmul.f32 %v5999_v14, %v6148_v22  ;;  %v1021_v20 = vadd.f32 %v872_v61, %v697_v29  ;;  %v6241_v35 = vmul.f32 %v6001_v15, %v6148_v22 }
  0x8e   :  { %v1473_v3 = vadd.f32 %v1321_v11, %v1150_v10  ;;  %v10770_v34 = vrot.slane %v5945_v47, 2  ;;  %v1319_v33 = vrot.slane %v1206_v16, 2  ;;  %v1793_v30 = vadd.f32 %v6041_v32, %v1470_v54  ;;  %v188_v54 = vpop.permute.xlu2 %187 }
  0x8f   :  { %v1154_v5 = vadd.f32 %v6098_v26, %v1021_v20  ;;  %v549_v46 = vsel %vm535_vm0, %v546_v23, %v548_v25  ;;  %v372_v22 = vmul.f32 %v5965_v57, %v118_v53  ;;  %v1149_v4 = vadd.f32 %v1093_v38, %v1016_v60 }
  0x90   :  { %v1796_v10 = vadd.f32 %v1644_v59, %v1473_v3  ;;  %v547_v28 = vsel %vm535_vm0, %v10770_v34, %v546_v23  ;;  %v870_v3 = vrot.slane %v753_v12, 4  ;;  %v1322_v26 = vsel %vm535_vm0, %v1319_v33, %v1321_v11  ;;  %v138_v34 = vpop.permute.xlu1 %137 }
  0x91   :  { %v695_v16 = vadd.f32 %v547_v28, %v6018_v24  ;;  %v696_v12 = vadd.f32 %v549_v46, %v372_v22  ;;  %v6263_v60 = vadd.f32 %v6070_v49, %v1793_v30  ;;  %v1472_v20 = vadd.f32 %v1322_v26, %v1149_v4 }
  0x92   :  { %1072 = vperm.xlu2 %5784, %v77_v55   ;;  %v1529_v55 = vmul.f32 %v5958_v52, %v118_v53  ;;  %v1929_v29 = vadd.f32 %v6105_v40, %v1796_v10  ;;  %v10772_v40 = vrot.slane %v6082_v58, 2  ;;  %v6272_v10 = vmul.f32 %v5936_v42, %v188_v54 }
  0x93   :  { %362 = vperm.xlu1 %5783, %v76_v37   ;;  %357 = vperm.xlu0 %5782, %v75_v31   ;;  %v10771_v37 = vrot.slane %v5975_v1, 2  ;;  %v10773_v1 = vrot.slane %v6090_v7, 2  ;;  %v873_v46 = vsel %vm859_vm1, %v870_v3, %v872_v61  ;;  %v6278_v30 = vmul.f32 %v5965_v57, %v188_v54 }
  0x94   :  { %v1477_v53 = vadd.f32 %v10772_v40, %v1154_v5  ;;  %v1642_v23 = vrot.slane %v1529_v55, 4  ;;  %10775 = vst [vmem:[#allocation17_spill] sm:$0xff] %v6272_v10  ;;  %v6281_v5 = vmul.f32 %v5938_v44, %v188_v54  ;;  %v6288_v4 = vmul.f32 %v5989_v6, %v188_v54  ;;  %v10814_v10 = vld [vmem:[#allocation5_spill] sm:$0xff] }
  0x95   :  { %v1320_v32 = vsel %vm535_vm0, %v10771_v37, %v1319_v33  ;;  %v2252_v28 = vadd.f32 %v10773_v1, %v1929_v29  ;;  %v10774_v33 = vrot.slane %v5963_v56, 4  ;;  %10776 = vst [vmem:[#allocation18_spill] sm:$0xff] %v6278_v30  ;;  %v10778_v56 = vrot.slane %v6085_v63, 4 }
  0x96   :  { %v1471_v38 = vadd.f32 %v1320_v32, %v1148_v48  ;;  %10777 = vst [vmem:[#allocation19_spill] sm:$0xff] %v6281_v5  ;;  %v1020_v48 = vadd.f32 %v873_v46, %v696_v12  ;;  %v6291_v29 = vmul.f32 %v5956_v51, %v188_v54  ;;  %v10780_v61 = vrot.slane %v6093_v8, 4 }
  0x97   :  { %v871_v11 = vsel %vm859_vm1, %v10774_v33, %v870_v3  ;;  %v6285_v55 = vadd.f32 %v10778_v56, %v1477_v53  ;;  %v10782_v3 = vrot.slane %v5978_v2, 4  ;;  %v1645_v37 = vsel %vm859_vm1, %v1642_v23, %v1644_v59  ;;  %v133_v53 = vpop.permute.xlu0 %132 }
  0x98   :  { %v6275_v49 = vadd.f32 %v871_v11, %v695_v16  ;;  %10779 = vst [vmem:[#allocation20_spill] sm:$0xff] %v6291_v29  ;;  %v6295_v22 = vadd.f32 %v10780_v61, %v2252_v28  ;;  %v6302_v32 = vmul.f32 %v5936_v42, %v138_v34  ;;  %v1795_v40 = vadd.f32 %v1645_v37, %v1472_v20 }
  0x99   :  { %v1643_v16 = vsel %vm859_vm1, %v10782_v3, %v1642_v23  ;;  %v6306_v12 = vmul.f32 %v5938_v44, %v138_v34  ;;  %v1097_v2 = vmul.f32 %v5989_v6, %v138_v34  ;;  %v6312_v33 = vmul.f32 %v5956_v51, %v138_v34 }
  0x9a   :  { %10781 = vst [vmem:[#allocation21_spill] sm:$0xff] %v6295_v22  ;;  %v1794_v26 = vadd.f32 %v1643_v16, %v1471_v38  ;;  %v10570_v28 = vrot.slane %v6302_v32, 2  ;;  %v376_v59 = vmul.f32 %v5965_v57, %v138_v34  ;;  %v6317_v11 = vmul.f32 %v5958_v52, %v138_v34 }
  0x9b   :  { %v10573_v23 = vrot.slane %v6306_v12, 4  ;;  %v1872_v38 = vmul.f32 %v6003_v17, %v138_v34  ;;  %v10783_v20 = vrot.slane %v6015_v21, 2  ;;  %v10574_v56 = vrot.slane %v6312_v33, 2 }
  0x9c   :  { %v1985_v61 = vmul.f32 %v5999_v14, %v138_v34  ;;  %v6328_v3 = vmul.f32 %v6001_v15, %v138_v34  ;;  %v2706_v16 = vmul.f32 %v6295_v22, %v6295_v22  ;;  %v6334_v1 = vmul.f32 %v5958_v52, %v188_v54 }
  0x9d   :  { %v556_v46 = vsel %vm535_vm0, %v10570_v28, %v10783_v20  ;;  %v6337_v24 = vmul.f32 %v5999_v14, %v188_v54  ;;  %v6340_v20 = vmul.f32 %v6001_v15, %v188_v54  ;;  %v1153_v25 = vadd.f32 %v1097_v2, %v1020_v48 }
  0x9e   :  { %10784 = vst [vmem:[#allocation22_spill] sm:$0xff] %v6334_v1  ;;  %v700_v21 = vadd.f32 %v556_v46, %v376_v59  ;;  %v2098_v47 = vrot.slane %v1985_v61, 2  ;;  %v6344_v34 = vsel %vm859_vm1, %v6295_v22, 0.0  ;;  %v10787_v31 = vrot.slane %v6049_v36, 4 }
  0x9f   :  { %10785 = vst [vmem:[#allocation23_spill] sm:$0xff] %v6337_v24  ;;  %v10788_v59 = vrot.slane %v6082_v58, 2  ;;  %v1928_v28 = vadd.f32 %v1872_v38, %v1795_v40  ;;  %v10789_v2 = vrot.slane %v6090_v7, 2  ;;  %v2421_v22 = vrot.slane %v6328_v3, 4  ;;  %v80_v40 = vld [vmem:[%s10547_s0 + $0x1d8] sm:$0xff]  ;;  %v79_v7 = vld [vmem:[%s10547_s0 + $0x1d0] sm:$0xff] }
  0xa0   :  { %10786 = vst [vmem:[#allocation24_spill] sm:$0xff] %v6340_v20  ;;  %v880_v37 = vsel %vm859_vm1, %v10573_v23, %v10787_v31  ;;  %v432_v36 = vmul.f32 %v5936_v42, %v133_v53  ;;  %v6363_v5 = vsel %vm859_vm1, %v2706_v16, 0.0  ;;  %v6367_v31 = vmul.f32 %v6003_v17, %v188_v54  ;;  %v78_v38 = vld [vmem:[%s10547_s0 + $0x1c8] sm:$0xff]  ;;  %1087 = vperm.xlu2 %5784, %v80_v40  }
  0xa1   :  { %v1329_v46 = vsel %vm535_vm0, %v10574_v56, %v10788_v59  ;;  %v2101_v61 = vsel %vm535_vm0, %v2098_v47, %v10789_v2  ;;  %v1024_v59 = vadd.f32 %v880_v37, %v700_v21  ;;  %v1209_v54 = vmul.f32 %v5956_v51, %v133_v53  ;;  %1082 = vperm.xlu1 %5783, %v79_v7   ;;  %v203_v56 = vpop.permute.xlu2 %202 }
  0xa2   :  { %10790 = vst [vmem:[#allocation25_spill] sm:$0xff] %v6367_v31  ;;  %v1476_v2 = vadd.f32 %v1329_v46, %v1153_v25  ;;  %v2251_v37 = vadd.f32 %v2101_v61, %v1928_v28  ;;  %v375_v21 = vmul.f32 %v5965_v57, %v133_v53  ;;  %v1096_v58 = vmul.f32 %v5989_v6, %v133_v53  ;;  %v10815_v31 = vld [vmem:[#allocation4_spill] sm:$0xff] }
  0xa3   :  { %v1871_v23 = vmul.f32 %v6003_v17, %v133_v53  ;;  %1077 = vperm.xlu0 %5782, %v78_v38   ;;  %v10791_v48 = vrot.slane %v6085_v63, 4  ;;  %v10792_v3 = vrot.slane %v6317_v11, 4  ;;  %v10793_v25 = vrot.slane %v6093_v8, 4 }
  0xa4   :  { %v551_v40 = vrot.slane %v432_v36, 2  ;;  %v1984_v28 = vmul.f32 %v5999_v14, %v133_v53  ;;  %v6394_v61 = vadd.f32 %v6151_v50, %v1024_v59  ;;  %v6397_v7 = vmul.f32 %v5938_v44, %v133_v53 }
  0xa5   :  { %v1652_v16 = vsel %vm859_vm1, %v10792_v3, %v10791_v48  ;;  %v2424_v46 = vsel %vm859_vm1, %v2421_v22, %v10793_v25  ;;  %v1927_v38 = vadd.f32 %v1871_v23, %v1794_v26  ;;  %v2307_v63 = vmul.f32 %v6001_v15, %v133_v53 }
  0xa6   :  { %v6400_v1 = vadd.f32 %v1652_v16, %v1476_v2  ;;  %v1324_v30 = vrot.slane %v1209_v54, 2  ;;  %v2096_v48 = vrot.slane %v1984_v28, 2  ;;  %v6403_v8 = vmul.f32 %v5936_v42, %v203_v56 }
  0xa7   :  { %v6405_v3 = vadd.f32 %v2424_v46, %v2251_v37  ;;  %v1152_v36 = vadd.f32 %v1096_v58, %v6275_v49  ;;  %v6409_v50 = vmul.f32 %v5958_v52, %v133_v53  ;;  %v2419_v59 = vrot.slane %v2307_v63, 4 }
  0xa8   :  { %10794 = vst [vmem:[#allocation26_spill] sm:$0xff] %v6403_v8  ;;  %v10796_v25 = vrot.slane %v6302_v32, 2  ;;  %v10797_v23 = vrot.slane %v6060_v41, 2  ;;  %v2099_v2 = vsel %vm535_vm0, %v2096_v48, %v2098_v47  ;;  %v10577_v54 = vrot.slane %v6403_v8, 2 }
  0xa9   :  { %10795 = vst [vmem:[#allocation27_spill] sm:$0xff] %v6405_v3  ;;  %v2250_v46 = vadd.f32 %v2099_v2, %v1927_v38  ;;  %v389_v49 = vmul.f32 %v5965_v57, %v203_v56  ;;  %v6422_v53 = vmul.f32 %v5938_v44, %v203_v56  ;;  %v10799_v32 = vrot.slane %v6009_v19, 2 }
  0xaa   :  { %v554_v26 = vsel %vm535_vm0, %v551_v40, %v10796_v25  ;;  %v2097_v16 = vsel %vm535_vm0, %v10797_v23, %v2096_v48  ;;  %v10581_v41 = vrot.slane %v6397_v7, 4  ;;  %v10800_v28 = vrot.slane %v6312_v33, 2  ;;  %v153_v25 = vpop.permute.xlu1 %152 }
  0xab   :  { %v2249_v37 = vadd.f32 %v2097_v16, %v6263_v60  ;;  %10798 = vst [vmem:[#allocation28_spill] sm:$0xff] %v6422_v53  ;;  %v552_v58 = vsel %vm535_vm0, %v10799_v32, %v551_v40  ;;  %v6432_v63 = vmul.f32 %v5956_v51, %v203_v56  ;;  %v10802_v60 = vrot.slane %v6063_v43, 4 }
  0xac   :  { %v1327_v47 = vsel %vm535_vm0, %v1324_v30, %v10800_v28  ;;  %v2422_v48 = vsel %vm859_vm1, %v2419_v59, %v2421_v22  ;;  %v713_v19 = vadd.f32 %v10577_v54, %v389_v49  ;;  %v6441_v40 = vmul.f32 %v5958_v52, %v203_v56 }
  0xad   :  { %10801 = vst [vmem:[#allocation29_spill] sm:$0xff] %v6432_v63  ;;  %v2420_v38 = vsel %vm859_vm1, %v10802_v60, %v2419_v59  ;;  %v699_v23 = vadd.f32 %v554_v26, %v375_v21  ;;  %v1647_v33 = vrot.slane %v6409_v50, 4  ;;  %v6446_v2 = vadd.f32 %v2422_v48, %v2250_v46 }
  0xae   :  { %10803 = vst [vmem:[#allocation30_spill] sm:$0xff] %v6441_v40  ;;  %v6444_v16 = vadd.f32 %v2420_v38, %v2249_v37  ;;  %v2705_v43 = vmul.f32 %v6405_v3, %v6405_v3  ;;  %v10806_v32 = vrot.slane %v6022_v27, 2  ;;  %v1475_v59 = vadd.f32 %v1327_v47, %v1152_v36 }
  0xaf   :  { %10805 = vst [vmem:[#allocation32_spill] sm:$0xff] %v6446_v2  ;;  %v10576_v49 = vrot.slane %v6422_v53, 4  ;;  %v6455_v28 = vmul.f32 %v5989_v6, %v203_v56  ;;  %v6459_v50 = vmul.f32 %v6003_v17, %v203_v56  ;;  %v6462_v26 = vmul.f32 %v5936_v42, %v153_v25 }
  0xb0   :  { %10804 = vst [vmem:[#allocation31_spill] sm:$0xff] %v6444_v16  ;;  %v1325_v22 = vsel %vm535_vm0, %v10806_v32, %v1324_v30  ;;  %v6470_v30 = vmul.f32 %v5999_v14, %v203_v56  ;;  %v6473_v36 = vmul.f32 %v6001_v15, %v203_v56  ;;  %v2703_v46 = vmul.f32 %v6444_v16, %v6444_v16 }
  0xb1   :  { %v6466_v37 = vadd.f32 %v10576_v49, %v713_v19  ;;  %v2704_v47 = vmul.f32 %v6446_v2, %v6446_v2  ;;  %v6481_v38 = vmul.f32 %v5956_v51, %v153_v25  ;;  %v2628_v48 = vadd.f32 %v6446_v2, %v6444_v16 }
  0xb2   :  { %v6486_v19 = vmul.f32 %v5938_v44, %v153_v25  ;;  %v10808_v56 = vrot.slane %v6306_v12, 4  ;;  %v1875_v27 = vmul.f32 %v6003_v17, %v153_v25  ;;  %v379_v49 = vmul.f32 %v5965_v57, %v153_v25 }
  0xb3   :  { %10807 = vst [vmem:[#allocation33_spill] sm:$0xff] %v6466_v37  ;;  %v1100_v54 = vmul.f32 %v5989_v6, %v153_v25  ;;  %v10809_v60 = vrot.slane %v6317_v11, 4  ;;  %v10810_v16 = vrot.slane %v6128_v39, 2  ;;  %v10811_v37 = vrot.slane %v6462_v26, 2 }
  0xb4   :  { %v878_v32 = vsel %vm859_vm1, %v10581_v41, %v10808_v56  ;;  %v1331_v20 = vrot.slane %v6481_v38, 2  ;;  %v1988_v41 = vmul.f32 %v5999_v14, %v153_v25  ;;  %v2759_v29 = vadd.f32 %v2704_v47, %v2703_v46 }
  0xb5   :  { %v1023_v21 = vadd.f32 %v878_v32, %v699_v23  ;;  %v1650_v2 = vsel %vm859_vm1, %v1647_v33, %v10809_v60  ;;  %v561_v12 = vsel %vm535_vm0, %v10811_v37, %v10810_v16  ;;  %v6508_v32 = vmul.f32 %v5958_v52, %v153_v25  ;;  %v81_v37 = vld [vmem:[%s10547_s0 + $0x1e0] sm:$0xff] }
  0xb6   :  { %v1798_v56 = vadd.f32 %v1650_v2, %v1475_v59  ;;  %v6511_v11 = vmul.f32 %v6001_v15, %v153_v25  ;;  %v2629_v60 = vadd.f32 %v2628_v48, %v6405_v3  ;;  %v2103_v16 = vrot.slane %v1988_v41, 2  ;;  %v83_v2 = vld [vmem:[%s10547_s0 + $0x1f0] sm:$0xff]  ;;  %v82_v59 = vld [vmem:[%s10547_s0 + $0x1e8] sm:$0xff]  ;;  %1851 = vperm.xlu0 %5782, %v81_v37  }
  0xb7   :  { %v703_v46 = vadd.f32 %v561_v12, %v379_v49  ;;  %v1156_v47 = vadd.f32 %v1100_v54, %v1023_v21  ;;  %v1474_v38 = vadd.f32 %v1325_v22, %v6065_v45  ;;  %1861 = vperm.xlu2 %5784, %v83_v2   ;;  %1856 = vperm.xlu1 %5783, %v82_v59   ;;  %v10812_v41 = vrot.slane %v6135_v13, 2  ;;  %v10817_v12 = vld [vmem:[#allocation8_spill] sm:$0xff] }
  0xb8   :  { %v1931_v24 = vadd.f32 %v1875_v27, %v1798_v56  ;;  %v148_v27 = vpop.permute.xlu0 %147  ;;  %v10813_v56 = vrot.slane %v6141_v0, 2  ;;  %v698_v3 = vadd.f32 %v552_v58, %v10814_v10  ;;  %v10816_v40 = vrot.slane %v10815_v31, 4  ;;  %v10821_v58 = vld [vmem:[#allocation3_spill] sm:$0xff] }
  0xb9   :  { %v1334_v48 = vsel %vm535_vm0, %v1331_v20, %v10812_v41  ;;  %v2760_v54 = vadd.f32 %v2759_v29, %v2705_v43  ;;  %v1654_v45 = vrot.slane %v6508_v32, 4  ;;  %v2426_v22 = vrot.slane %v6511_v11, 4 }
  0xba   :  { %v2106_v23 = vsel %vm535_vm0, %v2103_v16, %v10813_v56  ;;  %v1648_v49 = vsel %vm859_vm1, %v10816_v40, %v1647_v33  ;;  %v10818_v2 = vrot.slane %v10817_v12, 4  ;;  %v10819_v59 = vrot.slane %v6486_v19, 4 }
  0xbb   :  { %v1797_v21 = vadd.f32 %v1648_v49, %v1474_v38  ;;  %v2254_v56 = vadd.f32 %v2106_v23, %v1931_v24  ;;  %v10820_v10 = vrot.slane %v6397_v7, 4  ;;  %v10822_v31 = vrot.slane %v10821_v58, 4  ;;  %v10823_v23 = vld [vmem:[#allocation9_spill] sm:$0xff] }
  0xbc   :  { %v885_v41 = vsel %vm859_vm1, %v10819_v59, %v10818_v2  ;;  %v435_v29 = vmul.f32 %v5936_v42, %v148_v27  ;;  %v1479_v43 = vadd.f32 %v1334_v48, %v1156_v47  ;;  %v1212_v32 = vmul.f32 %v5956_v51, %v148_v27  ;;  %v10825_v59 = vld [vmem:[#allocation11_spill] sm:$0xff] }
  0xbd   :  { %v876_v40 = vsel %vm859_vm1, %v10822_v31, %v10820_v10  ;;  %v1027_v33 = vadd.f32 %v885_v41, %v703_v46  ;;  %v1874_v11 = vmul.f32 %v6003_v17, %v148_v27  ;;  %v1099_v49 = vmul.f32 %v5989_v6, %v148_v27 }
  0xbe   :  { %v1022_v37 = vadd.f32 %v876_v40, %v698_v3  ;;  %v557_v38 = vrot.slane %v435_v29, 2  ;;  %v1987_v24 = vmul.f32 %v5999_v14, %v148_v27  ;;  %v10824_v7 = vrot.slane %v10823_v23, 4  ;;  %v218_v40 = vpop.permute.xlu2 %217  ;;  %v10828_v29 = vld [vmem:[#allocation15_spill] sm:$0xff] }
  0xbf   :  { %v10826_v10 = vrot.slane %v10825_v59, 4  ;;  %v1330_v46 = vrot.slane %v1212_v32, 2  ;;  %v1930_v47 = vadd.f32 %v1874_v11, %v1797_v21  ;;  %v759_v41 = vmul.f32 %v5938_v44, %v148_v27 }
  0xc0   :  { %v1657_v2 = vsel %vm859_vm1, %v1654_v45, %v10824_v7  ;;  %v2102_v3 = vrot.slane %v1987_v24, 2  ;;  %v2310_v31 = vmul.f32 %v6001_v15, %v148_v27  ;;  %v6564_v25 = vadd.f32 %v10828_v29, %v1027_v33 }
  0xc1   :  { %v2429_v58 = vsel %vm859_vm1, %v2426_v22, %v10826_v10  ;;  %v6566_v53 = vadd.f32 %v1657_v2, %v1479_v43  ;;  %v2631_v7 = vadd.f32 %v6344_v34, %v2629_v60  ;;  %v1535_v63 = vmul.f32 %v5958_v52, %v148_v27  ;;  %v168_v34 = vpop.permute.xlu1 %167 }
  0xc2   :  { %v6559_v48 = vadd.f32 %v2429_v58, %v2254_v56  ;;  %10829 = vst [vmem:[#allocation4_spill] sm:$0xff] %v6564_v25  ;;  %v10830_v32 = vrot.slane %v6462_v26, 2  ;;  %v1155_v56 = vadd.f32 %v1099_v49, %v1022_v37  ;;  %v2104_v11 = vsel %vm535_vm0, %v2102_v3, %v2103_v16 }
  0xc3   :  { %v2425_v24 = vrot.slane %v2310_v31, 4  ;;  %v1332_v10 = vsel %vm535_vm0, %v1330_v46, %v1331_v20  ;;  %v2253_v58 = vadd.f32 %v2104_v11, %v1930_v47  ;;  %v6576_v33 = vmul.f32 %v5936_v42, %v218_v40 }
  0xc4   :  { %10827 = vst [vmem:[#allocation5_spill] sm:$0xff] %v6559_v48  ;;  %v559_v21 = vsel %vm535_vm0, %v557_v38, %v10830_v32  ;;  %v6579_v43 = vmul.f32 %v5938_v44, %v218_v40  ;;  %v6583_v60 = vmul.f32 %v6559_v48, %v6559_v48  ;;  %v2762_v26 = vadd.f32 %v6363_v5, %v2760_v54 }
  0xc5   :  { %10831 = vst [vmem:[#allocation8_spill] sm:$0xff] %v6576_v33  ;;  %v378_v37 = vmul.f32 %v5965_v57, %v148_v27  ;;  %v881_v16 = vrot.slane %v759_v41, 4  ;;  %v1653_v38 = vrot.slane %v1535_v63, 4  ;;  %v2427_v20 = vsel %vm859_vm1, %v2425_v24, %v2426_v22 }
  0xc6   :  { %10832 = vst [vmem:[#allocation3_spill] sm:$0xff] %v6579_v43  ;;  %v6589_v49 = vmul.f32 %v5965_v57, %v218_v40  ;;  %v6592_v2 = vmul.f32 %v5956_v51, %v218_v40  ;;  %v1478_v47 = vadd.f32 %v1332_v10, %v1155_v56  ;;  %v6594_v3 = vadd.f32 %v2427_v20, %v2253_v58  ;;  %v10840_v58 = vld [vmem:[#allocation12_spill] sm:$0xff] }
  0xc7   :  { %v702_v46 = vadd.f32 %v559_v21, %v378_v37  ;;  %v439_v31 = vmul.f32 %v5936_v42, %v168_v34  ;;  %v6600_v63 = vmul.f32 %v5989_v6, %v218_v40  ;;  %v763_v54 = vmul.f32 %v5938_v44, %v168_v34 }
  0xc8   :  { %10833 = vst [vmem:[#allocation9_spill] sm:$0xff] %v6589_v49  ;;  %v6604_v22 = vmul.f32 %v5958_v52, %v218_v40  ;;  %v6607_v41 = vmul.f32 %v6003_v17, %v218_v40  ;;  %v6610_v29 = vmul.f32 %v5999_v14, %v218_v40  ;;  %v6614_v56 = vmul.f32 %v6001_v15, %v218_v40 }
  0xc9   :  { %10834 = vst [vmem:[#allocation11_spill] sm:$0xff] %v6592_v2  ;;  %v564_v32 = vrot.slane %v439_v31, 2  ;;  %v382_v11 = vmul.f32 %v5965_v57, %v168_v34  ;;  %v1655_v24 = vsel %vm859_vm1, %v1653_v38, %v1654_v45  ;;  %v2707_v10 = vmul.f32 %v6594_v3, %v6594_v3  ;;  %v10843_v45 = vld [vmem:[#allocation14_spill] sm:$0xff] }
  0xca   :  { %10835 = vst [vmem:[#allocation15_spill] sm:$0xff] %v6594_v3  ;;  %v10841_v37 = vrot.slane %v10840_v58, 2  ;;  %v1216_v27 = vmul.f32 %v5956_v51, %v168_v34  ;;  %v1801_v5 = vadd.f32 %v1655_v24, %v1478_v47  ;;  %v10842_v31 = vrot.slane %v6486_v19, 4 }
  0xcb   :  { %10836 = vst [vmem:[#allocation34_spill] sm:$0xff] %v6600_v63  ;;  %v888_v40 = vrot.slane %v763_v54, 4  ;;  %v1539_v49 = vmul.f32 %v5958_v52, %v168_v34  ;;  %v1103_v2 = vmul.f32 %v5989_v6, %v168_v34  ;;  %v1991_v43 = vmul.f32 %v5999_v14, %v168_v34 }
  0xcc   :  { %10837 = vst [vmem:[#allocation35_spill] sm:$0xff] %v6604_v22  ;;  %v566_v20 = vsel %vm535_vm0, %v564_v32, %v10841_v37  ;;  %v883_v21 = vsel %vm859_vm1, %v881_v16, %v10842_v31  ;;  %v163_v32 = vpop.permute.xlu0 %162  ;;  %v2632_v37 = vadd.f32 %v2631_v7, %v6594_v3  ;;  %v2314_v16 = vmul.f32 %v6001_v15, %v168_v34 }
  0xcd   :  { %10838 = vst [vmem:[#allocation36_spill] sm:$0xff] %v6607_v41  ;;  %v1878_v41 = vmul.f32 %v6003_v17, %v168_v34  ;;  %v1026_v38 = vadd.f32 %v883_v21, %v702_v46  ;;  %v706_v19 = vadd.f32 %v566_v20, %v382_v11  ;;  %v1337_v24 = vrot.slane %v1216_v27, 2  ;;  %v10846_v34 = vld [vmem:[#allocation10_spill] sm:$0xff] }
  0xce   :  { %10839 = vst [vmem:[#allocation37_spill] sm:$0xff] %v6614_v56  ;;  %v2109_v33 = vrot.slane %v1991_v43, 2  ;;  %v2763_v63 = vadd.f32 %v2762_v26, %v2707_v10  ;;  %v10844_v46 = vrot.slane %v10843_v45, 4  ;;  %v1660_v22 = vrot.slane %v1539_v49, 4  ;;  %v84_v49 = vld [vmem:[%s10547_s0 + $0x1f8] sm:$0xff] }
  0xcf   :  { %v1934_v31 = vadd.f32 %v1878_v41, %v1801_v5  ;;  %v438_v25 = vmul.f32 %v5936_v42, %v163_v32  ;;  %v1159_v8 = vadd.f32 %v1103_v2, %v1026_v38  ;;  %v10845_v7 = vrot.slane %v6237_v9, 2  ;;  %1866 = vperm.xlu0 %5782, %v84_v49  }
  0xd0   :  { %v890_v21 = vsel %vm859_vm1, %v888_v40, %v10844_v46  ;;  %v1932_v20 = vadd.f32 %v10846_v34, %v6400_v1  ;;  %v1102_v27 = vmul.f32 %v5989_v6, %v163_v32  ;;  %v2432_v43 = vrot.slane %v2314_v16, 4  ;;  %v10849_v16 = vld [vmem:[#allocation6_spill] sm:$0xff] }
  0xd1   :  { %v2111_v11 = vsel %vm535_vm0, %v2109_v33, %v10845_v7  ;;  %v1030_v5 = vadd.f32 %v890_v21, %v706_v19  ;;  %v2633_v26 = vadd.f32 %v2632_v37, %v6559_v48  ;;  %v1215_v41 = vmul.f32 %v5956_v51, %v163_v32 }
  0xd2   :  { %v10847_v2 = vrot.slane %v6201_v18, 2  ;;  %v2257_v33 = vadd.f32 %v2111_v11, %v1934_v31  ;;  %v1877_v40 = vmul.f32 %v6003_v17, %v163_v32  ;;  %v1990_v1 = vmul.f32 %v5999_v14, %v163_v32 }
  0xd3   :  { %v10848_v38 = vrot.slane %v6210_v62, 4  ;;  %v562_v19 = vrot.slane %v438_v25, 2  ;;  %v1158_v46 = vadd.f32 %v1102_v27, %v10849_v16  ;;  %v1335_v21 = vrot.slane %v1215_v41, 2 }
  0xd4   :  { %v1339_v10 = vsel %vm535_vm0, %v1337_v24, %v10847_v2  ;;  %v6661_v7 = vmul.f32 %v5938_v44, %v163_v32  ;;  %v1933_v34 = vadd.f32 %v1877_v40, %v6285_v55  ;;  %v2107_v24 = vrot.slane %v1990_v1, 2 }
  0xd5   :  { %v1662_v37 = vsel %vm859_vm1, %v1660_v22, %v10848_v38  ;;  %v2313_v31 = vmul.f32 %v6001_v15, %v163_v32  ;;  %v1482_v11 = vadd.f32 %v1339_v10, %v1159_v8  ;;  %v10850_v2 = vrot.slane %v6241_v35, 4  ;;  %v233_v22 = vpop.permute.xlu2 %232 }
  0xd6   :  { %v381_v54 = vmul.f32 %v5965_v57, %v163_v32  ;;  %v6670_v25 = vmul.f32 %v5958_v52, %v163_v32  ;;  %v10852_v41 = vrot.slane %v6141_v0, 2  ;;  %v2256_v40 = vadd.f32 %v2107_v24, %v1933_v34 }
  0xd7   :  { %v2434_v49 = vsel %vm859_vm1, %v2432_v43, %v10850_v2  ;;  %v2430_v1 = vrot.slane %v2313_v31, 4  ;;  %v2764_v8 = vadd.f32 %v2763_v63, %v6583_v60  ;;  %v1481_v38 = vadd.f32 %v1335_v21, %v1158_v46 }
  0xd8   :  { %v6672_v27 = vadd.f32 %v2434_v49, %v2257_v33  ;;  %v2108_v55 = vsel %vm535_vm0, %v10852_v41, %v2107_v24  ;;  %v705_v10 = vadd.f32 %v562_v19, %v381_v54  ;;  %v6679_v43 = vadd.f32 %v6288_v4, %v1030_v5  ;;  %v183_v4 = vpop.permute.xlu1 %182 }
  0xd9   :  { %v2255_v16 = vadd.f32 %v2108_v55, %v1932_v20  ;;  %v10601_v32 = vrot.slane %v6661_v7, 4  ;;  %v6683_v2 = vmul.f32 %v5936_v42, %v233_v22  ;;  %v6686_v33 = vmul.f32 %v5938_v44, %v233_v22 }
  0xda   :  { %10851 = vst [vmem:[#allocation12_spill] sm:$0xff] %v6672_v27  ;;  %v10600_v0 = vrot.slane %v6670_v25, 4  ;;  %v10855_v34 = vrot.slane %v10825_v59, 4  ;;  %v6692_v63 = vadd.f32 %v2430_v1, %v2256_v40  ;;  %v6695_v54 = vmul.f32 %v5956_v51, %v233_v22 }
  0xdb   :  { %10853 = vst [vmem:[#allocation14_spill] sm:$0xff] %v6683_v2  ;;  %v6697_v20 = vadd.f32 %v1662_v37, %v1482_v11  ;;  %v6701_v5 = vmul.f32 %v6672_v27, %v6672_v27  ;;  %v10858_v46 = vrot.slane %v6128_v39, 2  ;;  %v1029_v59 = vadd.f32 %v10601_v32, %v705_v10 }
  0xdc   :  { %10854 = vst [vmem:[#allocation10_spill] sm:$0xff] %v6686_v33  ;;  %v2431_v60 = vsel %vm859_vm1, %v10855_v34, %v2430_v1  ;;  %v10860_v49 = vrot.slane %v6135_v13, 2  ;;  %v1804_v37 = vadd.f32 %v10600_v0, %v1481_v38  ;;  %v6716_v11 = vmul.f32 %v5965_v57, %v233_v22  ;;  %v178_v33 = vpop.permute.xlu0 %177 }
  0xdd   :  { %10856 = vst [vmem:[#allocation6_spill] sm:$0xff] %v6692_v63  ;;  %v563_v24 = vsel %vm535_vm0, %v10858_v46, %v562_v19  ;;  %v6706_v31 = vadd.f32 %v2431_v60, %v2255_v16  ;;  %v6721_v19 = vmul.f32 %v5989_v6, %v233_v22  ;;  %v6724_v40 = vmul.f32 %v5936_v42, %v183_v4 }
  0xde   :  { %10857 = vst [vmem:[#allocation38_spill] sm:$0xff] %v6695_v54  ;;  %v1336_v41 = vsel %vm535_vm0, %v10860_v49, %v1335_v21  ;;  %v2635_v13 = vsel %vm859_vm1, %v6692_v63, 0.0  ;;  %v2710_v21 = vmul.f32 %v6692_v63, %v6692_v63  ;;  %v6732_v10 = vmul.f32 %v5958_v52, %v233_v22 }
  0xdf   :  { %10859 = vst [vmem:[#allocation39_spill] sm:$0xff] %v6706_v31  ;;  %v2709_v38 = vmul.f32 %v6706_v31, %v6706_v31  ;;  %v6737_v16 = vmul.f32 %v6003_v17, %v233_v22  ;;  %v1106_v34 = vmul.f32 %v5989_v6, %v183_v4  ;;  %v6741_v60 = vmul.f32 %v5956_v51, %v183_v4 }
  0xe0   :  { %10861 = vst [vmem:[#allocation40_spill] sm:$0xff] %v6716_v11  ;;  %v2634_v46 = vadd.f32 %v2633_v26, %v6706_v31  ;;  %v6745_v49 = vmul.f32 %v5999_v14, %v233_v22  ;;  %v569_v1 = vrot.slane %v6724_v40, 2  ;;  %v6749_v39 = vmul.f32 %v5958_v52, %v183_v4 }
  0xe1   :  { %10862 = vst [vmem:[#allocation41_spill] sm:$0xff] %v6737_v16  ;;  %v6752_v55 = vmul.f32 %v6001_v15, %v233_v22  ;;  %v1162_v47 = vadd.f32 %v1106_v34, %v1029_v59  ;;  %v1342_v0 = vrot.slane %v6741_v60, 2  ;;  %v1881_v32 = vmul.f32 %v6003_v17, %v183_v4 }
  0xe2   :  { %v385_v63 = vmul.f32 %v5965_v57, %v183_v4  ;;  %v6758_v26 = vmul.f32 %v5938_v44, %v183_v4  ;;  %v6761_v31 = vmul.f32 %v5999_v14, %v183_v4  ;;  %v6764_v40 = vmul.f32 %v6001_v15, %v183_v4 }
  0xe3   :  { %v2765_v48 = vadd.f32 %v2764_v8, %v2709_v38  ;;  %v1485_v22 = vadd.f32 %v1342_v0, %v1162_v47  ;;  %v10614_v59 = vrot.slane %v6749_v39, 4  ;;  %v1937_v34 = vadd.f32 %v1881_v32, %v1804_v37  ;;  %v10863_v37 = vld [vmem:[#allocation7_spill] sm:$0xff] }
  0xe4   :  { %v2636_v3 = vadd.f32 %v2635_v13, %v2634_v46  ;;  %v709_v16 = vadd.f32 %v569_v1, %v385_v63  ;;  %v2114_v54 = vrot.slane %v6761_v31, 2  ;;  %v2766_v2 = vsel %vm859_vm1, %v2710_v21, 0.0 }
  0xe5   :  { %v1808_v8 = vadd.f32 %v10614_v59, %v1485_v22  ;;  %v10615_v47 = vrot.slane %v6758_v26, 4  ;;  %v2437_v32 = vrot.slane %v6764_v40, 4  ;;  %v704_v13 = vadd.f32 %v563_v24, %v10863_v37 }
  0xe6   :  { %v2260_v38 = vadd.f32 %v2114_v54, %v1937_v34  ;;  %v2767_v63 = vadd.f32 %v2766_v2, %v2765_v48  ;;  %v1480_v46 = vadd.f32 %v1336_v41, %v6394_v61  ;;  %v441_v21 = vmul.f32 %v5936_v42, %v178_v33 }
  0xe7   :  { %v1941_v31 = vadd.f32 %v6459_v50, %v1808_v8  ;;  %v6783_v11 = vadd.f32 %v2636_v3, %v6672_v27  ;;  %v1033_v22 = vadd.f32 %v10615_v47, %v709_v16  ;;  %v1218_v4 = vmul.f32 %v5956_v51, %v178_v33 }
  0xe8   :  { %v6789_v34 = vadd.f32 %v2437_v32, %v2260_v38  ;;  %v10865_v48 = vrot.slane %v6470_v30, 2  ;;  %v10866_v50 = vrot.slane %v6661_v7, 4  ;;  %v10867_v61 = vrot.slane %v10817_v12, 4 }
  0xe9   :  { %v567_v3 = vrot.slane %v441_v21, 2  ;;  %v6800_v41 = vmul.f32 %v5938_v44, %v178_v33  ;;  %v10868_v8 = vrot.slane %v6670_v25, 4  ;;  %v10869_v38 = vrot.slane %v10823_v23, 4 }
  0xea   :  { %10864 = vst [vmem:[#allocation7_spill] sm:$0xff] %v6789_v34  ;;  %v2264_v2 = vadd.f32 %v10865_v48, %v1941_v31  ;;  %v887_v24 = vsel %vm859_vm1, %v10867_v61, %v10866_v50  ;;  %v1105_v56 = vmul.f32 %v5989_v6, %v178_v33  ;;  %v6809_v31 = vmul.f32 %v5958_v52, %v178_v33  ;;  %v10872_v50 = vld [vmem:[#allocation16_spill] sm:$0xff] }
  0xeb   :  { %v1028_v16 = vadd.f32 %v887_v24, %v704_v13  ;;  %v1659_v37 = vsel %vm859_vm1, %v10869_v38, %v10868_v8  ;;  %v6812_v12 = vadd.f32 %v2767_v63, %v6701_v5  ;;  %v2714_v7 = vmul.f32 %v6789_v34, %v6789_v34 }
  0xec   :  { %v1803_v21 = vadd.f32 %v1659_v37, %v1480_v46  ;;  %v1880_v13 = vmul.f32 %v6003_v17, %v178_v33  ;;  %v6818_v25 = vadd.f32 %v6455_v28, %v1033_v22  ;;  %v10870_v23 = vrot.slane %v6473_v36, 4  ;;  %v248_v37 = vpop.permute.xlu2 %247 }
  0xed   :  { %v1935_v61 = vadd.f32 %v10872_v50, %v6566_v53  ;;  %v1340_v24 = vrot.slane %v1218_v4, 2  ;;  %v384_v5 = vmul.f32 %v5965_v57, %v178_v33  ;;  %v570_v63 = vsel %vm535_vm0, %v567_v3, %v569_v1 }
  0xee   :  { %v6822_v48 = vadd.f32 %v10870_v23, %v2264_v2  ;;  %v1993_v46 = vmul.f32 %v5999_v14, %v178_v33  ;;  %v6832_v28 = vsel %vm859_vm1, %v6789_v34, 0.0  ;;  %v1161_v22 = vadd.f32 %v1105_v56, %v1028_v16 }
  0xef   :  { %v2316_v38 = vmul.f32 %v6001_v15, %v178_v33  ;;  %v6837_v53 = vsel %vm859_vm1, %v2714_v7, 0.0  ;;  %v10873_v4 = vrot.slane %v10840_v58, 2  ;;  %v1936_v23 = vadd.f32 %v1880_v13, %v1803_v21  ;;  %v198_v13 = vpop.permute.xlu1 %197 }
  0xf0   :  { %10871 = vst [vmem:[#allocation42_spill] sm:$0xff] %v6822_v48  ;;  %v2112_v50 = vrot.slane %v1993_v46, 2  ;;  %v2718_v59 = vmul.f32 %v6822_v48, %v6822_v48  ;;  %v708_v8 = vadd.f32 %v570_v63, %v384_v5  ;;  %v1343_v56 = vsel %vm535_vm0, %v1340_v24, %v1342_v0 }
  0xf1   :  { %v6842_v1 = vsel %vm535_vm0, %v10873_v4, %v567_v3  ;;  %v2435_v33 = vrot.slane %v2316_v38, 4  ;;  %v10874_v16 = vrot.slane %v6237_v9, 2  ;;  %v6853_v58 = vmul.f32 %v5936_v42, %v248_v37 }
  0xf2   :  { %v6856_v3 = vmul.f32 %v5938_v44, %v248_v37  ;;  %v6859_v21 = vmul.f32 %v5956_v51, %v248_v37  ;;  %v6863_v60 = vsel %vm859_vm1, %v6822_v48, 0.0  ;;  %v10878_v0 = vrot.slane %v6201_v18, 2 }
  0xf3   :  { %v2113_v7 = vsel %vm535_vm0, %v10874_v16, %v2112_v50  ;;  %10875 = vst [vmem:[#allocation16_spill] sm:$0xff] %v6853_v58  ;;  %v6869_v63 = vmul.f32 %v5958_v52, %v248_v37  ;;  %v1484_v46 = vadd.f32 %v1343_v56, %v1161_v22  ;;  %v2115_v38 = vsel %vm535_vm0, %v2112_v50, %v2114_v54  ;;  %v10888_v22 = vld [vmem:[#allocation26_spill] sm:$0xff] }
  0xf4   :  { %10876 = vst [vmem:[#allocation43_spill] sm:$0xff] %v6856_v3  ;;  %v1341_v9 = vsel %vm535_vm0, %v10878_v0, %v1340_v24  ;;  %v2258_v5 = vadd.f32 %v2113_v7, %v1935_v61  ;;  %v10880_v4 = vrot.slane %v6241_v35, 4  ;;  %v6876_v2 = vmul.f32 %v5965_v57, %v248_v37 }
  0xf5   :  { %10877 = vst [vmem:[#allocation44_spill] sm:$0xff] %v6859_v21  ;;  %v6879_v47 = vsel %vm859_vm1, %v2718_v59, 0.0  ;;  %v6884_v61 = vmul.f32 %v5989_v6, %v248_v37  ;;  %v6887_v24 = vmul.f32 %v5936_v42, %v198_v13  ;;  %v6893_v50 = vmul.f32 %v6003_v17, %v248_v37 }
  0xf6   :  { %10879 = vst [vmem:[#allocation45_spill] sm:$0xff] %v6869_v63  ;;  %v2436_v16 = vsel %vm859_vm1, %v10880_v4, %v2435_v33  ;;  %v2259_v56 = vadd.f32 %v2115_v38, %v1936_v23  ;;  %v2438_v59 = vsel %vm859_vm1, %v2435_v33, %v2437_v32  ;;  %v6904_v4 = vmul.f32 %v5938_v44, %v198_v13 }
  0xf7   :  { %10881 = vst [vmem:[#allocation46_spill] sm:$0xff] %v6876_v2  ;;  %v6881_v18 = vadd.f32 %v2436_v16, %v2258_v5  ;;  %v10619_v0 = vrot.slane %v6887_v24, 2  ;;  %v6901_v5 = vmul.f32 %v5999_v14, %v248_v37  ;;  %v10885_v16 = vrot.slane %v6758_v26, 4 }
  0xf8   :  { %10883 = vst [vmem:[#allocation48_spill] sm:$0xff] %v6893_v50  ;;  %v10886_v35 = vrot.slane %v6800_v41, 4  ;;  %v6912_v40 = vmul.f32 %v5956_v51, %v198_v13  ;;  %v6917_v33 = vmul.f32 %v6001_v15, %v248_v37  ;;  %v1109_v7 = vmul.f32 %v5989_v6, %v198_v13 }
  0xf9   :  { %10882 = vst [vmem:[#allocation47_spill] sm:$0xff] %v6881_v18  ;;  %v2712_v32 = vmul.f32 %v6881_v18, %v6881_v18  ;;  %v10889_v54 = vrot.slane %v10888_v22, 2  ;;  %v10890_v48 = vrot.slane %v6749_v39, 4  ;;  %v10891_v34 = vrot.slane %v6809_v31, 4 }
  0xfa   :  { %10884 = vst [vmem:[#allocation49_spill] sm:$0xff] %v6901_v5  ;;  %v894_v23 = vsel %vm859_vm1, %v10886_v35, %v10885_v16  ;;  %v6927_v16 = vmul.f32 %v5958_v52, %v198_v13  ;;  %v1884_v27 = vmul.f32 %v6003_v17, %v198_v13  ;;  %v1997_v35 = vmul.f32 %v5999_v14, %v198_v13 }
  0xfb   :  { %10887 = vst [vmem:[#allocation50_spill] sm:$0xff] %v6917_v33  ;;  %v1032_v38 = vadd.f32 %v894_v23, %v708_v8  ;;  %v577_v26 = vsel %vm535_vm0, %v10619_v0, %v10889_v54  ;;  %v1666_v37 = vsel %vm859_vm1, %v10891_v34, %v10890_v48  ;;  %v6934_v8 = vadd.f32 %v2438_v59, %v2259_v56  ;;  %v10901_v59 = vld [vmem:[#allocation4_spill] sm:$0xff] }
  0xfc   :  { %v388_v23 = vmul.f32 %v5965_v57, %v198_v13  ;;  %v1807_v22 = vadd.f32 %v1666_v37, %v1484_v46  ;;  %v2638_v54 = vadd.f32 %v6783_v11, %v6881_v18  ;;  %v6943_v39 = vmul.f32 %v6001_v15, %v198_v13  ;;  %v10893_v46 = vld [vmem:[#allocation29_spill] sm:$0xff] }
  0xfd   :  { %10892 = vst [vmem:[#allocation26_spill] sm:$0xff] %v6934_v8  ;;  %v2769_v3 = vadd.f32 %v6812_v12, %v2712_v32  ;;  %v1165_v48 = vadd.f32 %v1109_v7, %v1032_v38  ;;  %v10894_v37 = vrot.slane %v10893_v46, 2  ;;  %v10895_v63 = vrot.slane %v6912_v40, 2  ;;  %v10896_v7 = vld [vmem:[#allocation13_spill] sm:$0xff]  ;;  %v193_v32 = vpop.permute.xlu0 %192 }
  0xfe   :  { %v712_v34 = vadd.f32 %v577_v26, %v388_v23  ;;  %v1940_v56 = vadd.f32 %v1884_v27, %v1807_v22  ;;  %v2119_v18 = vrot.slane %v1997_v35, 2  ;;  %v2713_v13 = vmul.f32 %v6934_v8, %v6934_v8  ;;  %v10897_v26 = vld [vmem:[#allocation28_spill] sm:$0xff] }
  0xff   :  { %v1350_v11 = vsel %vm535_vm0, %v10895_v63, %v10894_v37  ;;  %v707_v27 = vadd.f32 %v6842_v1, %v10896_v7  ;;  %v2639_v38 = vadd.f32 %v2638_v54, %v6934_v8  ;;  %v10898_v23 = vrot.slane %v10897_v26, 4  ;;  %v10902_v1 = vld [vmem:[#allocation30_spill] sm:$0xff] }
 0x100   :  { %v10899_v63 = vrot.slane %v6904_v4, 4  ;;  %v10900_v35 = vrot.slane %v6470_v30, 2  ;;  %v1483_v2 = vadd.f32 %v1341_v9, %v10901_v59  ;;  %v2770_v0 = vadd.f32 %v2769_v3, %v2713_v13 }
 0x101   :  { %v1488_v33 = vadd.f32 %v1350_v11, %v1165_v48  ;;  %v10903_v7 = vrot.slane %v10902_v1, 4  ;;  %v10904_v54 = vrot.slane %v6927_v16, 4  ;;  %v10905_v8 = vrot.slane %v6800_v41, 4 }
 0x102   :  { %v901_v22 = vsel %vm859_vm1, %v10899_v63, %v10898_v23  ;;  %v2122_v37 = vsel %vm535_vm0, %v2119_v18, %v10900_v35  ;;  %v10906_v23 = vrot.slane %v10843_v45, 4  ;;  %v444_v63 = vmul.f32 %v5936_v42, %v193_v32 }
 0x103   :  { %v1036_v12 = vadd.f32 %v901_v22, %v712_v34  ;;  %v2263_v21 = vadd.f32 %v2122_v37, %v1940_v56  ;;  %v1673_v26 = vsel %vm859_vm1, %v10904_v54, %v10903_v7  ;;  %v1221_v9 = vmul.f32 %v5956_v51, %v193_v32 }
 0x104   :  { %v892_v30 = vsel %vm859_vm1, %v10906_v23, %v10905_v8  ;;  %v10907_v3 = vrot.slane %v6473_v36, 4  ;;  %v10908_v34 = vrot.slane %v6943_v39, 4  ;;  %v10909_v59 = vrot.slane %v6809_v31, 4  ;;  %v10912_v31 = vld [vmem:[#allocation34_spill] sm:$0xff]  ;;  %v10914_v23 = vld [vmem:[#allocation25_spill] sm:$0xff] }
 0x105   :  { %v1031_v56 = vadd.f32 %v892_v30, %v707_v27  ;;  %v10910_v11 = vrot.slane %v6210_v62, 4  ;;  %v1996_v45 = vmul.f32 %v5999_v14, %v193_v32  ;;  %v6995_v22 = vmul.f32 %v5938_v44, %v193_v32 }
 0x106   :  { %v2445_v48 = vsel %vm859_vm1, %v10908_v34, %v10907_v3  ;;  %v1108_v36 = vmul.f32 %v5989_v6, %v193_v32  ;;  %v572_v35 = vrot.slane %v444_v63, 2  ;;  %v1345_v37 = vrot.slane %v1221_v9, 2  ;;  %v10915_v9 = vld [vmem:[#allocation23_spill] sm:$0xff] }
 0x107   :  { %v1664_v41 = vsel %vm859_vm1, %v10910_v11, %v10909_v59  ;;  %v6992_v8 = vadd.f32 %v2445_v48, %v2263_v21  ;;  %v1883_v27 = vmul.f32 %v6003_v17, %v193_v32  ;;  %v2117_v7 = vrot.slane %v1996_v45, 2  ;;  %v263_v59 = vpop.permute.xlu2 %262  ;;  %v10919_v45 = vld [vmem:[#allocation17_spill] sm:$0xff] }
 0x108   :  { %v1806_v13 = vadd.f32 %v1664_v41, %v1483_v2  ;;  %v7000_v54 = vadd.f32 %v10912_v31, %v1036_v12  ;;  %v7002_v62 = vadd.f32 %v1673_v26, %v1488_v33  ;;  %v1938_v21 = vadd.f32 %v10914_v23, %v6697_v20 }
 0x109   :  { %10911 = vst [vmem:[#allocation29_spill] sm:$0xff] %v6992_v8  ;;  %v7007_v2 = vmul.f32 %v5958_v52, %v193_v32  ;;  %v2641_v30 = vadd.f32 %v6832_v28, %v2639_v38  ;;  %v2772_v3 = vadd.f32 %v6837_v53, %v2770_v0  ;;  %v387_v63 = vmul.f32 %v5965_v57, %v193_v32 }
 0x10a   :  { %10913 = vst [vmem:[#allocation13_spill] sm:$0xff] %v7000_v54  ;;  %v10916_v34 = vrot.slane %v10915_v9, 2  ;;  %v7017_v33 = vmul.f32 %v6992_v8, %v6992_v8  ;;  %v1164_v20 = vadd.f32 %v1108_v36, %v1031_v56  ;;  %v2319_v26 = vmul.f32 %v6001_v15, %v193_v32  ;;  %v10921_v9 = vld [vmem:[#allocation20_spill] sm:$0xff] }
 0x10b   :  { %v10917_v28 = vrot.slane %v6887_v24, 2  ;;  %v10918_v0 = vrot.slane %v6912_v40, 2  ;;  %v1939_v11 = vadd.f32 %v1883_v27, %v1806_v13  ;;  %v10920_v31 = vrot.slane %v10919_v45, 2 }
 0x10c   :  { %v2118_v48 = vsel %vm535_vm0, %v10916_v34, %v2117_v7  ;;  %v2120_v32 = vsel %vm535_vm0, %v2117_v7, %v2119_v18  ;;  %v2440_v36 = vrot.slane %v2319_v26, 4  ;;  %v10922_v24 = vrot.slane %v10921_v9, 2 }
 0x10d   :  { %v575_v53 = vsel %vm535_vm0, %v572_v35, %v10917_v28  ;;  %v1348_v38 = vsel %vm535_vm0, %v1345_v37, %v10918_v0  ;;  %v2261_v41 = vadd.f32 %v2118_v48, %v1938_v21  ;;  %v7030_v23 = vsel %vm535_vm0, %v10920_v31, %v572_v35  ;;  %v213_v35 = vpop.permute.xlu1 %212  ;;  %v10925_v28 = vld [vmem:[#allocation24_spill] sm:$0xff] }
 0x10e   :  { %v1346_v34 = vsel %vm535_vm0, %v10922_v24, %v1345_v37  ;;  %v7038_v40 = vmul.f32 %v5936_v42, %v263_v59  ;;  %v7041_v13 = vmul.f32 %v5938_v44, %v263_v59  ;;  %v7044_v27 = vmul.f32 %v5956_v51, %v263_v59 }
 0x10f   :  { %v711_v21 = vadd.f32 %v575_v53, %v387_v63  ;;  %v1487_v48 = vadd.f32 %v1348_v38, %v1164_v20  ;;  %v10926_v0 = vrot.slane %v10925_v28, 4  ;;  %v7050_v7 = vmul.f32 %v5958_v52, %v263_v59 }
 0x110   :  { %10923 = vst [vmem:[#allocation28_spill] sm:$0xff] %v7038_v40  ;;  %v2262_v37 = vadd.f32 %v2120_v32, %v1939_v11  ;;  %v401_v45 = vmul.f32 %v5965_v57, %v263_v59  ;;  %v7056_v31 = vmul.f32 %v5989_v6, %v263_v59  ;;  %v7059_v9 = vmul.f32 %v6003_v17, %v263_v59 }
 0x111   :  { %10924 = vst [vmem:[#allocation4_spill] sm:$0xff] %v7044_v27  ;;  %v2441_v18 = vsel %vm859_vm1, %v10926_v0, %v2440_v36  ;;  %v7062_v63 = vmul.f32 %v5999_v14, %v263_v59  ;;  %v7065_v20 = vmul.f32 %v5936_v42, %v213_v35  ;;  %v7068_v53 = vmul.f32 %v5938_v44, %v213_v35 }
 0x112   :  { %10927 = vst [vmem:[#allocation30_spill] sm:$0xff] %v7050_v7  ;;  %v7052_v26 = vadd.f32 %v2441_v18, %v2261_v41  ;;  %v10931_v24 = vrot.slane %v6943_v39, 4  ;;  %v7080_v18 = vmul.f32 %v6001_v15, %v263_v59  ;;  %v391_v58 = vmul.f32 %v5965_v57, %v213_v35 }
 0x113   :  { %10929 = vst [vmem:[#allocation25_spill] sm:$0xff] %v7056_v31  ;;  %v10631_v56 = vrot.slane %v7065_v20, 2  ;;  %v10933_v11 = vrot.slane %v6904_v4, 4  ;;  %v10934_v41 = vrot.slane %v6995_v22, 4  ;;  %v7092_v39 = vmul.f32 %v5956_v51, %v213_v35 }
 0x114   :  { %10928 = vst [vmem:[#allocation34_spill] sm:$0xff] %v7052_v26  ;;  %v2715_v38 = vmul.f32 %v7052_v26, %v7052_v26  ;;  %v2443_v28 = vsel %vm859_vm1, %v2440_v36, %v10931_v24  ;;  %v2642_v36 = vadd.f32 %v2641_v30, %v7052_v26  ;;  %v10935_v24 = vld [vmem:[#allocation8_spill] sm:$0xff]  ;;  %v1112_v4 = vmul.f32 %v5989_v6, %v213_v35 }
 0x115   :  { %10930 = vst [vmem:[#allocation23_spill] sm:$0xff] %v7059_v9  ;;  %v7083_v12 = vadd.f32 %v2443_v28, %v2262_v37  ;;  %v899_v32 = vsel %vm859_vm1, %v10934_v41, %v10933_v11  ;;  %v10936_v59 = vrot.slane %v10935_v24, 2  ;;  %v7103_v50 = vmul.f32 %v5958_v52, %v213_v35 }
 0x116   :  { %v1035_v0 = vadd.f32 %v899_v32, %v711_v21  ;;  %v2773_v5 = vadd.f32 %v2772_v3, %v2715_v38  ;;  %v10937_v11 = vrot.slane %v6927_v16, 4  ;;  %v10938_v41 = vrot.slane %v7007_v2, 4 }
 0x117   :  { %10932 = vst [vmem:[#allocation17_spill] sm:$0xff] %v7083_v12  ;;  %v582_v37 = vsel %vm535_vm0, %v10631_v56, %v10936_v59  ;;  %v1352_v26 = vrot.slane %v7092_v39, 2  ;;  %v1887_v59 = vmul.f32 %v6003_v17, %v213_v35  ;;  %v2000_v56 = vmul.f32 %v5999_v14, %v213_v35 }
 0x118   :  { %v1671_v30 = vsel %vm859_vm1, %v10938_v41, %v10937_v11  ;;  %v2716_v3 = vmul.f32 %v7083_v12, %v7083_v12  ;;  %v10939_v21 = vrot.slane %v7038_v40, 2  ;;  %v715_v16 = vadd.f32 %v582_v37, %v391_v58 }
 0x119   :  { %v1810_v7 = vadd.f32 %v1671_v30, %v1487_v48  ;;  %v2643_v28 = vadd.f32 %v2642_v36, %v7083_v12  ;;  %v2124_v41 = vrot.slane %v2000_v56, 2  ;;  %v2323_v48 = vmul.f32 %v6001_v15, %v213_v35  ;;  %v10940_v30 = vld [vmem:[#allocation3_spill] sm:$0xff] }
 0x11a   :  { %v725_v38 = vadd.f32 %v10939_v21, %v401_v45  ;;  %v2774_v39 = vadd.f32 %v2773_v5, %v2716_v3  ;;  %v10941_v27 = vrot.slane %v10940_v30, 4  ;;  %v10942_v31 = vrot.slane %v7068_v53, 4  ;;  %v208_v45 = vpop.permute.xlu0 %207  ;;  %v10943_v21 = vld [vmem:[#allocation11_spill] sm:$0xff] }
 0x11b   :  { %v1168_v9 = vadd.f32 %v1112_v4, %v1035_v0  ;;  %v1943_v40 = vadd.f32 %v1887_v59, %v1810_v7  ;;  %v10944_v32 = vrot.slane %v10943_v21, 2  ;;  %v10945_v56 = vrot.slane %v6610_v29, 2  ;;  %v10950_v4 = vld [vmem:[#allocation22_spill] sm:$0xff] }
 0x11c   :  { %v906_v54 = vsel %vm859_vm1, %v10942_v31, %v10941_v27  ;;  %v1486_v5 = vadd.f32 %v1346_v34, %v6679_v43  ;;  %v10946_v37 = vrot.slane %v7041_v13, 4  ;;  %v10948_v31 = vld [vmem:[#allocation18_spill] sm:$0xff]  ;;  %v10949_v0 = vrot.slane %v7007_v2, 4 }
 0x11d   :  { %v1355_v58 = vsel %vm535_vm0, %v1352_v26, %v10944_v32  ;;  %v2127_v35 = vsel %vm535_vm0, %v2124_v41, %v10945_v56  ;;  %v1039_v27 = vadd.f32 %v906_v54, %v715_v16  ;;  %v710_v7 = vadd.f32 %v7030_v23, %v10948_v31  ;;  %v10952_v16 = vld [vmem:[#allocation35_spill] sm:$0xff] }
 0x11e   :  { %v7136_v3 = vadd.f32 %v10946_v37, %v725_v38  ;;  %v10951_v59 = vrot.slane %v10950_v4, 4  ;;  %v2644_v11 = vadd.f32 %v2643_v28, %v6992_v8  ;;  %v2447_v36 = vrot.slane %v2323_v48, 4  ;;  %v10956_v4 = vld [vmem:[#allocation19_spill] sm:$0xff] }
 0x11f   :  { %v447_v43 = vmul.f32 %v5936_v42, %v208_v45  ;;  %v2775_v34 = vadd.f32 %v2774_v39, %v7017_v33  ;;  %v1491_v38 = vadd.f32 %v1355_v58, %v1168_v9  ;;  %v2266_v37 = vadd.f32 %v2127_v35, %v1943_v40  ;;  %v10958_v35 = vld [vmem:[#allocation37_spill] sm:$0xff] }
 0x120   :  { %10947 = vst [vmem:[#allocation20_spill] sm:$0xff] %v7136_v3  ;;  %v1669_v32 = vsel %vm859_vm1, %v10951_v59, %v10949_v0  ;;  %v1224_v54 = vmul.f32 %v5956_v51, %v208_v45  ;;  %v10953_v23 = vrot.slane %v10952_v16, 4  ;;  %v10954_v2 = vrot.slane %v7103_v50, 4 }
 0x121   :  { %v1809_v56 = vadd.f32 %v1669_v32, %v1486_v5  ;;  %v10955_v0 = vrot.slane %v6995_v22, 4  ;;  %v10957_v28 = vrot.slane %v10956_v4, 4  ;;  %v1886_v5 = vmul.f32 %v6003_v17, %v208_v45 }
 0x122   :  { %v1678_v31 = vsel %vm859_vm1, %v10954_v2, %v10953_v23  ;;  %v1999_v33 = vmul.f32 %v5999_v14, %v208_v45  ;;  %v7162_v40 = vadd.f32 %v6721_v19, %v1039_v27  ;;  %v578_v39 = vrot.slane %v447_v43, 2  ;;  %v278_v27 = vpop.permute.xlu2 %277 }
 0x123   :  { %v897_v48 = vsel %vm859_vm1, %v10957_v28, %v10955_v0  ;;  %v1111_v58 = vmul.f32 %v5989_v6, %v208_v45  ;;  %v10959_v59 = vrot.slane %v10958_v35, 4  ;;  %v1351_v22 = vrot.slane %v1224_v54, 2 }
 0x124   :  { %v1034_v9 = vadd.f32 %v897_v48, %v710_v7  ;;  %v1942_v23 = vadd.f32 %v1886_v5, %v1809_v56  ;;  %v2123_v2 = vrot.slane %v1999_v33, 2  ;;  %v771_v0 = vmul.f32 %v5938_v44, %v208_v45 }
 0x125   :  { %v2450_v32 = vsel %vm859_vm1, %v2447_v36, %v10959_v59  ;;  %v1547_v28 = vmul.f32 %v5958_v52, %v208_v45  ;;  %v2322_v19 = vmul.f32 %v6001_v15, %v208_v45  ;;  %v7173_v7 = vadd.f32 %v1678_v31, %v1491_v38 }
 0x126   :  { %v7168_v4 = vadd.f32 %v2450_v32, %v2266_v37  ;;  %v2646_v43 = vadd.f32 %v6863_v60, %v2644_v11  ;;  %v2777_v48 = vadd.f32 %v6879_v47, %v2775_v34  ;;  %v2125_v59 = vsel %vm535_vm0, %v2123_v2, %v2124_v41  ;;  %v228_v32 = vpop.permute.xlu1 %227 }
 0x127   :  { %v10961_v56 = vrot.slane %v7065_v20, 2  ;;  %v1167_v54 = vadd.f32 %v1111_v58, %v1034_v9  ;;  %v2265_v5 = vadd.f32 %v2125_v59, %v1942_v23  ;;  %v2446_v33 = vrot.slane %v2322_v19, 4 }
 0x128   :  { %10960 = vst [vmem:[#allocation24_spill] sm:$0xff] %v7168_v4  ;;  %v390_v8 = vmul.f32 %v5965_v57, %v208_v45  ;;  %v1353_v12 = vsel %vm535_vm0, %v1351_v22, %v1352_v26  ;;  %v7184_v38 = vmul.f32 %v5936_v42, %v278_v27  ;;  %v7187_v60 = vmul.f32 %v5938_v44, %v278_v27 }
 0x129   :  { %v580_v37 = vsel %vm535_vm0, %v578_v39, %v10961_v56  ;;  %v7191_v47 = vmul.f32 %v7168_v4, %v7168_v4  ;;  %v902_v20 = vrot.slane %v771_v0, 4  ;;  %v1674_v11 = vrot.slane %v1547_v28, 4 }
 0x12a   :  { %10962 = vst [vmem:[#allocation8_spill] sm:$0xff] %v7184_v38  ;;  %v2448_v41 = vsel %vm859_vm1, %v2446_v33, %v2447_v36  ;;  %v714_v34 = vadd.f32 %v580_v37, %v390_v8  ;;  %v7197_v45 = vmul.f32 %v5965_v57, %v278_v27  ;;  %v451_v26 = vmul.f32 %v5936_v42, %v228_v32  ;;  %v10969_v37 = vld [vmem:[#allocation14_spill] sm:$0xff] }
 0x12b   :  { %10963 = vst [vmem:[#allocation3_spill] sm:$0xff] %v7187_v60  ;;  %v7194_v31 = vadd.f32 %v2448_v41, %v2265_v5  ;;  %v1490_v9 = vadd.f32 %v1353_v12, %v1167_v54  ;;  %v7201_v39 = vmul.f32 %v5989_v6, %v278_v27  ;;  %v7204_v58 = vmul.f32 %v5956_v51, %v278_v27 }
 0x12c   :  { %10965 = vst [vmem:[#allocation18_spill] sm:$0xff] %v7197_v45  ;;  %v775_v22 = vmul.f32 %v5938_v44, %v228_v32  ;;  %v7210_v36 = vmul.f32 %v5958_v52, %v278_v27  ;;  %v585_v2 = vrot.slane %v451_v26, 2  ;;  %v7213_v0 = vmul.f32 %v6003_v17, %v278_v27 }
 0x12d   :  { %10964 = vst [vmem:[#allocation11_spill] sm:$0xff] %v7194_v31  ;;  %v7216_v12 = vmul.f32 %v5999_v14, %v278_v27  ;;  %v7219_v28 = vmul.f32 %v6001_v15, %v278_v27  ;;  %v1228_v19 = vmul.f32 %v5956_v51, %v228_v32  ;;  %v2719_v59 = vmul.f32 %v7194_v31, %v7194_v31 }
 0x12e   :  { %10966 = vst [vmem:[#allocation22_spill] sm:$0xff] %v7204_v58  ;;  %v394_v56 = vmul.f32 %v5965_v57, %v228_v32  ;;  %v10970_v54 = vrot.slane %v10969_v37, 2  ;;  %v10971_v33 = vrot.slane %v7068_v53, 4  ;;  %v909_v26 = vrot.slane %v775_v22, 4  ;;  %v10974_v58 = vld [vmem:[#allocation10_spill] sm:$0xff] }
 0x12f   :  { %10967 = vst [vmem:[#allocation35_spill] sm:$0xff] %v7213_v0  ;;  %v10972_v27 = vrot.slane %v7103_v50, 4  ;;  %v1890_v45 = vmul.f32 %v6003_v17, %v228_v32  ;;  %v1115_v3 = vmul.f32 %v5989_v6, %v228_v32  ;;  %v1551_v0 = vmul.f32 %v5958_v52, %v228_v32 }
 0x130   :  { %10968 = vst [vmem:[#allocation19_spill] sm:$0xff] %v7219_v28  ;;  %v587_v5 = vsel %vm535_vm0, %v585_v2, %v10970_v54  ;;  %v904_v41 = vsel %vm859_vm1, %v902_v20, %v10971_v33  ;;  %v2003_v38 = vmul.f32 %v5999_v14, %v228_v32  ;;  %v1358_v22 = vrot.slane %v1228_v19, 2  ;;  %v223_v33 = vpop.permute.xlu0 %222 }
 0x131   :  { %v1038_v8 = vadd.f32 %v904_v41, %v714_v34  ;;  %v1676_v23 = vsel %vm859_vm1, %v1674_v11, %v10972_v27  ;;  %v718_v20 = vadd.f32 %v587_v5, %v394_v56  ;;  %v2326_v54 = vmul.f32 %v6001_v15, %v228_v32  ;;  %v10977_v34 = vld [vmem:[#allocation38_spill] sm:$0xff] }
 0x132   :  { %v1813_v60 = vadd.f32 %v1676_v23, %v1490_v9  ;;  %v2130_v11 = vrot.slane %v2003_v38, 2  ;;  %v2647_v41 = vadd.f32 %v2646_v43, %v7194_v31  ;;  %v2778_v27 = vadd.f32 %v2777_v48, %v2719_v59  ;;  %v10979_v48 = vld [vmem:[#allocation36_spill] sm:$0xff] }
 0x133   :  { %v10973_v23 = vrot.slane %v10893_v46, 2  ;;  %v10975_v53 = vrot.slane %v10974_v58, 4  ;;  %v1171_v56 = vadd.f32 %v1115_v3, %v1038_v8  ;;  %v1681_v5 = vrot.slane %v1551_v0, 4 }
 0x134   :  { %v1946_v9 = vadd.f32 %v1890_v45, %v1813_v60  ;;  %v10976_v50 = vrot.slane %v6745_v49, 2  ;;  %v10978_v28 = vrot.slane %v10977_v34, 2  ;;  %v1944_v60 = vadd.f32 %v10979_v48, %v7002_v62 }
 0x135   :  { %v1489_v2 = vadd.f32 %v10973_v23, %v6818_v25  ;;  %v911_v19 = vsel %vm859_vm1, %v909_v26, %v10975_v53  ;;  %v450_v25 = vmul.f32 %v5936_v42, %v223_v33  ;;  %v2453_v46 = vrot.slane %v2326_v54, 4 }
 0x136   :  { %v2132_v38 = vsel %vm535_vm0, %v2130_v11, %v10976_v50  ;;  %v1042_v32 = vadd.f32 %v911_v19, %v718_v20  ;;  %v1360_v43 = vsel %vm535_vm0, %v1358_v22, %v10978_v28  ;;  %v1114_v45 = vmul.f32 %v5989_v6, %v223_v33  ;;  %v10982_v50 = vld [vmem:[#allocation33_spill] sm:$0xff] }
 0x137   :  { %v1227_v3 = vmul.f32 %v5956_v51, %v223_v33  ;;  %v1889_v8 = vmul.f32 %v6003_v17, %v223_v33  ;;  %v2269_v0 = vadd.f32 %v2132_v38, %v1946_v9  ;;  %v10980_v59 = vrot.slane %v10902_v1, 4  ;;  %v293_v1 = vpop.permute.xlu2 %292 }
 0x138   :  { %v583_v53 = vrot.slane %v450_v25, 2  ;;  %v2002_v20 = vmul.f32 %v5999_v14, %v223_v33  ;;  %v1494_v28 = vadd.f32 %v1360_v43, %v1171_v56  ;;  %v10981_v22 = vrot.slane %v6732_v10, 4 }
 0x139   :  { %v1812_v26 = vadd.f32 %v10980_v59, %v1489_v2  ;;  %v1170_v11 = vadd.f32 %v1114_v45, %v10982_v50  ;;  %v1356_v54 = vrot.slane %v1227_v3, 2  ;;  %v393_v23 = vmul.f32 %v5965_v57, %v223_v33 }
 0x13a   :  { %v1683_v62 = vsel %vm859_vm1, %v1681_v5, %v10981_v22  ;;  %v7271_v19 = vmul.f32 %v5938_v44, %v223_v33  ;;  %v2128_v38 = vrot.slane %v2002_v20, 2  ;;  %v7274_v2 = vadd.f32 %v6884_v61, %v1042_v32 }
 0x13b   :  { %v1945_v9 = vadd.f32 %v1889_v8, %v1812_v26  ;;  %v10983_v56 = vrot.slane %v6752_v55, 4  ;;  %v7280_v5 = vmul.f32 %v5958_v52, %v223_v33  ;;  %v2325_v48 = vmul.f32 %v6001_v15, %v223_v33 }
 0x13c   :  { %v2648_v45 = vadd.f32 %v2647_v41, %v7168_v4  ;;  %v717_v3 = vadd.f32 %v583_v53, %v393_v23  ;;  %v10985_v8 = vrot.slane %v6610_v29, 2  ;;  %v1493_v61 = vadd.f32 %v1356_v54, %v1170_v11  ;;  %v243_v23 = vpop.permute.xlu1 %242 }
 0x13d   :  { %v2455_v43 = vsel %vm859_vm1, %v2453_v46, %v10983_v56  ;;  %v2451_v26 = vrot.slane %v2325_v48, 4  ;;  %v7290_v20 = vmul.f32 %v5936_v42, %v293_v1  ;;  %v7292_v46 = vadd.f32 %v1683_v62, %v1494_v28 }
 0x13e   :  { %v7283_v25 = vadd.f32 %v2455_v43, %v2269_v0  ;;  %v2129_v59 = vsel %vm535_vm0, %v10985_v8, %v2128_v38  ;;  %v2779_v22 = vadd.f32 %v2778_v27, %v7191_v47  ;;  %v10646_v33 = vrot.slane %v7271_v19, 4 }
 0x13f   :  { %v2267_v32 = vadd.f32 %v2129_v59, %v1944_v60  ;;  %10986 = vst [vmem:[#allocation14_spill] sm:$0xff] %v7290_v20  ;;  %v2268_v0 = vadd.f32 %v2128_v38, %v1945_v9  ;;  %v10645_v41 = vrot.slane %v7280_v5, 4  ;;  %v10987_v50 = vrot.slane %v10958_v35, 4 }
 0x140   :  { %10984 = vst [vmem:[#allocation37_spill] sm:$0xff] %v7283_v25  ;;  %v7301_v11 = vmul.f32 %v5938_v44, %v293_v1  ;;  %v7304_v60 = vmul.f32 %v5956_v51, %v293_v1  ;;  %v7308_v28 = vmul.f32 %v7283_v25, %v7283_v25  ;;  %v10990_v47 = vrot.slane %v10935_v24, 2 }
 0x141   :  { %v2452_v29 = vsel %vm859_vm1, %v10987_v50, %v2451_v26  ;;  %v10991_v62 = vrot.slane %v10943_v21, 2  ;;  %v1041_v38 = vadd.f32 %v10646_v33, %v717_v3  ;;  %v1816_v56 = vadd.f32 %v10645_v41, %v1493_v61 }
 0x142   :  { %10988 = vst [vmem:[#allocation10_spill] sm:$0xff] %v7301_v11  ;;  %v584_v27 = vsel %vm535_vm0, %v10990_v47, %v583_v53  ;;  %v7316_v9 = vadd.f32 %v2452_v29, %v2267_v32  ;;  %v7323_v43 = vmul.f32 %v5965_v57, %v293_v1  ;;  %v7326_v24 = vadd.f32 %v2451_v26, %v2268_v0 }
 0x143   :  { %10989 = vst [vmem:[#allocation38_spill] sm:$0xff] %v7304_v60  ;;  %v1357_v35 = vsel %vm535_vm0, %v10991_v62, %v1356_v54  ;;  %v7329_v53 = vmul.f32 %v5989_v6, %v293_v1  ;;  %v7332_v21 = vmul.f32 %v5958_v52, %v293_v1  ;;  %v7335_v54 = vmul.f32 %v5936_v42, %v243_v23 }
 0x144   :  { %10992 = vst [vmem:[#allocation36_spill] sm:$0xff] %v7316_v9  ;;  %v7340_v59 = vmul.f32 %v6003_v17, %v293_v1  ;;  %v1118_v61 = vmul.f32 %v5989_v6, %v243_v23  ;;  %v2649_v32 = vadd.f32 %v2648_v45, %v7316_v9  ;;  %v2721_v26 = vmul.f32 %v7316_v9, %v7316_v9 }
 0x145   :  { %10993 = vst [vmem:[#allocation33_spill] sm:$0xff] %v7323_v43  ;;  %v7347_v0 = vmul.f32 %v5999_v14, %v293_v1  ;;  %v7350_v50 = vmul.f32 %v5956_v51, %v243_v23  ;;  %v590_v29 = vrot.slane %v7335_v54, 2  ;;  %v7354_v62 = vmul.f32 %v5958_v52, %v243_v23 }
 0x146   :  { %10994 = vst [vmem:[#allocation51_spill] sm:$0xff] %v7326_v24  ;;  %v1174_v47 = vadd.f32 %v1118_v61, %v1041_v38  ;;  %v1893_v8 = vmul.f32 %v6003_v17, %v243_v23  ;;  %v2722_v45 = vmul.f32 %v7326_v24, %v7326_v24  ;;  %v7360_v3 = vmul.f32 %v6001_v15, %v293_v1 }
 0x147   :  { %10995 = vst [vmem:[#allocation52_spill] sm:$0xff] %v7332_v21  ;;  %v397_v48 = vmul.f32 %v5965_v57, %v243_v23  ;;  %v1363_v41 = vrot.slane %v7350_v50, 2  ;;  %v7365_v33 = vmul.f32 %v5938_v44, %v243_v23  ;;  %v7368_v38 = vmul.f32 %v5999_v14, %v243_v23  ;;  %v10998_v50 = vld [vmem:[#allocation23_spill] sm:$0xff]  ;;  %v10999_v21 = vld [vmem:[#allocation13_spill] sm:$0xff] }
 0x148   :  { %10996 = vst [vmem:[#allocation53_spill] sm:$0xff] %v7340_v59  ;;  %v1949_v54 = vadd.f32 %v1893_v8, %v1816_v56  ;;  %v7371_v61 = vmul.f32 %v6001_v15, %v243_v23  ;;  %v2650_v9 = vsel %vm859_vm1, %v7326_v24, 0.0  ;;  %v2780_v4 = vadd.f32 %v2779_v22, %v2721_v26  ;;  %v238_v56 = vpop.permute.xlu0 %237 }
 0x149   :  { %v1497_v1 = vadd.f32 %v1363_v41, %v1174_v47  ;;  %v10659_v31 = vrot.slane %v7354_v62, 4  ;;  %v2651_v43 = vadd.f32 %v2650_v9, %v2649_v32  ;;  %v721_v59 = vadd.f32 %v590_v29, %v397_v48  ;;  %v10997_v32 = vld [vmem:[#allocation9_spill] sm:$0xff] }
 0x14a   :  { %v2135_v60 = vrot.slane %v7368_v38, 2  ;;  %v2781_v8 = vsel %vm859_vm1, %v2722_v45, 0.0  ;;  %v10660_v22 = vrot.slane %v7365_v33, 4  ;;  %v10661_v9 = vrot.slane %v7371_v61, 4 }
 0x14b   :  { %v1820_v24 = vadd.f32 %v10659_v31, %v1497_v1  ;;  %v716_v47 = vadd.f32 %v584_v27, %v10997_v32  ;;  %v2782_v48 = vadd.f32 %v2781_v8, %v2780_v4  ;;  %v1492_v20 = vadd.f32 %v1357_v35, %v10999_v21 }
 0x14c   :  { %v2272_v26 = vadd.f32 %v2135_v60, %v1949_v54  ;;  %v453_v45 = vmul.f32 %v5936_v42, %v238_v56  ;;  %v7390_v11 = vadd.f32 %v2651_v43, %v7283_v25  ;;  %v1045_v1 = vadd.f32 %v10660_v22, %v721_v59 }
 0x14d   :  { %v1953_v38 = vadd.f32 %v10998_v50, %v1820_v24  ;;  %v1230_v23 = vmul.f32 %v5956_v51, %v238_v56  ;;  %v11001_v4 = vrot.slane %v7062_v63, 2  ;;  %v11002_v24 = vrot.slane %v7271_v19, 4 }
 0x14e   :  { %v7396_v54 = vadd.f32 %v10661_v9, %v2272_v26  ;;  %v11003_v35 = vrot.slane %v10940_v30, 4  ;;  %v588_v43 = vrot.slane %v453_v45, 2  ;;  %v7407_v50 = vmul.f32 %v5938_v44, %v238_v56 }
 0x14f   :  { %v2276_v27 = vadd.f32 %v11001_v4, %v1953_v38  ;;  %v11004_v8 = vrot.slane %v7280_v5, 4  ;;  %v11005_v26 = vrot.slane %v10952_v16, 4  ;;  %v1117_v31 = vmul.f32 %v5989_v6, %v238_v56  ;;  %v11006_v4 = vld [vmem:[#allocation25_spill] sm:$0xff] }
 0x150   :  { %11000 = vst [vmem:[#allocation9_spill] sm:$0xff] %v7396_v54  ;;  %v908_v21 = vsel %vm859_vm1, %v11003_v35, %v11002_v24  ;;  %v7416_v38 = vmul.f32 %v5958_v52, %v238_v56  ;;  %v7419_v30 = vadd.f32 %v2782_v48, %v7308_v28  ;;  %v2726_v19 = vmul.f32 %v7396_v54, %v7396_v54  ;;  %v11009_v35 = vld [vmem:[#allocation41_spill] sm:$0xff] }
 0x151   :  { %v1040_v59 = vadd.f32 %v908_v21, %v716_v47  ;;  %v1680_v32 = vsel %vm859_vm1, %v11005_v26, %v11004_v8  ;;  %v1892_v47 = vmul.f32 %v6003_v17, %v238_v56  ;;  %v7425_v5 = vadd.f32 %v11006_v4, %v1045_v1 }
 0x152   :  { %v1815_v45 = vadd.f32 %v1680_v32, %v1492_v20  ;;  %v11007_v16 = vrot.slane %v7080_v18, 4  ;;  %v1947_v21 = vadd.f32 %v11009_v35, %v7173_v7  ;;  %v1361_v8 = vrot.slane %v1230_v23, 2 }
 0x153   :  { %v396_v28 = vmul.f32 %v5965_v57, %v238_v56  ;;  %v591_v48 = vsel %vm535_vm0, %v588_v43, %v590_v29  ;;  %v2005_v20 = vmul.f32 %v5999_v14, %v238_v56  ;;  %v7439_v1 = vsel %vm859_vm1, %v7396_v54, 0.0 }
 0x154   :  { %v7429_v24 = vadd.f32 %v11007_v16, %v2276_v27  ;;  %v1173_v32 = vadd.f32 %v1117_v31, %v1040_v59  ;;  %v2328_v4 = vmul.f32 %v6001_v15, %v238_v56  ;;  %v308_v16 = vpop.permute.xlu2 %307  ;;  %v7444_v7 = vsel %vm859_vm1, %v2726_v19, 0.0 }
 0x155   :  { %v11010_v23 = vrot.slane %v10969_v37, 2  ;;  %v1948_v35 = vadd.f32 %v1892_v47, %v1815_v45  ;;  %v2133_v26 = vrot.slane %v2005_v20, 2  ;;  %v720_v9 = vadd.f32 %v591_v48, %v396_v28  ;;  %v258_v45 = vpop.permute.xlu1 %257 }
 0x156   :  { %11008 = vst [vmem:[#allocation23_spill] sm:$0xff] %v7429_v24  ;;  %v2730_v22 = vmul.f32 %v7429_v24, %v7429_v24  ;;  %v1364_v31 = vsel %vm535_vm0, %v1361_v8, %v1363_v41  ;;  %v2456_v59 = vrot.slane %v2328_v4, 4  ;;  %v11011_v56 = vrot.slane %v6745_v49, 2 }
 0x157   :  { %v7449_v29 = vsel %vm535_vm0, %v11010_v23, %v588_v43  ;;  %v7458_v19 = vmul.f32 %v5936_v42, %v308_v16  ;;  %v7461_v37 = vmul.f32 %v5938_v44, %v308_v16  ;;  %v7464_v43 = vmul.f32 %v5956_v51, %v308_v16 }
 0x158   :  { %v2134_v27 = vsel %vm535_vm0, %v11011_v56, %v2133_v26  ;;  %v7468_v47 = vsel %vm859_vm1, %v7429_v24, 0.0  ;;  %v11015_v41 = vrot.slane %v10977_v34, 2  ;;  %v7474_v48 = vmul.f32 %v5958_v52, %v308_v16 }
 0x159   :  { %11012 = vst [vmem:[#allocation13_spill] sm:$0xff] %v7458_v19  ;;  %v2270_v28 = vadd.f32 %v2134_v27, %v1947_v21  ;;  %v1496_v20 = vadd.f32 %v1364_v31, %v1173_v32  ;;  %v2136_v4 = vsel %vm535_vm0, %v2133_v26, %v2135_v60  ;;  %v11017_v23 = vrot.slane %v6752_v55, 4  ;;  %v11026_v60 = vld [vmem:[#allocation28_spill] sm:$0xff] }
 0x15a   :  { %11013 = vst [vmem:[#allocation25_spill] sm:$0xff] %v7461_v37  ;;  %v1362_v49 = vsel %vm535_vm0, %v11015_v41, %v1361_v8  ;;  %v7481_v54 = vmul.f32 %v5965_v57, %v308_v16  ;;  %v7484_v24 = vsel %vm859_vm1, %v2730_v22, 0.0  ;;  %v7489_v21 = vmul.f32 %v5989_v6, %v308_v16 }
 0x15b   :  { %11014 = vst [vmem:[#allocation41_spill] sm:$0xff] %v7464_v43  ;;  %v2457_v56 = vsel %vm859_vm1, %v11017_v23, %v2456_v59  ;;  %v7492_v8 = vmul.f32 %v5936_v42, %v258_v45  ;;  %v7498_v32 = vmul.f32 %v6003_v17, %v308_v16  ;;  %v2271_v27 = vadd.f32 %v2136_v4, %v1948_v35 }
 0x15c   :  { %11016 = vst [vmem:[#allocation54_spill] sm:$0xff] %v7474_v48  ;;  %v7486_v34 = vadd.f32 %v2457_v56, %v2270_v28  ;;  %v11021_v22 = vrot.slane %v7371_v61, 4  ;;  %v7506_v23 = vmul.f32 %v5999_v14, %v308_v16  ;;  %v7509_v56 = vmul.f32 %v5938_v44, %v258_v45 }
 0x15d   :  { %11018 = vst [vmem:[#allocation55_spill] sm:$0xff] %v7481_v54  ;;  %v11023_v55 = vrot.slane %v7365_v33, 4  ;;  %v11024_v26 = vrot.slane %v7407_v50, 4  ;;  %v7517_v61 = vmul.f32 %v5956_v51, %v258_v45  ;;  %v7522_v4 = vmul.f32 %v6001_v15, %v308_v16 }
 0x15e   :  { %11019 = vst [vmem:[#allocation56_spill] sm:$0xff] %v7486_v34  ;;  %v2459_v31 = vsel %vm859_vm1, %v2456_v59, %v11021_v22  ;;  %v2724_v59 = vmul.f32 %v7486_v34, %v7486_v34  ;;  %v1121_v41 = vmul.f32 %v5989_v6, %v258_v45  ;;  %v11027_v28 = vrot.slane %v11026_v60, 2 }
 0x15f   :  { %11020 = vst [vmem:[#allocation57_spill] sm:$0xff] %v7498_v32  ;;  %v915_v35 = vsel %vm859_vm1, %v11024_v26, %v11023_v55  ;;  %v11028_v33 = vrot.slane %v7492_v8, 2  ;;  %v7532_v26 = vmul.f32 %v5958_v52, %v258_v45  ;;  %v11029_v48 = vrot.slane %v7354_v62, 4 }
 0x160   :  { %11022 = vst [vmem:[#allocation58_spill] sm:$0xff] %v7506_v23  ;;  %v1044_v22 = vadd.f32 %v915_v35, %v720_v9  ;;  %v11030_v37 = vrot.slane %v7416_v38, 4  ;;  %v7539_v9 = vadd.f32 %v2459_v31, %v2271_v27  ;;  %v400_v35 = vmul.f32 %v5965_v57, %v258_v45 }
 0x161   :  { %11025 = vst [vmem:[#allocation59_spill] sm:$0xff] %v7522_v4  ;;  %v598_v25 = vsel %vm535_vm0, %v11028_v33, %v11027_v28  ;;  %v1896_v54 = vmul.f32 %v6003_v17, %v258_v45  ;;  %v2653_v28 = vadd.f32 %v7390_v11, %v7486_v34  ;;  %v2009_v55 = vmul.f32 %v5999_v14, %v258_v45 }
 0x162   :  { %v1687_v16 = vsel %vm859_vm1, %v11030_v37, %v11029_v48  ;;  %11031 = vst [vmem:[#allocation28_spill] sm:$0xff] %v7539_v9  ;;  %v7548_v62 = vmul.f32 %v6001_v15, %v258_v45  ;;  %v2784_v43 = vadd.f32 %v7419_v30, %v2724_v59  ;;  %v724_v37 = vadd.f32 %v598_v25, %v400_v35  ;;  %v11035_v30 = vld [vmem:[#allocation40_spill] sm:$0xff] }
 0x163   :  { %v1819_v60 = vadd.f32 %v1687_v16, %v1496_v20  ;;  %v1177_v48 = vadd.f32 %v1121_v41, %v1044_v22  ;;  %v11032_v20 = vld [vmem:[#allocation4_spill] sm:$0xff]  ;;  %v11034_v19 = vrot.slane %v7517_v61, 2  ;;  %v2140_v34 = vrot.slane %v2009_v55, 2  ;;  %v253_v41 = vpop.permute.xlu0 %252 }
 0x164   :  { %v11033_v16 = vrot.slane %v11032_v20, 2  ;;  %v2725_v45 = vmul.f32 %v7539_v9, %v7539_v9  ;;  %v2654_v59 = vadd.f32 %v2653_v28, %v7539_v9  ;;  %v11036_v22 = vrot.slane %v7041_v13, 4 }
 0x165   :  { %v1952_v27 = vadd.f32 %v1896_v54, %v1819_v60  ;;  %v719_v54 = vadd.f32 %v7449_v29, %v11035_v30  ;;  %v11038_v55 = vrot.slane %v7062_v63, 2  ;;  %v11039_v29 = vld [vmem:[#allocation30_spill] sm:$0xff]  ;;  %v11041_v28 = vrot.slane %v7532_v26, 4 }
 0x166   :  { %v1371_v11 = vsel %vm535_vm0, %v11034_v19, %v11033_v16  ;;  %v11037_v19 = vrot.slane %v7509_v56, 4  ;;  %v1495_v16 = vadd.f32 %v1362_v49, %v7162_v40  ;;  %v2785_v32 = vadd.f32 %v2784_v43, %v2725_v45 }
 0x167   :  { %v2143_v60 = vsel %vm535_vm0, %v2140_v34, %v11038_v55  ;;  %v1500_v25 = vadd.f32 %v1371_v11, %v1177_v48  ;;  %v11040_v30 = vrot.slane %v11039_v29, 4  ;;  %v11042_v9 = vrot.slane %v7407_v50, 4 }
 0x168   :  { %v922_v35 = vsel %vm859_vm1, %v11037_v19, %v11036_v22  ;;  %v2275_v33 = vadd.f32 %v2143_v60, %v1952_v27  ;;  %v11043_v22 = vrot.slane %v10974_v58, 4  ;;  %v456_v19 = vmul.f32 %v5936_v42, %v253_v41 }
 0x169   :  { %v1048_v31 = vadd.f32 %v922_v35, %v724_v37  ;;  %v1694_v13 = vsel %vm859_vm1, %v11041_v28, %v11040_v30  ;;  %v1233_v40 = vmul.f32 %v5956_v51, %v253_v41  ;;  %v11044_v43 = vrot.slane %v7080_v18, 4  ;;  %v11050_v28 = vld [vmem:[#allocation48_spill] sm:$0xff] }
 0x16a   :  { %v913_v63 = vsel %vm859_vm1, %v11043_v22, %v11042_v9  ;;  %v11045_v49 = vrot.slane %v7548_v62, 4  ;;  %v11046_v27 = vrot.slane %v7416_v38, 4  ;;  %v11047_v11 = vrot.slane %v6732_v10, 4 }
 0x16b   :  { %v1043_v48 = vadd.f32 %v913_v63, %v719_v54  ;;  %v2008_v58 = vmul.f32 %v5999_v14, %v253_v41  ;;  %v7600_v35 = vmul.f32 %v5938_v44, %v253_v41  ;;  %v1120_v18 = vmul.f32 %v5989_v6, %v253_v41 }
 0x16c   :  { %v2466_v37 = vsel %vm859_vm1, %v11045_v49, %v11044_v43  ;;  %v1685_v50 = vsel %vm859_vm1, %v11047_v11, %v11046_v27  ;;  %v593_v55 = vrot.slane %v456_v19, 2  ;;  %v1366_v60 = vrot.slane %v1233_v40, 2  ;;  %v11051_v40 = vld [vmem:[#allocation49_spill] sm:$0xff]  ;;  %v11055_v11 = vld [vmem:[#allocation16_spill] sm:$0xff] }
 0x16d   :  { %v7597_v9 = vadd.f32 %v2466_v37, %v2275_v33  ;;  %v1818_v45 = vadd.f32 %v1685_v50, %v1495_v16  ;;  %v1895_v54 = vmul.f32 %v6003_v17, %v253_v41  ;;  %v2138_v30 = vrot.slane %v2008_v58, 2 }
 0x16e   :  { %v7605_v38 = vadd.f32 %v7201_v39, %v1048_v31  ;;  %v7607_v10 = vadd.f32 %v1694_v13, %v1500_v25  ;;  %v1950_v33 = vadd.f32 %v11050_v28, %v7292_v46  ;;  %v7612_v16 = vmul.f32 %v5958_v52, %v253_v41  ;;  %v323_v13 = vpop.permute.xlu2 %322  ;;  %v11057_v28 = vld [vmem:[#allocation44_spill] sm:$0xff] }
 0x16f   :  { %11048 = vst [vmem:[#allocation4_spill] sm:$0xff] %v7597_v9  ;;  %v2656_v22 = vadd.f32 %v7439_v1, %v2654_v59  ;;  %v2787_v63 = vadd.f32 %v7444_v7, %v2785_v32  ;;  %v399_v19 = vmul.f32 %v5965_v57, %v253_v41  ;;  %v11052_v43 = vrot.slane %v11051_v40, 2 }
 0x170   :  { %11049 = vst [vmem:[#allocation40_spill] sm:$0xff] %v7605_v38  ;;  %v7622_v39 = vmul.f32 %v7597_v9, %v7597_v9  ;;  %v1176_v46 = vadd.f32 %v1120_v18, %v1043_v48  ;;  %v2331_v25 = vmul.f32 %v6001_v15, %v253_v41  ;;  %v11053_v1 = vrot.slane %v7492_v8, 2 }
 0x171   :  { %v2139_v49 = vsel %vm535_vm0, %v11052_v43, %v2138_v30  ;;  %v11054_v32 = vrot.slane %v7517_v61, 2  ;;  %v1951_v37 = vadd.f32 %v1895_v54, %v1818_v45  ;;  %v11056_v50 = vrot.slane %v11055_v11, 2 }
 0x172   :  { %v596_v7 = vsel %vm535_vm0, %v593_v55, %v11053_v1  ;;  %v2273_v27 = vadd.f32 %v2139_v49, %v1950_v33  ;;  %v2141_v41 = vsel %vm535_vm0, %v2138_v30, %v2140_v34  ;;  %v2461_v18 = vrot.slane %v2331_v25, 4  ;;  %v11061_v49 = vld [vmem:[#allocation50_spill] sm:$0xff] }
 0x173   :  { %v1369_v59 = vsel %vm535_vm0, %v1366_v60, %v11054_v32  ;;  %v7635_v58 = vsel %vm535_vm0, %v11056_v50, %v593_v55  ;;  %v11058_v8 = vrot.slane %v11057_v28, 2  ;;  %v7643_v61 = vmul.f32 %v5936_v42, %v323_v13  ;;  %v273_v55 = vpop.permute.xlu1 %272 }
 0x174   :  { %v7646_v45 = vmul.f32 %v5938_v44, %v323_v13  ;;  %v7649_v54 = vmul.f32 %v5956_v51, %v323_v13  ;;  %v723_v33 = vadd.f32 %v596_v7, %v399_v19  ;;  %v1499_v43 = vadd.f32 %v1369_v59, %v1176_v46 }
 0x175   :  { %v1367_v40 = vsel %vm535_vm0, %v11058_v8, %v1366_v60  ;;  %11059 = vst [vmem:[#allocation30_spill] sm:$0xff] %v7643_v61  ;;  %v11062_v1 = vrot.slane %v11061_v49, 4  ;;  %v7655_v30 = vmul.f32 %v5958_v52, %v323_v13  ;;  %v2274_v60 = vadd.f32 %v2141_v41, %v1951_v37 }
 0x176   :  { %11060 = vst [vmem:[#allocation48_spill] sm:$0xff] %v7649_v54  ;;  %v413_v32 = vmul.f32 %v5965_v57, %v323_v13  ;;  %v7661_v11 = vmul.f32 %v5989_v6, %v323_v13  ;;  %v7664_v50 = vmul.f32 %v6003_v17, %v323_v13  ;;  %v7667_v19 = vmul.f32 %v5999_v14, %v323_v13 }
 0x177   :  { %v2462_v34 = vsel %vm859_vm1, %v11062_v1, %v2461_v18  ;;  %11063 = vst [vmem:[#allocation49_spill] sm:$0xff] %v7655_v30  ;;  %v7670_v46 = vmul.f32 %v5936_v42, %v273_v55  ;;  %v7673_v7 = vmul.f32 %v5938_v44, %v273_v55  ;;  %v11067_v28 = vrot.slane %v7548_v62, 4 }
 0x178   :  { %v7657_v25 = vadd.f32 %v2462_v34, %v2273_v27  ;;  %11065 = vst [vmem:[#allocation44_spill] sm:$0xff] %v7661_v11  ;;  %v7685_v1 = vmul.f32 %v6001_v15, %v323_v13  ;;  %v403_v31 = vmul.f32 %v5965_v57, %v273_v55  ;;  %v11069_v37 = vrot.slane %v7509_v56, 4 }
 0x179   :  { %11066 = vst [vmem:[#allocation50_spill] sm:$0xff] %v7664_v50  ;;  %v2464_v8 = vsel %vm859_vm1, %v2461_v18, %v11067_v28  ;;  %v10676_v34 = vrot.slane %v7670_v46, 2  ;;  %v11070_v27 = vrot.slane %v7600_v35, 4  ;;  %v7697_v62 = vmul.f32 %v5956_v51, %v273_v55  ;;  %v11071_v28 = vld [vmem:[#allocation8_spill] sm:$0xff] }
 0x17a   :  { %11064 = vst [vmem:[#allocation16_spill] sm:$0xff] %v7657_v25  ;;  %v2727_v59 = vmul.f32 %v7657_v25, %v7657_v25  ;;  %v7688_v48 = vadd.f32 %v2464_v8, %v2274_v60  ;;  %v2657_v18 = vadd.f32 %v2656_v22, %v7657_v25  ;;  %v11072_v13 = vrot.slane %v11071_v28, 2 }
 0x17b   :  { %v920_v41 = vsel %vm859_vm1, %v11070_v27, %v11069_v37  ;;  %v1124_v56 = vmul.f32 %v5989_v6, %v273_v55  ;;  %v7708_v23 = vmul.f32 %v5958_v52, %v273_v55  ;;  %v11073_v37 = vrot.slane %v7532_v26, 4 }
 0x17c   :  { %11068 = vst [vmem:[#allocation60_spill] sm:$0xff] %v7688_v48  ;;  %v603_v60 = vsel %vm535_vm0, %v10676_v34, %v11072_v13  ;;  %v1047_v49 = vadd.f32 %v920_v41, %v723_v33  ;;  %v2788_v4 = vadd.f32 %v2787_v63, %v2727_v59  ;;  %v11074_v27 = vrot.slane %v7612_v16, 4 }
 0x17d   :  { %v1373_v25 = vrot.slane %v7697_v62, 2  ;;  %v1899_v13 = vmul.f32 %v6003_v17, %v273_v55  ;;  %v2012_v34 = vmul.f32 %v5999_v14, %v273_v55  ;;  %v2728_v63 = vmul.f32 %v7688_v48, %v7688_v48 }
 0x17e   :  { %v1692_v22 = vsel %vm859_vm1, %v11074_v27, %v11073_v37  ;;  %v11075_v33 = vrot.slane %v7643_v61, 2  ;;  %v727_v26 = vadd.f32 %v603_v60, %v403_v31  ;;  %v2658_v8 = vadd.f32 %v2657_v18, %v7688_v48 }
 0x17f   :  { %v1822_v30 = vadd.f32 %v1692_v22, %v1499_v43  ;;  %v2145_v27 = vrot.slane %v2012_v34, 2  ;;  %v2335_v43 = vmul.f32 %v6001_v15, %v273_v55  ;;  %v2789_v62 = vadd.f32 %v2788_v4, %v2728_v63  ;;  %v11076_v22 = vld [vmem:[#allocation3_spill] sm:$0xff] }
 0x180   :  { %v737_v59 = vadd.f32 %v11075_v33, %v413_v32  ;;  %v11077_v54 = vrot.slane %v11076_v22, 4  ;;  %v11078_v11 = vrot.slane %v7673_v7, 4  ;;  %v1180_v50 = vadd.f32 %v1124_v56, %v1047_v49  ;;  %v268_v32 = vpop.permute.xlu0 %267  ;;  %v11079_v33 = vld [vmem:[#allocation22_spill] sm:$0xff]  ;;  %v11086_v56 = vld [vmem:[#allocation45_spill] sm:$0xff] }
 0x181   :  { %v1955_v61 = vadd.f32 %v1899_v13, %v1822_v30  ;;  %v11080_v41 = vrot.slane %v11079_v33, 2  ;;  %v11081_v34 = vrot.slane %v7216_v12, 2  ;;  %v1498_v4 = vadd.f32 %v1367_v40, %v7274_v2 }
 0x182   :  { %v927_v38 = vsel %vm859_vm1, %v11078_v11, %v11077_v54  ;;  %v11082_v60 = vrot.slane %v7646_v45, 4  ;;  %v11084_v11 = vld [vmem:[#allocation46_spill] sm:$0xff]  ;;  %v11085_v49 = vrot.slane %v7612_v16, 4  ;;  %v11087_v13 = vrot.slane %v11086_v56, 4 }
 0x183   :  { %v1376_v31 = vsel %vm535_vm0, %v1373_v25, %v11080_v41  ;;  %v2148_v55 = vsel %vm535_vm0, %v2145_v27, %v11081_v34  ;;  %v1051_v54 = vadd.f32 %v927_v38, %v727_v26  ;;  %v722_v30 = vadd.f32 %v7635_v58, %v11084_v11 }
 0x184   :  { %v7741_v63 = vadd.f32 %v11082_v60, %v737_v59  ;;  %v1690_v41 = vsel %vm859_vm1, %v11087_v13, %v11085_v49  ;;  %v2659_v37 = vadd.f32 %v2658_v8, %v7597_v9  ;;  %v2468_v18 = vrot.slane %v2335_v43, 4  ;;  %v11091_v49 = vld [vmem:[#allocation43_spill] sm:$0xff] }
 0x185   :  { %v1821_v34 = vadd.f32 %v1690_v41, %v1498_v4  ;;  %v459_v2 = vmul.f32 %v5936_v42, %v268_v32  ;;  %v2790_v40 = vadd.f32 %v2789_v62, %v7622_v39  ;;  %v1503_v59 = vadd.f32 %v1376_v31, %v1180_v50 }
 0x186   :  { %11083 = vst [vmem:[#allocation8_spill] sm:$0xff] %v7741_v63  ;;  %v2278_v60 = vadd.f32 %v2148_v55, %v1955_v61  ;;  %v1236_v38 = vmul.f32 %v5956_v51, %v268_v32  ;;  %v11088_v58 = vrot.slane %v7210_v36, 4  ;;  %v11089_v16 = vrot.slane %v7708_v23, 4  ;;  %v11093_v55 = vld [vmem:[#allocation19_spill] sm:$0xff] }
 0x187   :  { %v11090_v11 = vrot.slane %v7600_v35, 4  ;;  %v11092_v8 = vrot.slane %v11091_v49, 4  ;;  %v1898_v4 = vmul.f32 %v6003_v17, %v268_v32  ;;  %v2011_v39 = vmul.f32 %v5999_v14, %v268_v32 }
 0x188   :  { %v1699_v26 = vsel %vm859_vm1, %v11089_v16, %v11088_v58  ;;  %v7767_v61 = vadd.f32 %v7329_v53, %v1051_v54  ;;  %v599_v62 = vrot.slane %v459_v2, 2  ;;  %v1123_v31 = vmul.f32 %v5989_v6, %v268_v32  ;;  %v338_v54 = vpop.permute.xlu2 %337 }
 0x189   :  { %v918_v43 = vsel %vm859_vm1, %v11092_v8, %v11090_v11  ;;  %v11094_v56 = vrot.slane %v11093_v55, 4  ;;  %v1372_v35 = vrot.slane %v1236_v38, 2  ;;  %v1954_v41 = vadd.f32 %v1898_v4, %v1821_v34 }
 0x18a   :  { %v1046_v50 = vadd.f32 %v918_v43, %v722_v30  ;;  %v2144_v58 = vrot.slane %v2011_v39, 2  ;;  %v783_v11 = vmul.f32 %v5938_v44, %v268_v32  ;;  %v1559_v49 = vmul.f32 %v5958_v52, %v268_v32 }
 0x18b   :  { %v2471_v13 = vsel %vm859_vm1, %v2468_v18, %v11094_v56  ;;  %v2334_v53 = vmul.f32 %v6001_v15, %v268_v32  ;;  %v7778_v30 = vadd.f32 %v1699_v26, %v1503_v59  ;;  %v2661_v2 = vadd.f32 %v7468_v47, %v2659_v37  ;;  %v288_v56 = vpop.permute.xlu1 %287 }
 0x18c   :  { %v7773_v16 = vadd.f32 %v2471_v13, %v2278_v60  ;;  %v2792_v8 = vadd.f32 %v7484_v24, %v2790_v40  ;;  %v2146_v43 = vsel %vm535_vm0, %v2144_v58, %v2145_v27  ;;  %v11096_v34 = vrot.slane %v7670_v46, 2 }
 0x18d   :  { %v1179_v38 = vadd.f32 %v1123_v31, %v1046_v50  ;;  %v2277_v4 = vadd.f32 %v2146_v43, %v1954_v41  ;;  %v2467_v39 = vrot.slane %v2334_v53, 4  ;;  %v402_v13 = vmul.f32 %v5965_v57, %v268_v32 }
 0x18e   :  { %11095 = vst [vmem:[#allocation3_spill] sm:$0xff] %v7773_v16  ;;  %v601_v60 = vsel %vm535_vm0, %v599_v62, %v11096_v34  ;;  %v1374_v9 = vsel %vm535_vm0, %v1372_v35, %v1373_v25  ;;  %v7789_v59 = vmul.f32 %v5936_v42, %v338_v54  ;;  %v7792_v47 = vmul.f32 %v5938_v44, %v338_v54 }
 0x18f   :  { %v7796_v24 = vmul.f32 %v7773_v16, %v7773_v16  ;;  %v923_v46 = vrot.slane %v783_v11, 4  ;;  %v1695_v37 = vrot.slane %v1559_v49, 4  ;;  %v2469_v27 = vsel %vm859_vm1, %v2467_v39, %v2468_v18 }
 0x190   :  { %11097 = vst [vmem:[#allocation22_spill] sm:$0xff] %v7789_v59  ;;  %v726_v40 = vadd.f32 %v601_v60, %v402_v13  ;;  %v7799_v26 = vadd.f32 %v2469_v27, %v2277_v4  ;;  %v7802_v32 = vmul.f32 %v5965_v57, %v338_v54  ;;  %v463_v25 = vmul.f32 %v5936_v42, %v288_v56 }
 0x191   :  { %11098 = vst [vmem:[#allocation46_spill] sm:$0xff] %v7792_v47  ;;  %v1502_v50 = vadd.f32 %v1374_v9, %v1179_v38  ;;  %v7806_v62 = vmul.f32 %v5989_v6, %v338_v54  ;;  %v7809_v31 = vmul.f32 %v5956_v51, %v338_v54  ;;  %v787_v35 = vmul.f32 %v5938_v44, %v288_v56  ;;  %v11103_v38 = vld [vmem:[#allocation14_spill] sm:$0xff] }
 0x192   :  { %11099 = vst [vmem:[#allocation45_spill] sm:$0xff] %v7799_v26  ;;  %v7815_v58 = vmul.f32 %v5958_v52, %v338_v54  ;;  %v606_v11 = vrot.slane %v463_v25, 2  ;;  %v7818_v49 = vmul.f32 %v6003_v17, %v338_v54  ;;  %v7821_v9 = vmul.f32 %v5999_v14, %v338_v54 }
 0x193   :  { %11100 = vst [vmem:[#allocation43_spill] sm:$0xff] %v7802_v32  ;;  %v7824_v53 = vmul.f32 %v6001_v15, %v338_v54  ;;  %v1240_v43 = vmul.f32 %v5956_v51, %v288_v56  ;;  %v2731_v34 = vmul.f32 %v7799_v26, %v7799_v26  ;;  %v406_v60 = vmul.f32 %v5965_v57, %v288_v56 }
 0x194   :  { %11101 = vst [vmem:[#allocation19_spill] sm:$0xff] %v7818_v49  ;;  %v11104_v4 = vrot.slane %v11103_v38, 2  ;;  %v11105_v13 = vrot.slane %v7673_v7, 4  ;;  %v930_v25 = vrot.slane %v787_v35, 4  ;;  %v1127_v54 = vmul.f32 %v5989_v6, %v288_v56 }
 0x195   :  { %11102 = vst [vmem:[#allocation61_spill] sm:$0xff] %v7824_v53  ;;  %v1563_v41 = vmul.f32 %v5958_v52, %v288_v56  ;;  %v1379_v47 = vrot.slane %v1240_v43, 2  ;;  %v11106_v32 = vrot.slane %v7708_v23, 4  ;;  %v2015_v49 = vmul.f32 %v5999_v14, %v288_v56 }
 0x196   :  { %v608_v39 = vsel %vm535_vm0, %v606_v11, %v11104_v4  ;;  %v925_v27 = vsel %vm859_vm1, %v923_v46, %v11105_v13  ;;  %v1902_v7 = vmul.f32 %v6003_v17, %v288_v56  ;;  %v11107_v46 = vrot.slane %v11032_v20, 2  ;;  %v11110_v20 = vld [vmem:[#allocation38_spill] sm:$0xff] }
 0x197   :  { %v1050_v18 = vadd.f32 %v925_v27, %v726_v40  ;;  %v730_v48 = vadd.f32 %v608_v39, %v406_v60  ;;  %v1697_v59 = vsel %vm859_vm1, %v1695_v37, %v11106_v32  ;;  %v2151_v23 = vrot.slane %v2015_v49, 2  ;;  %v283_v39 = vpop.permute.xlu0 %282  ;;  %v11108_v32 = vld [vmem:[#allocation10_spill] sm:$0xff] }
 0x198   :  { %v1825_v4 = vadd.f32 %v1697_v59, %v1502_v50  ;;  %v1501_v40 = vadd.f32 %v11107_v46, %v7425_v5  ;;  %v2662_v37 = vadd.f32 %v2661_v2, %v7799_v26  ;;  %v11109_v13 = vrot.slane %v11108_v32, 4  ;;  %v11113_v2 = vld [vmem:[#allocation35_spill] sm:$0xff] }
 0x199   :  { %v1183_v50 = vadd.f32 %v1127_v54, %v1050_v18  ;;  %v1702_v27 = vrot.slane %v1563_v41, 4  ;;  %v2793_v11 = vadd.f32 %v2792_v8, %v2731_v34  ;;  %v11111_v5 = vrot.slane %v11110_v20, 2  ;;  %v11115_v34 = vld [vmem:[#allocation52_spill] sm:$0xff] }
 0x19a   :  { %v932_v59 = vsel %vm859_vm1, %v930_v25, %v11109_v13  ;;  %v2338_v35 = vmul.f32 %v6001_v15, %v288_v56  ;;  %v1958_v60 = vadd.f32 %v1902_v7, %v1825_v4  ;;  %v11112_v49 = vrot.slane %v11039_v29, 4 }
 0x19b   :  { %v1054_v63 = vadd.f32 %v932_v59, %v730_v48  ;;  %v1381_v46 = vsel %vm535_vm0, %v1379_v47, %v11111_v5  ;;  %v1956_v26 = vadd.f32 %v11113_v2, %v7607_v10  ;;  %v462_v53 = vmul.f32 %v5936_v42, %v283_v39  ;;  %v11117_v59 = vld [vmem:[#allocation20_spill] sm:$0xff] }
 0x19c   :  { %v1824_v43 = vadd.f32 %v11112_v49, %v1501_v40  ;;  %v11114_v18 = vrot.slane %v7347_v0, 2  ;;  %v1126_v48 = vmul.f32 %v5989_v6, %v283_v39  ;;  %v1239_v41 = vmul.f32 %v5956_v51, %v283_v39 }
 0x19d   :  { %v1901_v47 = vmul.f32 %v6003_v17, %v283_v39  ;;  %v1506_v56 = vadd.f32 %v1381_v46, %v1183_v50  ;;  %v11116_v25 = vrot.slane %v11115_v34, 4  ;;  %v604_v54 = vrot.slane %v462_v53, 2 }
 0x19e   :  { %v2153_v8 = vsel %vm535_vm0, %v2151_v23, %v11114_v18  ;;  %v2014_v10 = vmul.f32 %v5999_v14, %v283_v39  ;;  %v2474_v4 = vrot.slane %v2338_v35, 4  ;;  %v405_v7 = vmul.f32 %v5965_v57, %v283_v39 }
 0x19f   :  { %v1704_v29 = vsel %vm859_vm1, %v1702_v27, %v11116_v25  ;;  %v7875_v40 = vmul.f32 %v5938_v44, %v283_v39  ;;  %v1957_v23 = vadd.f32 %v1901_v47, %v1824_v43  ;;  %v2281_v13 = vadd.f32 %v2153_v8, %v1958_v60  ;;  %v303_v27 = vpop.permute.xlu1 %302 }
 0x1a0   :  { %v1182_v5 = vadd.f32 %v1126_v48, %v11117_v59  ;;  %v1377_v49 = vrot.slane %v1239_v41, 2  ;;  %v2149_v2 = vrot.slane %v2014_v10, 2  ;;  %v7879_v50 = vadd.f32 %v7489_v21, %v1054_v63 }
 0x1a1   :  { %v729_v46 = vadd.f32 %v604_v54, %v405_v7  ;;  %v7882_v53 = vmul.f32 %v5958_v52, %v283_v39  ;;  %v2337_v35 = vmul.f32 %v6001_v15, %v283_v39  ;;  %v7885_v18 = vadd.f32 %v1704_v29, %v1506_v56 }
 0x1a2   :  { %v2663_v25 = vadd.f32 %v2662_v37, %v7773_v16  ;;  %v11118_v60 = vrot.slane %v7216_v12, 2  ;;  %v2280_v8 = vadd.f32 %v2149_v2, %v1957_v23  ;;  %v11119_v48 = vrot.slane %v7360_v3, 4  ;;  %v11130_v16 = vld [vmem:[#allocation18_spill] sm:$0xff] }
 0x1a3   :  { %v928_v63 = vrot.slane %v7875_v40, 4  ;;  %v2472_v47 = vrot.slane %v2337_v35, 4  ;;  %v2794_v39 = vadd.f32 %v2793_v11, %v7796_v24  ;;  %v1505_v56 = vadd.f32 %v1377_v49, %v1182_v5 }
 0x1a4   :  { %v2150_v43 = vsel %vm535_vm0, %v11118_v60, %v2149_v2  ;;  %v2476_v21 = vsel %vm859_vm1, %v2474_v4, %v11119_v48  ;;  %v7899_v37 = vmul.f32 %v5936_v42, %v303_v27  ;;  %v1700_v29 = vrot.slane %v7882_v53, 4 }
 0x1a5   :  { %v2279_v41 = vadd.f32 %v2150_v43, %v1956_v26  ;;  %v7895_v10 = vadd.f32 %v2476_v21, %v2281_v13  ;;  %v1053_v12 = vadd.f32 %v928_v63, %v729_v46  ;;  %v11121_v7 = vrot.slane %v11093_v55, 4  ;;  %v7919_v55 = vpop.permute.xlu2 %352 }
 0x1a6   :  { %v1130_v4 = vmul.f32 %v5989_v6, %v303_v27  ;;  %v11122_v26 = vrot.slane %v11071_v28, 2  ;;  %v7911_v24 = vadd.f32 %v2472_v47, %v2280_v8  ;;  %v7914_v11 = vmul.f32 %v5956_v51, %v303_v27  ;;  %11126 = vst [vmem:[#allocation35_spill] sm:$0xff] %v7919_v55 }
 0x1a7   :  { %11120 = vst [vmem:[#allocation14_spill] sm:$0xff] %v7895_v10  ;;  %v2473_v23 = vsel %vm859_vm1, %v11121_v7, %v2472_v47  ;;  %v11125_v59 = vrot.slane %v11079_v33, 2  ;;  %v611_v2 = vrot.slane %v7899_v37, 2  ;;  %v7923_v28 = vmul.f32 %v5958_v52, %v303_v27 }
 0x1a8   :  { %v605_v40 = vsel %vm535_vm0, %v11122_v26, %v604_v54  ;;  %v7909_v13 = vadd.f32 %v2473_v23, %v2279_v41  ;;  %11124 = vst [vmem:[#allocation38_spill] sm:$0xff] %v7911_v24  ;;  %v1186_v46 = vadd.f32 %v1130_v4, %v1053_v12  ;;  %v1828_v54 = vadd.f32 %v1700_v29, %v1505_v56 }
 0x1a9   :  { %v1378_v5 = vsel %vm535_vm0, %v11125_v59, %v1377_v49  ;;  %v409_v35 = vmul.f32 %v5965_v57, %v303_v27  ;;  %v10689_v60 = vrot.slane %v7914_v11, 2  ;;  %v7931_v49 = vmul.f32 %v5938_v44, %v303_v27 }
 0x1aa   :  { %11123 = vst [vmem:[#allocation10_spill] sm:$0xff] %v7909_v13  ;;  %v2733_v53 = vmul.f32 %v7909_v13, %v7909_v13  ;;  %v2664_v33 = vadd.f32 %v2663_v25, %v7909_v13  ;;  %v1905_v43 = vmul.f32 %v6003_v17, %v303_v27  ;;  %v7935_v8 = vmul.f32 %v5999_v14, %v303_v27 }
 0x1ab   :  { %v2734_v48 = vmul.f32 %v7911_v24, %v7911_v24  ;;  %v7941_v21 = vmul.f32 %v5999_v14, %v7919_v55  ;;  %v1509_v41 = vadd.f32 %v10689_v60, %v1186_v46  ;;  %v10691_v25 = vrot.slane %v7923_v28, 4 }
 0x1ac   :  { %v733_v47 = vadd.f32 %v611_v2, %v409_v35  ;;  %v1961_v56 = vadd.f32 %v1905_v43, %v1828_v54  ;;  %v10692_v37 = vrot.slane %v7935_v8, 2  ;;  %v7948_v12 = vmul.f32 %v6001_v15, %v303_v27  ;;  %v298_v35 = vpop.permute.xlu0 %297 }
 0x1ad   :  { %v2665_v7 = vsel %vm859_vm1, %v7911_v24, 0.0  ;;  %v2795_v23 = vadd.f32 %v2794_v39, %v2733_v53  ;;  %v7954_v4 = vmul.f32 %v6001_v15, %v7919_v55  ;;  %v1832_v26 = vadd.f32 %v10691_v25, %v1509_v41  ;;  %v11129_v53 = vld [vmem:[#allocation50_spill] sm:$0xff] }
 0x1ae   :  { %v2666_v59 = vadd.f32 %v2665_v7, %v2664_v33  ;;  %v10697_v46 = vrot.slane %v7931_v49, 4  ;;  %v2284_v54 = vadd.f32 %v10692_v37, %v1961_v56  ;;  %v10698_v27 = vrot.slane %v7948_v12, 4 }
 0x1af   :  { %11127 = vst [vmem:[#allocation52_spill] sm:$0xff] %v7954_v4  ;;  %v2735_v43 = vmul.f32 %v7895_v10, %v7895_v10  ;;  %v7966_v39 = vmul.f32 %v6003_v17, %v7919_v55  ;;  %v1965_v60 = vadd.f32 %v11129_v53, %v1832_v26  ;;  %v728_v41 = vadd.f32 %v605_v40, %v11130_v16  ;;  %v11133_v55 = vld [vmem:[#allocation40_spill] sm:$0xff] }
 0x1b0   :  { %v2796_v33 = vsel %vm859_vm1, %v2734_v48, 0.0  ;;  %v1057_v56 = vadd.f32 %v10697_v46, %v733_v47  ;;  %v7976_v25 = vadd.f32 %v10698_v27, %v2284_v54  ;;  %v11132_v24 = vrot.slane %v7667_v19, 2 }
 0x1b1   :  { %11128 = vst [vmem:[#allocation20_spill] sm:$0xff] %v7966_v39  ;;  %v2797_v37 = vadd.f32 %v2796_v33, %v2795_v23  ;;  %v1504_v39 = vadd.f32 %v1378_v5, %v11133_v55  ;;  %v465_v26 = vmul.f32 %v5936_v42, %v298_v35  ;;  %v7983_v16 = vadd.f32 %v2666_v59, %v7895_v10 }
 0x1b2   :  { %11131 = vst [vmem:[#allocation50_spill] sm:$0xff] %v7976_v25  ;;  %v2288_v13 = vadd.f32 %v11132_v24, %v1965_v60  ;;  %v11134_v48 = vrot.slane %v11076_v22, 4  ;;  %v1242_v54 = vmul.f32 %v5956_v51, %v298_v35  ;;  %v11135_v23 = vrot.slane %v7685_v1, 4 }
 0x1b3   :  { %v11137_v5 = vrot.slane %v7210_v36, 4  ;;  %v609_v60 = vrot.slane %v465_v26, 2  ;;  %v2738_v59 = vmul.f32 %v7976_v25, %v7976_v25  ;;  %v8000_v33 = vmul.f32 %v5938_v44, %v298_v35  ;;  %v11139_v26 = vld [vmem:[#allocation53_spill] sm:$0xff] }
 0x1b4   :  { %v929_v47 = vsel %vm859_vm1, %v11134_v48, %v928_v63  ;;  %v7992_v53 = vadd.f32 %v11135_v23, %v2288_v13  ;;  %v1129_v22 = vmul.f32 %v5989_v6, %v298_v35  ;;  %v8004_v63 = vmul.f32 %v5958_v52, %v298_v35  ;;  %v11138_v13 = vld [vmem:[#allocation44_spill] sm:$0xff] }
 0x1b5   :  { %v1052_v24 = vadd.f32 %v929_v47, %v728_v41  ;;  %v1701_v55 = vsel %vm859_vm1, %v11137_v5, %v1700_v29  ;;  %v2798_v48 = vadd.f32 %v2797_v37, %v2735_v43  ;;  %v8007_v23 = vadd.f32 %v11138_v13, %v1057_v56  ;;  %v318_v56 = vpop.permute.xlu1 %317 }
 0x1b6   :  { %11136 = vst [vmem:[#allocation18_spill] sm:$0xff] %v7992_v53  ;;  %v1827_v41 = vadd.f32 %v1701_v55, %v1504_v39  ;;  %v1382_v36 = vrot.slane %v1242_v54, 2  ;;  %v8011_v29 = vsel %vm859_vm1, %v7976_v25, 0.0  ;;  %v1959_v47 = vadd.f32 %v11139_v26, %v7778_v30 }
 0x1b7   :  { %v408_v5 = vmul.f32 %v5965_v57, %v298_v35  ;;  %v1904_v40 = vmul.f32 %v6003_v17, %v298_v35  ;;  %v2742_v7 = vmul.f32 %v7992_v53, %v7992_v53  ;;  %v612_v37 = vsel %vm535_vm0, %v609_v60, %v611_v2 }
 0x1b8   :  { %v2017_v43 = vmul.f32 %v5999_v14, %v298_v35  ;;  %v2340_v39 = vmul.f32 %v6001_v15, %v298_v35  ;;  %v8023_v54 = vsel %vm859_vm1, %v2738_v59, 0.0  ;;  %v1185_v30 = vadd.f32 %v1129_v22, %v1052_v24  ;;  %v1073_v35 = vpop.permute.xlu2 %1072 }
 0x1b9   :  { %v8029_v26 = vsel %vm859_vm1, %v7992_v53, 0.0  ;;  %v11140_v46 = vrot.slane %v7914_v11, 2  ;;  %v11141_v25 = vrot.slane %v11103_v38, 2  ;;  %v732_v4 = vadd.f32 %v612_v37, %v408_v5 }
 0x1ba   :  { %v2154_v27 = vrot.slane %v2017_v43, 2  ;;  %v2477_v10 = vrot.slane %v2340_v39, 4  ;;  %v1960_v55 = vadd.f32 %v1904_v40, %v1827_v41  ;;  %v8038_v24 = vmul.f32 %v5936_v42, %v318_v56 }
 0x1bb   :  { %v1385_v2 = vsel %vm535_vm0, %v1382_v36, %v11140_v46  ;;  %v610_v59 = vsel %vm535_vm0, %v11141_v25, %v609_v60  ;;  %v8041_v22 = vsel %vm859_vm1, %v2742_v7, 0.0  ;;  %v11142_v13 = vrot.slane %v11110_v20, 2 }
 0x1bc   :  { %v11143_v46 = vrot.slane %v7347_v0, 2  ;;  %v11144_v38 = vrot.slane %v7935_v8, 2  ;;  %v1508_v60 = vadd.f32 %v1385_v2, %v1185_v30  ;;  %v8053_v41 = vmul.f32 %v5989_v6, %v1073_v35 }
 0x1bd   :  { %v1383_v11 = vsel %vm535_vm0, %v11142_v13, %v1382_v36  ;;  %v8056_v7 = vmul.f32 %v5956_v51, %v1073_v35  ;;  %v11147_v20 = vrot.slane %v7360_v3, 4  ;;  %v8062_v0 = vmul.f32 %v5958_v52, %v1073_v35  ;;  %v11150_v13 = vld [vmem:[#allocation30_spill] sm:$0xff] }
 0x1be   :  { %v2155_v43 = vsel %vm535_vm0, %v11143_v46, %v2154_v27  ;;  %v2157_v25 = vsel %vm535_vm0, %v2154_v27, %v11144_v38  ;;  %11145 = vst [vmem:[#allocation40_spill] sm:$0xff] %v8053_v41  ;;  %v10703_v5 = vrot.slane %v8038_v24, 2  ;;  %v8066_v8 = vmul.f32 %v5938_v44, %v318_v56 }
 0x1bf   :  { %v2282_v40 = vadd.f32 %v2155_v43, %v1959_v47  ;;  %11146 = vst [vmem:[#allocation44_spill] sm:$0xff] %v8056_v7  ;;  %v2478_v36 = vsel %vm859_vm1, %v11147_v20, %v2477_v10  ;;  %v2283_v27 = vadd.f32 %v2157_v25, %v1960_v55  ;;  %v8071_v37 = vmul.f32 %v6003_v17, %v1073_v35 }
 0x1c0   :  { %11148 = vst [vmem:[#allocation53_spill] sm:$0xff] %v8062_v0  ;;  %v412_v39 = vmul.f32 %v5965_v57, %v318_v56  ;;  %v8075_v3 = vmul.f32 %v5999_v14, %v1073_v35  ;;  %v8078_v30 = vmul.f32 %v6001_v15, %v1073_v35  ;;  %v11151_v2 = vrot.slane %v11150_v13, 2 }
 0x1c1   :  { %v8068_v47 = vadd.f32 %v2478_v36, %v2282_v40  ;;  %v1246_v25 = vmul.f32 %v5956_v51, %v318_v56  ;;  %v8090_v40 = vmul.f32 %v5958_v52, %v318_v56  ;;  %v11152_v35 = vrot.slane %v7948_v12, 4 }
 0x1c2   :  { %v619_v46 = vsel %vm535_vm0, %v10703_v5, %v11151_v2  ;;  %v11153_v13 = vrot.slane %v7931_v49, 4  ;;  %v11154_v2 = vrot.slane %v8000_v33, 4  ;;  %v11155_v55 = vrot.slane %v7923_v28, 4 }
 0x1c3   :  { %11149 = vst [vmem:[#allocation62_spill] sm:$0xff] %v8068_v47  ;;  %v2736_v43 = vmul.f32 %v8068_v47, %v8068_v47  ;;  %v736_v38 = vadd.f32 %v619_v46, %v412_v39  ;;  %v2480_v20 = vsel %vm859_vm1, %v2477_v10, %v11152_v35  ;;  %v11156_v39 = vrot.slane %v8004_v63, 4  ;;  %v11171_v63 = vld [vmem:[#allocation57_spill] sm:$0xff] }
 0x1c4   :  { %v936_v5 = vsel %vm859_vm1, %v11154_v2, %v11153_v13  ;;  %v8106_v53 = vadd.f32 %v2480_v20, %v2283_v27  ;;  %v1133_v12 = vmul.f32 %v5989_v6, %v318_v56  ;;  %v2668_v35 = vadd.f32 %v7983_v16, %v8068_v47 }
 0x1c5   :  { %v1708_v46 = vsel %vm859_vm1, %v11156_v39, %v11155_v55  ;;  %v1056_v41 = vadd.f32 %v936_v5, %v732_v4  ;;  %v11158_v49 = vrot.slane %v7646_v45, 4  ;;  %v11159_v36 = vrot.slane %v8066_v8, 4  ;;  %v11162_v4 = vld [vmem:[#allocation48_spill] sm:$0xff] }
 0x1c6   :  { %11157 = vst [vmem:[#allocation30_spill] sm:$0xff] %v8106_v53  ;;  %v1831_v10 = vadd.f32 %v1708_v46, %v1508_v60  ;;  %v1908_v28 = vmul.f32 %v6003_v17, %v318_v56  ;;  %v2021_v2 = vmul.f32 %v5999_v14, %v318_v56  ;;  %v2799_v55 = vadd.f32 %v2798_v48, %v2736_v43  ;;  %v313_v43 = vpop.permute.xlu0 %312 }
 0x1c7   :  { %v943_v13 = vsel %vm859_vm1, %v11159_v36, %v11158_v49  ;;  %v1389_v20 = vrot.slane %v1246_v25, 2  ;;  %v8122_v45 = vmul.f32 %v6001_v15, %v318_v56  ;;  %v2737_v36 = vmul.f32 %v8106_v53, %v8106_v53  ;;  %v11160_v49 = vld [vmem:[#allocation33_spill] sm:$0xff] }
 0x1c8   :  { %v1060_v27 = vadd.f32 %v943_v13, %v736_v38  ;;  %v2161_v16 = vrot.slane %v2021_v2, 2  ;;  %v1964_v46 = vadd.f32 %v1908_v28, %v1831_v10  ;;  %v731_v48 = vadd.f32 %v610_v59, %v11160_v49  ;;  %v11164_v28 = vld [vmem:[#allocation49_spill] sm:$0xff] }
 0x1c9   :  { %v2669_v38 = vadd.f32 %v2668_v35, %v8106_v53  ;;  %v1189_v25 = vadd.f32 %v1133_v12, %v1056_v41  ;;  %v11161_v13 = vrot.slane %v7667_v19, 2  ;;  %v1507_v2 = vadd.f32 %v1383_v11, %v7767_v61  ;;  %v8186_v53 = vpop.permute.xlu2 %1087 }
 0x1ca   :  { %v2800_v56 = vadd.f32 %v2799_v55, %v2737_v36  ;;  %v8134_v5 = vadd.f32 %v7806_v62, %v1060_v27  ;;  %v11163_v47 = vrot.slane %v11162_v4, 2  ;;  %v11165_v59 = vrot.slane %v11164_v28, 4  ;;  %11177 = vst [vmem:[#allocation48_spill] sm:$0xff] %v8186_v53 }
 0x1cb   :  { %v2164_v60 = vsel %vm535_vm0, %v2161_v16, %v11161_v13  ;;  %v11166_v49 = vrot.slane %v8090_v40, 4  ;;  %v2484_v19 = vrot.slane %v8122_v45, 4  ;;  %v11167_v12 = vrot.slane %v8000_v33, 4 }
 0x1cc   :  { %v1392_v10 = vsel %vm535_vm0, %v1389_v20, %v11163_v47  ;;  %v11168_v61 = vrot.slane %v11108_v32, 4  ;;  %v11169_v62 = vmov %v11156_v39  ;;  %v11170_v35 = vrot.slane %v11115_v34, 4 }
 0x1cd   :  { %v1715_v41 = vsel %vm859_vm1, %v11166_v49, %v11165_v59  ;;  %v468_v55 = vmul.f32 %v5936_v42, %v313_v43  ;;  %v2287_v27 = vadd.f32 %v2164_v60, %v1964_v46  ;;  %v1132_v13 = vmul.f32 %v5989_v6, %v313_v43 }
 0x1ce   :  { %v934_v11 = vsel %vm859_vm1, %v11168_v61, %v11167_v12  ;;  %v1706_v47 = vsel %vm859_vm1, %v11170_v35, %v11169_v62  ;;  %v1245_v45 = vmul.f32 %v5956_v51, %v313_v43  ;;  %v1907_v32 = vmul.f32 %v6003_v17, %v313_v43 }
 0x1cf   :  { %v1055_v36 = vadd.f32 %v934_v11, %v731_v48  ;;  %v1830_v59 = vadd.f32 %v1706_v47, %v1507_v2  ;;  %v614_v33 = vrot.slane %v468_v55, 2  ;;  %v2020_v49 = vmul.f32 %v5999_v14, %v313_v43 }
 0x1d0   :  { %v1512_v12 = vadd.f32 %v1392_v10, %v1189_v25  ;;  %v1962_v34 = vadd.f32 %v11171_v63, %v7885_v18  ;;  %v8163_v61 = vmul.f32 %v5938_v44, %v313_v43  ;;  %v1387_v62 = vrot.slane %v1245_v45, 2  ;;  %v11175_v45 = vld [vmem:[#allocation58_spill] sm:$0xff] }
 0x1d1   :  { %v11172_v60 = vrot.slane %v7685_v1, 4  ;;  %v8169_v48 = vmul.f32 %v5958_v52, %v313_v43  ;;  %v2159_v2 = vrot.slane %v2020_v49, 2  ;;  %v2343_v11 = vmul.f32 %v6001_v15, %v313_v43 }
 0x1d2   :  { %v411_v25 = vmul.f32 %v5965_v57, %v313_v43  ;;  %v11174_v18 = vrot.slane %v8038_v24, 2  ;;  %v1188_v47 = vadd.f32 %v1132_v13, %v1055_v36  ;;  %v1390_v55 = vsel %vm535_vm0, %v1387_v62, %v1389_v20  ;;  %v11178_v13 = vld [vmem:[#allocation59_spill] sm:$0xff] }
 0x1d3   :  { %v2487_v46 = vsel %vm859_vm1, %v2484_v19, %v11172_v60  ;;  %v1963_v1 = vadd.f32 %v1907_v32, %v1830_v59  ;;  %v11176_v63 = vrot.slane %v11175_v45, 2  ;;  %v2482_v39 = vrot.slane %v2343_v11, 4 }
 0x1d4   :  { %v8172_v35 = vadd.f32 %v2487_v46, %v2287_v27  ;;  %v617_v10 = vsel %vm535_vm0, %v614_v33, %v11174_v18  ;;  %v8182_v49 = vadd.f32 %v1715_v41, %v1512_v12  ;;  %v938_v27 = vrot.slane %v8163_v61, 4  ;;  %v333_v18 = vpop.permute.xlu1 %332 }
 0x1d5   :  { %v2160_v60 = vsel %vm535_vm0, %v11176_v63, %v2159_v2  ;;  %v2162_v46 = vsel %vm535_vm0, %v2159_v2, %v2161_v16  ;;  %v2671_v24 = vadd.f32 %v8011_v29, %v2669_v38  ;;  %v735_v36 = vadd.f32 %v617_v10, %v411_v25  ;;  %v11183_v38 = vld [vmem:[#allocation41_spill] sm:$0xff] }
 0x1d6   :  { %11173 = vst [vmem:[#allocation33_spill] sm:$0xff] %v8172_v35  ;;  %v2285_v43 = vadd.f32 %v2160_v60, %v1962_v34  ;;  %v1710_v20 = vrot.slane %v8169_v48, 4  ;;  %v11179_v59 = vrot.slane %v11178_v13, 4  ;;  %v2741_v41 = vmul.f32 %v8172_v35, %v8172_v35  ;;  %v11181_v34 = vld [vmem:[#allocation13_spill] sm:$0xff] }
 0x1d7   :  { %v2802_v12 = vadd.f32 %v8023_v54, %v2800_v56  ;;  %v1511_v61 = vadd.f32 %v1390_v55, %v1188_v47  ;;  %v11182_v2 = vrot.slane %v11181_v34, 2  ;;  %v11184_v11 = vrot.slane %v11183_v38, 2 }
 0x1d8   :  { %v2483_v32 = vsel %vm859_vm1, %v11179_v59, %v2482_v39  ;;  %v2286_v25 = vadd.f32 %v2162_v46, %v1963_v1  ;;  %v8206_v10 = vmul.f32 %v6003_v17, %v8186_v53  ;;  %v8210_v45 = vmul.f32 %v5999_v14, %v8186_v53 }
 0x1d9   :  { %v8196_v16 = vadd.f32 %v2483_v32, %v2285_v43  ;;  %v615_v29 = vsel %vm535_vm0, %v11182_v2, %v614_v33  ;;  %v1388_v48 = vsel %vm535_vm0, %v11184_v11, %v1387_v62  ;;  %v8214_v54 = vmul.f32 %v6001_v15, %v8186_v53 }
 0x1da   :  { %v11185_v56 = vrot.slane %v8066_v8, 4  ;;  %v1136_v47 = vmul.f32 %v5989_v6, %v333_v18  ;;  %v1249_v1 = vmul.f32 %v5956_v51, %v333_v18  ;;  %v11186_v63 = vrot.slane %v8090_v40, 4 }
 0x1db   :  { %11180 = vst [vmem:[#allocation49_spill] sm:$0xff] %v8196_v16  ;;  %v2739_v62 = vmul.f32 %v8196_v16, %v8196_v16  ;;  %v2485_v46 = vsel %vm859_vm1, %v2482_v39, %v2484_v19  ;;  %v8228_v43 = vmul.f32 %v5965_v57, %v333_v18  ;;  %v8231_v8 = vmul.f32 %v5936_v42, %v333_v18  ;;  %v11188_v19 = vld [vmem:[#allocation55_spill] sm:$0xff] }
 0x1dc   :  { %v941_v33 = vsel %vm859_vm1, %v938_v27, %v11185_v56  ;;  %v1713_v60 = vsel %vm859_vm1, %v1710_v20, %v11186_v63  ;;  %v8233_v59 = vadd.f32 %v2485_v46, %v2286_v25  ;;  %v1394_v32 = vrot.slane %v1249_v1, 2  ;;  %v328_v46 = vpop.permute.xlu0 %327 }
 0x1dd   :  { %v1059_v55 = vadd.f32 %v941_v33, %v735_v36  ;;  %v1834_v13 = vadd.f32 %v1713_v60, %v1511_v61  ;;  %v1911_v36 = vmul.f32 %v6003_v17, %v333_v18  ;;  %v2024_v34 = vmul.f32 %v5999_v14, %v333_v18 }
 0x1de   :  { %11187 = vst [vmem:[#allocation57_spill] sm:$0xff] %v8233_v59  ;;  %v2672_v40 = vadd.f32 %v2671_v24, %v8196_v16  ;;  %v8240_v39 = vmul.f32 %v5958_v52, %v333_v18  ;;  %v734_v38 = vadd.f32 %v615_v29, %v11188_v19  ;;  %v2803_v11 = vadd.f32 %v2802_v12, %v2739_v62 }
 0x1df   :  { %v1192_v56 = vadd.f32 %v1136_v47, %v1059_v55  ;;  %v2166_v33 = vrot.slane %v2024_v34, 2  ;;  %v8244_v61 = vmul.f32 %v6001_v15, %v333_v18  ;;  %v11189_v63 = vrot.slane %v7809_v31, 2  ;;  %v11191_v47 = vld [vmem:[#allocation25_spill] sm:$0xff] }
 0x1e0   :  { %v1967_v60 = vadd.f32 %v1911_v36, %v1834_v13  ;;  %v2740_v2 = vmul.f32 %v8233_v59, %v8233_v59  ;;  %v11190_v12 = vrot.slane %v7821_v9, 2  ;;  %v11192_v62 = vrot.slane %v11191_v47, 4  ;;  %v11193_v47 = vld [vmem:[#allocation54_spill] sm:$0xff] }
 0x1e1   :  { %v1397_v24 = vsel %vm535_vm0, %v1394_v32, %v11189_v63  ;;  %v1510_v34 = vadd.f32 %v1388_v48, %v7879_v50  ;;  %v2673_v19 = vadd.f32 %v2672_v40, %v8233_v59  ;;  %v8262_v25 = vmul.f32 %v5938_v44, %v333_v18 }
 0x1e2   :  { %v2169_v29 = vsel %vm535_vm0, %v2166_v33, %v11190_v12  ;;  %v939_v55 = vsel %vm859_vm1, %v11192_v62, %v938_v27  ;;  %v1717_v13 = vrot.slane %v8240_v39, 4  ;;  %v2804_v63 = vadd.f32 %v2803_v11, %v2740_v2 }
 0x1e3   :  { %v1058_v36 = vadd.f32 %v939_v55, %v734_v38  ;;  %v1515_v1 = vadd.f32 %v1397_v24, %v1192_v56  ;;  %v2489_v16 = vrot.slane %v8244_v61, 4  ;;  %v471_v12 = vmul.f32 %v5936_v42, %v328_v46 }
 0x1e4   :  { %v2290_v53 = vadd.f32 %v2169_v29, %v1967_v60  ;;  %v11194_v0 = vrot.slane %v11193_v47, 4  ;;  %v1135_v50 = vmul.f32 %v5989_v6, %v328_v46  ;;  %v1248_v48 = vmul.f32 %v5956_v51, %v328_v46 }
 0x1e5   :  { %v1571_v40 = vmul.f32 %v5958_v52, %v328_v46  ;;  %v1910_v39 = vmul.f32 %v6003_v17, %v328_v46  ;;  %v2023_v2 = vmul.f32 %v5999_v14, %v328_v46  ;;  %v2674_v38 = vadd.f32 %v2673_v19, %v8172_v35  ;;  %v11208_v35 = vld [vmem:[#allocation19_spill] sm:$0xff] }
 0x1e6   :  { %v1711_v27 = vsel %vm859_vm1, %v11194_v0, %v1710_v20  ;;  %v620_v11 = vrot.slane %v471_v12, 2  ;;  %v1191_v56 = vadd.f32 %v1135_v50, %v1058_v36  ;;  %v1393_v61 = vrot.slane %v1248_v48, 2  ;;  %v11196_v20 = vld [vmem:[#allocation61_spill] sm:$0xff]  ;;  %v1862_v12 = vpop.permute.xlu2 %1861  ;;  %v8292_v48 = vpop.permute.xlu1 %347 }
 0x1e7   :  { %v1833_v18 = vadd.f32 %v1711_v27, %v1510_v34  ;;  %v2805_v24 = vadd.f32 %v2804_v63, %v2741_v41  ;;  %v11195_v60 = vrot.slane %v7815_v58, 4  ;;  %v11197_v29 = vrot.slane %v11196_v20, 4 }
 0x1e8   :  { %v2165_v55 = vrot.slane %v2023_v2, 2  ;;  %v8285_v47 = vmul.f32 %v5938_v44, %v328_v46  ;;  %v1395_v19 = vsel %vm535_vm0, %v1393_v61, %v1394_v32  ;;  %v2346_v36 = vmul.f32 %v6001_v15, %v328_v46 }
 0x1e9   :  { %v1720_v0 = vsel %vm859_vm1, %v1717_v13, %v11195_v60  ;;  %v2492_v62 = vsel %vm859_vm1, %v2489_v16, %v11197_v29  ;;  %v1716_v27 = vrot.slane %v1571_v40, 4  ;;  %v1966_v50 = vadd.f32 %v1910_v39, %v1833_v18 }
 0x1ea   :  { %v8282_v34 = vadd.f32 %v2492_v62, %v2290_v53  ;;  %v8290_v63 = vadd.f32 %v1720_v0, %v1515_v1  ;;  %v2676_v2 = vadd.f32 %v8029_v26, %v2674_v38  ;;  %v11198_v53 = vrot.slane %v8231_v8, 2 }
 0x1eb   :  { %v1514_v29 = vadd.f32 %v1395_v19, %v1191_v56  ;;  %v2167_v32 = vsel %vm535_vm0, %v2165_v55, %v2166_v33  ;;  %v8300_v61 = vadd.f32 %v8041_v22, %v2805_v24  ;;  %v414_v62 = vmul.f32 %v5965_v57, %v328_v46  ;;  %v343_v56 = vpop.permute.xlu0 %342 }
 0x1ec   :  { %v622_v60 = vsel %vm535_vm0, %v620_v11, %v11198_v53  ;;  %v8304_v1 = vmul.f32 %v5999_v14, %v1862_v12  ;;  %v8307_v18 = vmul.f32 %v6001_v15, %v1862_v12  ;;  %v8311_v26 = vmul.f32 %v8282_v34, %v8282_v34  ;;  %v11206_v53 = vld [vmem:[#allocation8_spill] sm:$0xff] }
 0x1ed   :  { %v2488_v39 = vrot.slane %v2346_v36, 4  ;;  %v8316_v33 = vmul.f32 %v5956_v51, %v8292_v48  ;;  %v8318_v22 = vadd.f32 %v622_v60, %v414_v62  ;;  %v2289_v46 = vadd.f32 %v2167_v32, %v1966_v50 }
 0x1ee   :  { %11199 = vst [vmem:[#allocation58_spill] sm:$0xff] %v8304_v1  ;;  %v8322_v38 = vmul.f32 %v5958_v52, %v8292_v48  ;;  %v1718_v11 = vsel %vm859_vm1, %v1716_v27, %v1717_v13  ;;  %v1914_v0 = vmul.f32 %v6003_v17, %v8292_v48  ;;  %v2027_v55 = vmul.f32 %v5999_v14, %v8292_v48 }
 0x1ef   :  { %11200 = vst [vmem:[#allocation59_spill] sm:$0xff] %v8307_v18  ;;  %v1837_v24 = vadd.f32 %v1718_v11, %v1514_v29  ;;  %v11202_v19 = vrot.slane %v11162_v4, 2  ;;  %v8333_v50 = vmul.f32 %v6003_v17, %v1862_v12  ;;  %v8339_v13 = vmul.f32 %v5989_v6, %v8292_v48  ;;  %v8359_v12 = vpop.permute.xlu1 %362 }
 0x1f0   :  { %11201 = vst [vmem:[#allocation13_spill] sm:$0xff] %v8311_v26  ;;  %v2490_v27 = vsel %vm859_vm1, %v2488_v39, %v2489_v16  ;;  %v8344_v32 = vmul.f32 %v5936_v42, %v343_v56  ;;  %v2350_v62 = vmul.f32 %v6001_v15, %v8292_v48  ;;  %v1251_v11 = vmul.f32 %v5956_v51, %v343_v56 }
 0x1f1   :  { %v1513_v36 = vadd.f32 %v11202_v19, %v8007_v23  ;;  %11203 = vst [vmem:[#allocation41_spill] sm:$0xff] %v8333_v50  ;;  %v1138_v23 = vmul.f32 %v5989_v6, %v343_v56  ;;  %v8347_v4 = vadd.f32 %v2490_v27, %v2289_v46  ;;  %v1970_v19 = vadd.f32 %v1914_v0, %v1837_v24 }
 0x1f2   :  { %v2172_v60 = vrot.slane %v2027_v55, 2  ;;  %v11205_v16 = vrot.slane %v11164_v28, 4  ;;  %v1398_v40 = vrot.slane %v1251_v11, 2  ;;  %v1574_v41 = vmul.f32 %v5958_v52, %v343_v56  ;;  %11207 = vst [vmem:[#allocation25_spill] sm:$0xff] %v8359_v12 }
 0x1f3   :  { %11204 = vst [vmem:[#allocation55_spill] sm:$0xff] %v8347_v4  ;;  %v1194_v29 = vadd.f32 %v1138_v23, %v11206_v53  ;;  %v1913_v46 = vmul.f32 %v6003_v17, %v343_v56  ;;  %v2026_v27 = vmul.f32 %v5999_v14, %v343_v56  ;;  %v1968_v59 = vadd.f32 %v11208_v35, %v8182_v49 }
 0x1f4   :  { %v1836_v39 = vadd.f32 %v11205_v16, %v1513_v36  ;;  %v417_v24 = vmul.f32 %v5965_v57, %v343_v56  ;;  %v625_v0 = vrot.slane %v8344_v32, 2  ;;  %v2349_v28 = vmul.f32 %v6001_v15, %v343_v56 }
 0x1f5   :  { %v8367_v55 = vadd.f32 %v2676_v2, %v8347_v4  ;;  %v1517_v36 = vadd.f32 %v1398_v40, %v1194_v29  ;;  %v1721_v53 = vrot.slane %v1574_v41, 4  ;;  %v798_v11 = vmul.f32 %v5938_v44, %v343_v56 }
 0x1f6   :  { %v1969_v23 = vadd.f32 %v1913_v46, %v1836_v39  ;;  %v11209_v16 = vrot.slane %v7809_v31, 2  ;;  %v2170_v50 = vrot.slane %v2026_v27, 2  ;;  %v1917_v35 = vmul.f32 %v6003_v17, %v8359_v12  ;;  %v8385_v46 = vpop.permute.xlu0 %357 }
 0x1f7   :  { %v11210_v49 = vrot.slane %v7941_v21, 2  ;;  %v1840_v26 = vadd.f32 %v1721_v53, %v1517_v36  ;;  %v2493_v2 = vrot.slane %v2349_v28, 4  ;;  %v2030_v41 = vmul.f32 %v5999_v14, %v8359_v12 }
 0x1f8   :  { %v1399_v18 = vsel %vm535_vm0, %v11209_v16, %v1398_v40  ;;  %v2743_v56 = vmul.f32 %v8347_v4, %v8347_v4  ;;  %v741_v29 = vadd.f32 %v625_v0, %v417_v24  ;;  %v11211_v31 = vrot.slane %v7821_v9, 2 }
 0x1f9   :  { %v2174_v32 = vsel %vm535_vm0, %v2172_v60, %v11210_v49  ;;  %v2292_v39 = vadd.f32 %v2170_v50, %v1969_v23  ;;  %v1973_v16 = vadd.f32 %v1917_v35, %v1840_v26  ;;  %v2177_v1 = vrot.slane %v2030_v41, 2 }
 0x1fa   :  { %v2171_v40 = vsel %vm535_vm0, %v11211_v31, %v2170_v50  ;;  %v1516_v60 = vadd.f32 %v1399_v18, %v8134_v5  ;;  %v2293_v28 = vadd.f32 %v2174_v32, %v1970_v19  ;;  %v2495_v36 = vrot.slane %v2350_v62, 4 }
 0x1fb   :  { %v2291_v27 = vadd.f32 %v2171_v40, %v1968_v59  ;;  %v949_v49 = vrot.slane %v798_v11, 4  ;;  %v2353_v7 = vmul.f32 %v6001_v15, %v8359_v12  ;;  %v11212_v24 = vrot.slane %v11196_v20, 4 }
 0x1fc   :  { %v8393_v4 = vadd.f32 %v2493_v2, %v2292_v39  ;;  %v1142_v50 = vmul.f32 %v5989_v6, %v8359_v12  ;;  %v2029_v59 = vmul.f32 %v5999_v14, %v8385_v46  ;;  %v2296_v18 = vadd.f32 %v2177_v1, %v1973_v16 }
 0x1fd   :  { %v2494_v9 = vsel %vm859_vm1, %v11212_v24, %v2493_v2  ;;  %v1065_v26 = vadd.f32 %v949_v49, %v741_v29  ;;  %v11214_v62 = vrot.slane %v7815_v58, 4  ;;  %v1916_v20 = vmul.f32 %v6003_v17, %v8385_v46  ;;  %v11216_v2 = vld [vmem:[#allocation52_spill] sm:$0xff] }
 0x1fe   :  { %11213 = vst [vmem:[#allocation54_spill] sm:$0xff] %v8393_v4  ;;  %v8399_v5 = vadd.f32 %v2494_v9, %v2291_v27  ;;  %v2352_v11 = vmul.f32 %v6001_v15, %v8385_v46  ;;  %v8410_v35 = vmul.f32 %v5936_v42, %v8359_v12  ;;  %v8413_v32 = vadd.f32 %v8300_v61, %v2743_v56  ;;  %v11218_v27 = vld [vmem:[#allocation20_spill] sm:$0xff] }
 0x1ff   :  { %v1722_v19 = vsel %vm859_vm1, %v11214_v62, %v1721_v53  ;;  %v11217_v41 = vrot.slane %v11216_v2, 4  ;;  %v2500_v29 = vrot.slane %v2353_v7, 4  ;;  %v2175_v53 = vrot.slane %v2029_v59, 2 }
 0x200   :  { %v1839_v23 = vadd.f32 %v1722_v19, %v1516_v60  ;;  %11215 = vst [vmem:[#allocation61_spill] sm:$0xff] %v8410_v35  ;;  %v8422_v40 = vsel %vm859_vm1, %v8393_v4, 0.0  ;;  %v1198_v39 = vadd.f32 %v1142_v50, %v1065_v26  ;;  %v1971_v16 = vadd.f32 %v11218_v27, %v8290_v63 }
 0x201   :  { %v2497_v58 = vsel %vm859_vm1, %v2495_v36, %v11217_v41  ;;  %v8428_v61 = vmul.f32 %v8399_v5, %v8399_v5  ;;  %v2746_v56 = vmul.f32 %v8393_v4, %v8393_v4  ;;  %v8432_v60 = vadd.f32 %v2500_v29, %v2296_v18  ;;  %v11221_v18 = vld [vmem:[#allocation22_spill] sm:$0xff] }
 0x202   :  { %v8418_v31 = vadd.f32 %v2497_v58, %v2293_v28  ;;  %v1255_v7 = vmul.f32 %v5956_v51, %v8359_v12  ;;  %v1972_v28 = vadd.f32 %v1916_v20, %v1839_v23  ;;  %v2498_v36 = vrot.slane %v2352_v11, 4  ;;  %v11223_v20 = vld [vmem:[#allocation43_spill] sm:$0xff] }
 0x203   :  { %v8439_v9 = vmul.f32 %v5938_v44, %v8359_v12  ;;  %v11220_v63 = vrot.slane %v7941_v21, 2  ;;  %v2178_v59 = vsel %vm535_vm0, %v2175_v53, %v2177_v1  ;;  %v8447_v26 = vmul.f32 %v5936_v42, %v8385_v46 }
 0x204   :  { %v11222_v62 = vrot.slane %v11221_v18, 2  ;;  %v1578_v23 = vmul.f32 %v5958_v52, %v8359_v12  ;;  %v8457_v21 = vmul.f32 %v5938_v44, %v8385_v46  ;;  %v1141_v1 = vmul.f32 %v5989_v6, %v8385_v46 }
 0x205   :  { %11219 = vst [vmem:[#allocation8_spill] sm:$0xff] %v8439_v9  ;;  %v2176_v50 = vsel %vm535_vm0, %v11220_v63, %v2175_v53  ;;  %v1405_v41 = vrot.slane %v1255_v7, 2  ;;  %v11224_v53 = vld [vmem:[#allocation46_spill] sm:$0xff]  ;;  %v1577_v4 = vmul.f32 %v5958_v52, %v8385_v46  ;;  %v8474_v7 = vadd.f32 %v2178_v59, %v1972_v28 }
 0x206   :  { %v626_v19 = vsel %vm535_vm0, %v11222_v62, %v625_v0  ;;  %v11225_v27 = vrot.slane %v11224_v53, 4  ;;  %v1254_v0 = vmul.f32 %v5956_v51, %v8385_v46  ;;  %v8468_v62 = vsel %vm859_vm1, %v2746_v56, 0.0 }
 0x207   :  { %v740_v11 = vadd.f32 %v626_v19, %v11223_v20  ;;  %11226 = vst [vmem:[#allocation19_spill] sm:$0xff] %v8468_v62  ;;  %v2294_v19 = vadd.f32 %v2176_v50, %v1971_v16  ;;  %v8470_v20 = vpop.permute.xlu1 %1082  ;;  %v11227_v58 = vrot.slane %v11216_v2, 4  ;;  %v1728_v62 = vrot.slane %v1578_v23, 4 }
 0x208   :  { %v950_v63 = vsel %vm859_vm1, %v11225_v27, %v949_v49  ;;  %v8480_v49 = vsel %vm859_vm1, %v2498_v36, %v2500_v29  ;;  %v1403_v27 = vrot.slane %v1254_v0, 2  ;;  %v2033_v59 = vmul.f32 %v5999_v14, %v8470_v20 }
 0x209   :  { %v1064_v24 = vadd.f32 %v950_v63, %v740_v11  ;;  %v2499_v12 = vsel %vm859_vm1, %v11227_v58, %v2498_v36  ;;  %v11228_v11 = vrot.slane %v8410_v35, 2  ;;  %v11229_v63 = vrot.slane %v8447_v26, 2  ;;  %v1078_v35 = vpop.permute.xlu0 %1077 }
 0x20a   :  { %v1406_v2 = vsel %vm535_vm0, %v1403_v27, %v1405_v41  ;;  %v11230_v29 = vrot.slane %v11221_v18, 2  ;;  %v11231_v36 = vrot.slane %v8231_v8, 2  ;;  %v8497_v58 = vadd.f32 %v2499_v12, %v2294_v19 }
 0x20b   :  { %v1197_v50 = vadd.f32 %v1141_v1, %v1064_v24  ;;  %v633_v28 = vsel %vm535_vm0, %v11229_v63, %v11228_v11  ;;  %v420_v24 = vmul.f32 %v5965_v57, %v8385_v46  ;;  %v8503_v1 = vmul.f32 %v5956_v51, %v8470_v20 }
 0x20c   :  { %v624_v23 = vsel %vm535_vm0, %v11231_v36, %v11230_v29  ;;  %11232 = vst [vmem:[#allocation52_spill] sm:$0xff] %v8497_v58  ;;  %v1726_v0 = vrot.slane %v1577_v4, 4  ;;  %v1145_v11 = vmul.f32 %v5989_v6, %v8470_v20  ;;  %v11233_v8 = vrot.slane %v8262_v25, 4 }
 0x20d   :  { %v1520_v63 = vadd.f32 %v1406_v2, %v1197_v50  ;;  %v739_v18 = vadd.f32 %v624_v23, %v8228_v43  ;;  %v11234_v29 = vrot.slane %v8285_v47, 4  ;;  %v744_v19 = vadd.f32 %v633_v28, %v420_v24 }
 0x20e   :  { %v1521_v36 = vadd.f32 %v1405_v41, %v1198_v39  ;;  %v11235_v46 = vrot.slane %v11224_v53, 4  ;;  %v11236_v16 = vmov %v11233_v8  ;;  %v11237_v50 = vrot.slane %v8439_v9, 4  ;;  %v11239_v53 = vld [vmem:[#allocation35_spill] sm:$0xff] }
 0x20f   :  { %v946_v12 = vsel %vm859_vm1, %v11234_v29, %v11233_v8  ;;  %v11238_v43 = vrot.slane %v8457_v21, 4  ;;  %v1920_v47 = vmul.f32 %v6003_v17, %v8470_v20  ;;  %v2182_v28 = vrot.slane %v2033_v59, 2 }
 0x210   :  { %v948_v4 = vsel %vm859_vm1, %v11236_v16, %v11235_v46  ;;  %v1062_v56 = vadd.f32 %v946_v12, %v8318_v22  ;;  %v1729_v25 = vsel %vm859_vm1, %v1726_v0, %v1728_v62  ;;  %v1253_v16 = vmul.f32 %v5956_v51, %v11239_v53 }
 0x211   :  { %v957_v2 = vsel %vm859_vm1, %v11238_v43, %v11237_v50  ;;  %v1063_v39 = vadd.f32 %v948_v4, %v739_v18  ;;  %v1576_v22 = vmul.f32 %v5958_v52, %v11239_v53  ;;  %v1843_v23 = vadd.f32 %v1729_v25, %v1520_v63 }
 0x212   :  { %v1140_v24 = vmul.f32 %v5989_v6, %v11239_v53  ;;  %v1195_v8 = vadd.f32 %v8339_v13, %v1062_v56  ;;  %v2032_v29 = vmul.f32 %v5999_v14, %v1078_v35  ;;  %v1068_v59 = vadd.f32 %v957_v2, %v744_v19 }
 0x213   :  { %v1844_v18 = vadd.f32 %v1728_v62, %v1521_v36  ;;  %v2356_v12 = vmul.f32 %v6001_v15, %v8470_v20  ;;  %v1401_v46 = vrot.slane %v1253_v16, 2  ;;  %v11240_v4 = vrot.slane %v8210_v45, 2 }
 0x214   :  { %v1196_v43 = vadd.f32 %v1140_v24, %v1063_v39  ;;  %v8542_v63 = vmul.f32 %v5956_v51, %v1078_v35  ;;  %v476_v25 = vmul.f32 %v5936_v42, %v11239_v53  ;;  %v11241_v13 = vrot.slane %v8316_v33, 2 }
 0x215   :  { %v2185_v50 = vsel %vm535_vm0, %v2182_v28, %v11240_v4  ;;  %v1404_v62 = vsel %vm535_vm0, %v1401_v46, %v1403_v27  ;;  %v1724_v19 = vrot.slane %v1576_v22, 4  ;;  %v2180_v36 = vrot.slane %v2032_v29, 2 }
 0x216   :  { %v1402_v56 = vsel %vm535_vm0, %v11241_v13, %v1401_v46  ;;  %v1976_v2 = vadd.f32 %v1920_v47, %v1843_v23  ;;  %v1519_v41 = vadd.f32 %v1404_v62, %v1196_v43  ;;  %v1919_v4 = vmul.f32 %v6003_v17, %v1078_v35 }
 0x217   :  { %v1518_v16 = vadd.f32 %v1402_v56, %v1195_v8  ;;  %v11242_v39 = vrot.slane %v8322_v38, 4  ;;  %v1727_v9 = vsel %vm859_vm1, %v1724_v19, %v1726_v0  ;;  %v628_v51 = vrot.slane %v476_v25, 2 }
 0x218   :  { %v800_v33 = vmul.f32 %v5938_v44, %v11239_v53  ;;  %v1842_v58 = vadd.f32 %v1727_v9, %v1519_v41  ;;  %v2355_v27 = vmul.f32 %v6001_v15, %v1078_v35  ;;  %v419_v47 = vmul.f32 %v5965_v57, %v11239_v53 }
 0x219   :  { %v1725_v24 = vsel %vm859_vm1, %v11242_v39, %v1724_v19  ;;  %v1408_v22 = vrot.slane %v8542_v63, 2  ;;  %v11243_v23 = vrot.slane %v8075_v3, 2  ;;  %v11244_v0 = vrot.slane %v8447_v26, 2  ;;  %v1857_v3 = vpop.permute.xlu1 %1856 }
 0x21a   :  { %v1841_v13 = vadd.f32 %v1725_v24, %v1518_v16  ;;  %v952_v8 = vrot.slane %v800_v33, 4  ;;  %v1975_v46 = vadd.f32 %v1919_v4, %v1842_v58  ;;  %v2183_v43 = vsel %vm535_vm0, %v2180_v36, %v2182_v28 }
 0x21b   :  { %v2181_v38 = vsel %vm535_vm0, %v11243_v23, %v2180_v36  ;;  %v631_v29 = vsel %vm535_vm0, %v628_v51, %v11244_v0  ;;  %v1144_v41 = vmul.f32 %v5989_v6, %v1078_v35  ;;  %v8572_v53 = vmul.f32 %v5958_v52, %v8470_v20 }
 0x21c   :  { %v743_v9 = vadd.f32 %v631_v29, %v419_v47  ;;  %v1974_v25 = vadd.f32 %v8071_v37, %v1841_v13  ;;  %v11245_v63 = vrot.slane %v8457_v21, 4  ;;  %v1580_v26 = vmul.f32 %v5958_v52, %v1078_v35 }
 0x21d   :  { %v1977_v58 = vadd.f32 %v8206_v10, %v1844_v18  ;;  %v2505_v62 = vrot.slane %v2356_v12, 4  ;;  %v2503_v28 = vrot.slane %v2355_v27, 4  ;;  %v8579_v36 = vadd.f32 %v1145_v11, %v1068_v59 }
 0x21e   :  { %v955_v56 = vsel %vm859_vm1, %v952_v8, %v11245_v63  ;;  %v2297_v16 = vadd.f32 %v2181_v38, %v1974_v25  ;;  %v11246_v37 = vrot.slane %v8503_v1, 2  ;;  %v475_v4 = vmul.f32 %v5936_v42, %v8292_v48 }
 0x21f   :  { %v1067_v19 = vadd.f32 %v955_v56, %v743_v9  ;;  %v2299_v21 = vadd.f32 %v2185_v50, %v1976_v2  ;;  %v2298_v39 = vadd.f32 %v2183_v43, %v1975_v46  ;;  %v8587_v35 = vmul.f32 %v5999_v14, %v1857_v3  ;;  %v1852_v46 = vpop.permute.xlu0 %1851 }
 0x220   :  { %v1411_v20 = vsel %vm535_vm0, %v1408_v22, %v11246_v37  ;;  %v1733_v10 = vrot.slane %v8572_v53, 4  ;;  %v1731_v18 = vrot.slane %v1580_v26, 4  ;;  %v627_v12 = vrot.slane %v475_v4, 2 }
 0x221   :  { %v1200_v24 = vadd.f32 %v1144_v41, %v1067_v19  ;;  %v799_v11 = vmul.f32 %v5938_v44, %v8292_v48  ;;  %v11247_v59 = vrot.slane %v8078_v30, 4  ;;  %v8596_v42 = vmul.f32 %v6001_v15, %v1857_v3 }
 0x222   :  { %v418_v50 = vmul.f32 %v5965_v57, %v8292_v48  ;;  %v2506_v2 = vsel %vm859_vm1, %v2503_v28, %v2505_v62  ;;  %v629_v47 = vsel %vm535_vm0, %v627_v12, %v628_v51  ;;  %v11248_v44 = vrot.slane %v8214_v54, 4 }
 0x223   :  { %v2504_v33 = vsel %vm859_vm1, %v11247_v59, %v2503_v28  ;;  %v1523_v13 = vadd.f32 %v1411_v20, %v1200_v24  ;;  %v951_v23 = vrot.slane %v799_v11, 4  ;;  %v8607_v38 = vadd.f32 %v2506_v2, %v2298_v39  ;;  %v11255_v24 = vld [vmem:[#allocation53_spill] sm:$0xff] }
 0x224   :  { %v8601_v27 = vadd.f32 %v2504_v33, %v2297_v16  ;;  %v2508_v30 = vsel %vm859_vm1, %v2505_v62, %v11248_v44  ;;  %v2187_v0 = vrot.slane %v8587_v35, 2  ;;  %v742_v29 = vadd.f32 %v629_v47, %v418_v50  ;;  %v11249_v62 = vld [vmem:[#allocation44_spill] sm:$0xff]  ;;  %v11257_v11 = vld [vmem:[#allocation13_spill] sm:$0xff] }
 0x225   :  { %v8610_v43 = vadd.f32 %v2508_v30, %v2299_v21  ;;  %v1734_v48 = vsel %vm859_vm1, %v1731_v18, %v1733_v10  ;;  %v953_v9 = vsel %vm859_vm1, %v951_v23, %v952_v8  ;;  %v2678_v51 = vadd.f32 %v8367_v55, %v8282_v34  ;;  %v11254_v21 = vld [vmem:[#allocation40_spill] sm:$0xff]  ;;  %v11259_v30 = vld [vmem:[#allocation25_spill] sm:$0xff] }
 0x226   :  { %v1846_v41 = vadd.f32 %v1734_v48, %v1523_v13  ;;  %v1923_v25 = vmul.f32 %v6003_v17, %v1857_v3  ;;  %v2510_v63 = vrot.slane %v8596_v42, 4  ;;  %v1066_v56 = vadd.f32 %v953_v9, %v742_v29  ;;  %v11252_v3 = vld [vmem:[#allocation58_spill] sm:$0xff]  ;;  %v11260_v48 = vld [vmem:[#allocation52_spill] sm:$0xff] }
 0x227   :  { %v8622_v26 = vmul.f32 %v8601_v27, %v8601_v27  ;;  %v11250_v28 = vrot.slane %v11249_v62, 2  ;;  %v11251_v16 = vrot.slane %v8210_v45, 2  ;;  %v2679_v37 = vadd.f32 %v2678_v51, %v8399_v5  ;;  %v11261_v51 = vld [vmem:[#allocation19_spill] sm:$0xff]  ;;  %v11262_v62 = vld [vmem:[#allocation61_spill] sm:$0xff] }
 0x228   :  { %v8632_v55 = vmul.f32 %v8607_v38, %v8607_v38  ;;  %v11253_v20 = vrot.slane %v11252_v3, 2  ;;  %v1199_v39 = vadd.f32 %v11254_v21, %v1066_v56  ;;  %v11256_v35 = vrot.slane %v11255_v24, 4 }
 0x229   :  { %v1409_v19 = vsel %vm535_vm0, %v11250_v28, %v1408_v22  ;;  %v2300_v8 = vadd.f32 %v11251_v16, %v1977_v58  ;;  %v8643_v45 = vadd.f32 %v8480_v49, %v8474_v7  ;;  %v2681_v22 = vadd.f32 %v8422_v40, %v2679_v37  ;;  %v11264_v16 = vld [vmem:[#allocation48_spill] sm:$0xff]  ;;  %v1867_v37 = vpop.permute.xlu0 %1866 }
 0x22a   :  { %v2190_v4 = vsel %vm535_vm0, %v2187_v0, %v11253_v20  ;;  %v1732_v12 = vsel %vm859_vm1, %v11256_v35, %v1731_v18  ;;  %v2685_v58 = vsel %vm859_vm1, %v8432_v60, 0.0  ;;  %v2809_v59 = vadd.f32 %v8413_v32, %v11257_v11  ;;  %v11266_v35 = vld [vmem:[#allocation8_spill] sm:$0xff] }
 0x22b   :  { %v1979_v33 = vadd.f32 %v1923_v25, %v1846_v41  ;;  %v1522_v13 = vadd.f32 %v1409_v19, %v1199_v39  ;;  %v2750_v50 = vmul.f32 %v8432_v60, %v8432_v60  ;;  %v2035_v2 = vmul.f32 %v5999_v14, %v1852_v46 }
 0x22c   :  { %v11258_v18 = vmov %v11248_v44  ;;  %v2682_v7 = vadd.f32 %v2681_v22, %v8418_v31  ;;  %v2810_v40 = vadd.f32 %v2809_v59, %v8428_v61  ;;  %v1922_v49 = vmul.f32 %v6003_v17, %v1852_v46 }
 0x22d   :  { %v8655_v47 = vadd.f32 %v11258_v18, %v2300_v8  ;;  %v1845_v23 = vadd.f32 %v1732_v12, %v1522_v13  ;;  %v2747_v32 = vmul.f32 %v8418_v31, %v8418_v31  ;;  %v2186_v44 = vrot.slane %v2035_v2, 2  ;;  %v11265_v8 = vld [vmem:[#allocation2_spill] sm:$0xff] }
 0x22e   :  { %v421_v29 = vmul.f32 %v5965_v57, %v11259_v30  ;;  %v2683_v9 = vadd.f32 %v2682_v7, %v11260_v48  ;;  %v2748_v54 = vmul.f32 %v11260_v48, %v11260_v48  ;;  %v2812_v41 = vadd.f32 %v11261_v51, %v2810_v40 }
 0x22f   :  { %v2358_v25 = vmul.f32 %v6001_v15, %v1852_v46  ;;  %v2749_v61 = vmul.f32 %v8643_v45, %v8643_v45  ;;  %v2816_v56 = vsel %vm859_vm1, %v2750_v50, 0.0  ;;  %v11263_v28 = vrot.slane %v11262_v62, 2 }
 0x230   :  { %v1259_v57 = vmul.f32 %v11265_v8, %v11264_v16  ;;  %v2684_v20 = vadd.f32 %v2683_v9, %v8643_v45  ;;  %v2813_v21 = vadd.f32 %v2812_v41, %v2747_v32  ;;  %v1978_v39 = vadd.f32 %v1922_v49, %v1845_v23 }
 0x231   :  { %v745_v19 = vadd.f32 %v11263_v28, %v421_v29  ;;  %v1582_v24 = vmul.f32 %v5958_v52, %v11264_v16  ;;  %v2188_v46 = vsel %vm535_vm0, %v2186_v44, %v2187_v0  ;;  %v11267_v12 = vrot.slane %v11266_v35, 4 }
 0x232   :  { %v1146_v11 = vmul.f32 %v5989_v6, %v11264_v16  ;;  %v1412_v59 = vrot.slane %v1259_v57, 2  ;;  %v2686_v13 = vadd.f32 %v2685_v58, %v2684_v20  ;;  %v2814_v50 = vadd.f32 %v2813_v21, %v2748_v54 }
 0x233   :  { %v1069_v22 = vadd.f32 %v11267_v12, %v745_v19  ;;  %v2509_v2 = vrot.slane %v2358_v25, 4  ;;  %v2038_v18 = vmul.f32 %v5999_v14, %v1867_v37  ;;  %v11268_v40 = vrot.slane %v8503_v1, 2 }
 0x234   :  { %v1735_v52 = vrot.slane %v1582_v24, 4  ;;  %v2361_v0 = vmul.f32 %v6001_v15, %v1867_v37  ;;  %v2687_v23 = vadd.f32 %v2686_v13, %v8601_v27  ;;  %v2815_v32 = vadd.f32 %v2814_v50, %v2749_v61 }
 0x235   :  { %v1202_v7 = vadd.f32 %v1146_v11, %v1069_v22  ;;  %v1413_v49 = vsel %vm535_vm0, %v11268_v40, %v1412_v59  ;;  %v2301_v44 = vadd.f32 %v2188_v46, %v1978_v39  ;;  %v1925_v14 = vmul.f32 %v6003_v17, %v1867_v37 }
 0x236   :  { %v1524_v6 = vadd.f32 %v1413_v49, %v8579_v36  ;;  %v1736_v58 = vsel %vm859_vm1, %v1733_v10, %v1735_v52  ;;  %v2191_v29 = vrot.slane %v2038_v18, 2  ;;  %v2302_v1 = vadd.f32 %v2190_v4, %v1979_v33  ;;  %v11270_v4 = vld [vmem:[#allocation41_spill] sm:$0xff] }
 0x237   :  { %v1525_v30 = vadd.f32 %v1412_v59, %v1202_v7  ;;  %v2688_v9 = vadd.f32 %v2687_v23, %v8607_v38  ;;  %v2817_v54 = vadd.f32 %v2816_v56, %v2815_v32  ;;  %v2511_v15 = vsel %vm859_vm1, %v2509_v2, %v2510_v63  ;;  %v11271_v56 = vld [vmem:[#allocation59_spill] sm:$0xff] }
 0x238   :  { %v1847_v51 = vadd.f32 %v1736_v58, %v1524_v6  ;;  %v11269_v36 = vrot.slane %v11252_v3, 2  ;;  %v2514_v53 = vrot.slane %v2361_v0, 4  ;;  %v8704_v61 = vadd.f32 %v2511_v15, %v2301_v44 }
 0x239   :  { %v1848_v41 = vadd.f32 %v1735_v52, %v1525_v30  ;;  %v2689_v10 = vadd.f32 %v2688_v9, %v8610_v43  ;;  %v2818_v17 = vadd.f32 %v2817_v54, %v8622_v26  ;;  %v11272_v62 = vrot.slane %v11271_v56, 4 }
 0x23a   :  { %v2192_v25 = vsel %vm535_vm0, %v11269_v36, %v2191_v29  ;;  %v1980_v33 = vadd.f32 %v11270_v4, %v1847_v51  ;;  %v2690_v3 = vsel %vm859_vm1, %v8655_v47, 0.0  ;;  %v2754_v19 = vmul.f32 %v8655_v47, %v8655_v47 }
 0x23b   :  { %v2513_v28 = vsel %vm859_vm1, %v2510_v63, %v11272_v62  ;;  %v1981_v16 = vadd.f32 %v1925_v14, %v1848_v41  ;;  %v2691_v8 = vadd.f32 %v2690_v3, %v2689_v10  ;;  %v2753_v26 = vmul.f32 %v8610_v43, %v8610_v43  ;;  %v20_v3 = vld [vmem:[%s10549_s3] sm:$0xf] }
 0x23c   :  { %v2819_v57 = vadd.f32 %v2818_v17, %v8632_v55  ;;  %v2303_v37 = vadd.f32 %v2192_v25, %v1980_v33  ;;  %v8719_v20 = vadd.f32 %v2513_v28, %v2302_v1  ;;  %v11273_v42 = vmov %v11272_v62 }
 0x23d   :  { %v2304_v21 = vadd.f32 %v2191_v29, %v1981_v16  ;;  %v2515_v63 = vsel %vm859_vm1, %v11273_v42, %v2514_v53  ;;  %v2692_v24 = vadd.f32 %v2691_v8, %v8704_v61  ;;  %v2755_v46 = vmul.f32 %v8704_v61, %v8704_v61 }
 0x23e   :  { %v2820_v39 = vadd.f32 %v2819_v57, %v2753_v26  ;;  %v2626_v35 = vadd.f32 %v2515_v63, %v2303_v37  ;;  %v2821_v12 = vsel %vm859_vm1, %v2754_v19, 0.0  ;;  %v2756_v59 = vmul.f32 %v8719_v20, %v8719_v20 }
 0x23f   :  { %v2627_v22 = vadd.f32 %v2514_v53, %v2304_v21  ;;  %v2693_v55 = vadd.f32 %v2692_v24, %v8719_v20 }
 0x240   :  { %v2822_v11 = vadd.f32 %v2821_v12, %v2820_v39  ;;  %v2757_v2 = vmul.f32 %v2626_v35, %v2626_v35 }
 0x241   :  { %v2694_v50 = vadd.f32 %v2693_v55, %v2626_v35  ;;  %v2695_v18 = vsel %vm859_vm1, %v2627_v22, 0.0  ;;  %v2758_v7 = vmul.f32 %v2627_v22, %v2627_v22 }
 0x242   :  { %v2823_v13 = vadd.f32 %v2822_v11, %v2755_v46 }
 0x243   :  { %v2696_v49 = vadd.f32 %v2695_v18, %v2694_v50  ;;  %v2826_v23 = vsel %vm859_vm1, %v2758_v7, 0.0 }
 0x244   :  { %v2824_v40 = vadd.f32 %v2823_v13, %v2756_v59 }
 0x245   :  { %v2697_v52 = vrot.slane %v2696_v49, 4 }
 0x246   :  { %v2825_v0 = vadd.f32 %v2824_v40, %v2757_v2 }
 0x247   :  { %v2698_v32 = vadd.f32 %v2697_v52, %v2696_v49 }
 0x248   :  { %v2827_v44 = vadd.f32 %v2826_v23, %v2825_v0 }
 0x249   :  { %v2699_v6 = vrot.slane %v2698_v32, 2 }
 0x24a   :  { %v2828_v30 = vrot.slane %v2827_v44, 4 }
 0x24b   :  { %v2700_v58 = vadd.f32 %v2699_v6, %v2698_v32 }
 0x24c   :  { %v2829_v14 = vadd.f32 %v2828_v30, %v2827_v44 }
 0x24d   :  { %v2701_v29 = vrot.slane %v2700_v58, 1 }
 0x24e   :  { %v2830_v1 = vrot.slane %v2829_v14, 2 }
 0x24f   :  { %v2702_v9 = vadd.f32 %v2701_v29, %v2700_v58 }
 0x250   :  { %v2831_v54 = vadd.f32 %v2830_v1, %v2829_v14 }
 0x251   :  { %v2834_v15 = vmul.f32 0.0025510204, %v2702_v9 }
 0x252   :  { %v2832_v51 = vrot.slane %v2831_v54, 1 }
 0x253   :  { %v2836_v36 = vmul.f32 %v2834_v15, %v2834_v15 }
 0x254   :  { %v2833_v41 = vadd.f32 %v2832_v51, %v2831_v54 }
 0x256   :  { %v2835_v25 = vmul.f32 0.0025510204, %v2833_v41 }
 0x258   :  { %v2837_v53 = vsub.f32 %v2835_v25, %v2836_v36 }
 0x25a   :  { %v2838_v10 = vmax.f32 %v2837_v53, 0.0 }
 0x25c   :  { %v2839_v17 = vadd.f32 1e-05, %v2838_v10 }
 0x25e   :  { %5785 = vrsqrt.f32 %v2839_v17  ;;  %vm2846_vm3 = vweird.f32 %v2839_v17 }
 0x264   :  { %v5786_v4 = vpop.eup %5785 }
 0x265   :  { %v2841_v33 = vmul.f32 %v5786_v4, %v2839_v17  ;;  %vm2847_vm2 = vweird.f32 %v5786_v4 }
 0x266   :  { %vm2848_vm4 = vmor %vm2846_vm3, %vm2847_vm2 }
 0x267   :  { %v2842_v56 = vmul.f32 %v5786_v4, %v2841_v33 }
 0x269   :  { %v2843_v62 = vmul.f32 0.5, %v2842_v56  ;;  %v11279_v56 = vld [vmem:[#allocation32_spill] sm:$0xff] }
 0x26b   :  { %v2844_v28 = vsub.f32 1.5, %v2843_v62 }
 0x26d   :  { %v2845_v19 = vmul.f32 %v5786_v4, %v2844_v28 }
 0x26f   :  { %v2849_v16 = vsel %vm2848_vm4, %v5786_v4, %v2845_v19  ;;  %v11278_v4 = vld [vmem:[#allocation31_spill] sm:$0xff] }
 0x270   :  { %v2850_v8 = vmul.f32 %v2849_v16, %v20_v3  ;;  %v11281_v16 = vld [vmem:[#allocation21_spill] sm:$0xff] }
 0x272   :  { %v2851_v26 = vmul.f32 %v2850_v8, %v2834_v15  ;;  %v8736_v57 = vperm.slane %v2850_v8, 0 }
 0x274   :  { %v2853_v37 = vrot.slane %v2851_v26, 7  ;;  %v2911_v21 = vmul.f32 %v8736_v57, %v2626_v35  ;;  %v2912_v42 = vmul.f32 %v8736_v57, %v2627_v22  ;;  %v2907_v39 = vmul.f32 %v8736_v57, %v8610_v43  ;;  %v11282_v26 = vld [vmem:[#allocation15_spill] sm:$0xff] }
 0x275   :  { %v2908_v24 = vmul.f32 %v8736_v57, %v8655_v47  ;;  %v8772_v33 = vmul.f32 %v8736_v57, %v11278_v4  ;;  %v8776_v62 = vmul.f32 %v8736_v57, %v11279_v56  ;;  %v2860_v8 = vmul.f32 %v8736_v57, %v11281_v16 }
 0x276   :  { %v2855_v63 = vsub.f32 %v20_v3, %v2853_v37  ;;  %v11280_v3 = vld [vmem:[#allocation27_spill] sm:$0xff]  ;;  %v8788_v37 = vmul.f32 %v8736_v57, %v11282_v26  ;;  %v11303_v26 = vld [vmem:[#allocation38_spill] sm:$0xff] }
 0x277   :  { %v8782_v19 = vmul.f32 %v8736_v57, %v11280_v3  ;;  %v11302_v3 = vld [vmem:[#allocation10_spill] sm:$0xff] }
 0x278   :  { %v8744_v46 = vperm.slane %v2855_v63, 1  ;;  %v11284_v63 = vld [vmem:[#allocation39_spill] sm:$0xff]  ;;  %v2887_v16 = vmul.f32 %v8736_v57, %v11302_v3 }
 0x27a   :  { %v2964_v12 = vadd.f32 %v8744_v46, %v2907_v39  ;;  %v2965_v11 = vadd.f32 %v8744_v46, %v2908_v24  ;;  %v2968_v55 = vadd.f32 %v8744_v46, %v2911_v21  ;;  %v2969_v59 = vadd.f32 %v8744_v46, %v2912_v42  ;;  %v11283_v21 = vld [vmem:[#allocation5_spill] sm:$0xff]  ;;  %v11285_v24 = vld [vmem:[#allocation6_spill] sm:$0xff] }
 0x27b   :  { %v8792_v42 = vmul.f32 %v8736_v57, %v11283_v21  ;;  %v8796_v39 = vmul.f32 %v8736_v57, %v11284_v63  ;;  %v8855_v56 = vadd.f32 %v8744_v46, %v2860_v8  ;;  %v2888_v21 = vmul.f32 %v8736_v57, %v11303_v26  ;;  %v11304_v63 = vld [vmem:[#allocation62_spill] sm:$0xff]  ;;  %v11307_v8 = vld [vmem:[#allocation49_spill] sm:$0xff] }
 0x27c   :  { %v3020_v35 = vmax.f32 %v2964_v12, 0.0  ;;  %v3021_v13 = vmax.f32 %v2965_v11, 0.0  ;;  %v3024_v22 = vmax.f32 %v2968_v55, 0.0  ;;  %v3025_v50 = vmax.f32 %v2969_v59, 0.0  ;;  %v11286_v11 = vld [vmem:[#allocation12_spill] sm:$0xff]  ;;  %v11287_v59 = vld [vmem:[#allocation47_spill] sm:$0xff] }
 0x27d   :  { %v2864_v12 = vmul.f32 %v8736_v57, %v11285_v24  ;;  %v8802_v55 = vmul.f32 %v8736_v57, %v11286_v11  ;;  %v2890_v24 = vmul.f32 %v8736_v57, %v11304_v63  ;;  %v11312_v26 = vld [vmem:[#allocation54_spill] sm:$0xff] }
 0x27e   :  { %v3208_v2 = vrot.slane %v3020_v35, 2  ;;  %v3209_v43 = vrot.slane %v3020_v35, 4  ;;  %v3210_v18 = vrot.slane %v3020_v35, 6  ;;  %v3211_v7 = vrot.slane %v3021_v13, 2 }
 0x27f   :  { %v3219_v47 = vrot.slane %v3024_v22, 4  ;;  %v3218_v40 = vrot.slane %v3024_v22, 2  ;;  %v3685_v49 = vsel %vm3362_vm5, %v3020_v35, -inf  ;;  %v3220_v23 = vrot.slane %v3024_v22, 6 }
 0x280   :  { %v3686_v52 = vsel %vm3362_vm5, %v3208_v2, -inf  ;;  %v3692_v0 = vsel %vm3362_vm5, %v3209_v43, -inf  ;;  %v3221_v32 = vrot.slane %v3025_v50, 2  ;;  %v3693_v6 = vsel %vm3362_vm5, %v3210_v18, -inf  ;;  %v11290_v43 = vld [vmem:[#allocation34_spill] sm:$0xff] }
 0x281   :  { %v3687_v44 = vmax.f32 %v3685_v49, %v3686_v52  ;;  %v3688_v30 = vsel %vm3362_vm5, %v3024_v22, -inf  ;;  %v3694_v58 = vmax.f32 %v3692_v0, %v3693_v6  ;;  %v3699_v14 = vsel %vm3362_vm5, %v3021_v13, -inf  ;;  %v11288_v13 = vld [vmem:[#allocation26_spill] sm:$0xff] }
 0x282   :  { %v3700_v29 = vsel %vm3362_vm5, %v3211_v7, -inf  ;;  %v3695_v9 = vsel %vm3362_vm5, %v3219_v47, -inf  ;;  %v3690_v51 = vsel %vm3362_vm5, %v3218_v40, -inf  ;;  %v3702_v41 = vsel %vm3362_vm5, %v3025_v50, -inf  ;;  %v11289_v50 = vld [vmem:[#allocation7_spill] sm:$0xff]  ;;  %v11291_v7 = vld [vmem:[#allocation17_spill] sm:$0xff] }
 0x283   :  { %v3689_v1 = vmax.f32 %v3687_v44, %v3688_v30  ;;  %v3701_v54 = vmax.f32 %v3699_v14, %v3700_v29  ;;  %v3696_v15 = vmax.f32 %v3694_v58, %v3695_v9  ;;  %v3697_v25 = vsel %vm3362_vm5, %v3220_v23, -inf  ;;  %v11292_v40 = vld [vmem:[#allocation29_spill] sm:$0xff]  ;;  %v11293_v52 = vld [vmem:[#allocation42_spill] sm:$0xff]  ;;  %v11294_v23 = vld [vmem:[#allocation11_spill] sm:$0xff] }
 0x284   :  { %v8768_v17 = vsel %vm3362_vm5, %v3221_v32, -inf  ;;  %v8806_v35 = vmul.f32 %v8736_v57, %v11287_v59  ;;  %v8810_v22 = vmul.f32 %v8736_v57, %v11288_v13  ;;  %v2868_v2 = vmul.f32 %v8736_v57, %v11289_v50  ;;  %v11295_v44 = vld [vmem:[#allocation24_spill] sm:$0xff]  ;;  %v11297_v14 = vld [vmem:[#allocation51_spill] sm:$0xff]  ;;  %v11305_v59 = vld [vmem:[#allocation30_spill] sm:$0xff] }
 0x285   :  { %v8760_v36 = vmax.f32 %v3689_v1, %v3690_v51  ;;  %v8763_v53 = vmax.f32 %v3701_v54, %v3702_v41  ;;  %v8765_v10 = vmax.f32 %v3696_v15, %v3697_v25  ;;  %11277 = vst [vmem:[#allocation46_spill] sm:$0xff] %v8768_v17  ;;  %v8816_v18 = vmul.f32 %v8736_v57, %v11290_v43  ;;  %v11296_v30 = vld [vmem:[#allocation36_spill] sm:$0xff]  ;;  %v11298_v1 = vld [vmem:[#allocation37_spill] sm:$0xff]  ;;  %v11301_v25 = vld [vmem:[#allocation23_spill] sm:$0xff] }
 0x286   :  { %v8820_v47 = vmul.f32 %v8736_v57, %v11291_v7  ;;  %v8824_v49 = vmul.f32 %v8736_v57, %v11292_v40  ;;  %v2872_v0 = vmul.f32 %v8736_v57, %v11293_v52  ;;  %v8830_v32 = vmul.f32 %v8736_v57, %v11294_v23  ;;  %v11299_v54 = vld [vmem:[#allocation56_spill] sm:$0xff]  ;;  %v11300_v15 = vld [vmem:[#allocation9_spill] sm:$0xff]  ;;  %v11306_v50 = vld [vmem:[#allocation50_spill] sm:$0xff] }
 0x287   :  { %11274 = vst [vmem:[#allocation20_spill] sm:$0xff] %v8760_v36  ;;  %v8834_v6 = vmul.f32 %v8736_v57, %v11295_v44  ;;  %v8838_v58 = vmul.f32 %v8736_v57, %v11296_v30  ;;  %v2876_v29 = vmul.f32 %v8736_v57, %v11297_v14  ;;  %v8844_v9 = vmul.f32 %v8736_v57, %v11298_v1  ;;  %v11308_v52 = vld [vmem:[#allocation57_spill] sm:$0xff] }
 0x288   :  { %11275 = vst [vmem:[#allocation22_spill] sm:$0xff] %v8763_v53  ;;  %v8848_v51 = vmul.f32 %v8736_v57, %v11299_v54  ;;  %v2880_v41 = vmul.f32 %v8736_v57, %v11300_v15  ;;  %v2884_v4 = vmul.f32 %v8736_v57, %v11301_v25  ;;  %v8864_v11 = vadd.f32 %v8744_v46, %v2864_v12  ;;  %v11309_v44 = vld [vmem:[#allocation33_spill] sm:$0xff]  ;;  %v11310_v12 = vld [vmem:[#allocation18_spill] sm:$0xff]  ;;  %v11311_v54 = vld [vmem:[#allocation55_spill] sm:$0xff] }
 0x289   :  { %11276 = vst [vmem:[#allocation43_spill] sm:$0xff] %v8765_v10  ;;  %v2891_v13 = vmul.f32 %v8736_v57, %v11305_v59  ;;  %v2892_v43 = vmul.f32 %v8736_v57, %v11306_v50  ;;  %v2893_v7 = vmul.f32 %v8736_v57, %v11307_v8  ;;  %v8873_v40 = vadd.f32 %v8744_v46, %v2868_v2 }
 0x28a   :  { %v2894_v23 = vmul.f32 %v8736_v57, %v11308_v52  ;;  %v2895_v30 = vmul.f32 %v8736_v57, %v11309_v44  ;;  %v2896_v14 = vmul.f32 %v8736_v57, %v11310_v12  ;;  %v8882_v1 = vadd.f32 %v8744_v46, %v2872_v0 }
 0x28b   :  { %v2897_v15 = vmul.f32 %v8736_v57, %v11311_v54  ;;  %v2898_v25 = vmul.f32 %v8736_v57, %v8282_v34  ;;  %v2899_v2 = vmul.f32 %v8736_v57, %v8399_v5  ;;  %v8891_v3 = vadd.f32 %v8744_v46, %v2876_v29 }
 0x28c   :  { %v2900_v63 = vmul.f32 %v8736_v57, %v11312_v26  ;;  %v2901_v59 = vmul.f32 %v8736_v57, %v8418_v31  ;;  %v2902_v0 = vmul.f32 %v8736_v57, %v11260_v48  ;;  %v8900_v50 = vadd.f32 %v8744_v46, %v2880_v41  ;;  %v11318_v26 = vld [vmem:[#allocation16_spill] sm:$0xff] }
 0x28d   :  { %v2903_v34 = vmul.f32 %v8736_v57, %v8643_v45  ;;  %v2904_v5 = vmul.f32 %v8736_v57, %v8432_v60  ;;  %v2905_v29 = vmul.f32 %v8736_v57, %v8601_v27  ;;  %v8909_v8 = vadd.f32 %v8744_v46, %v2884_v4 }
 0x28e   :  { %v2906_v31 = vmul.f32 %v8736_v57, %v8607_v38  ;;  %v2909_v48 = vmul.f32 %v8736_v57, %v8704_v61  ;;  %v8916_v41 = vadd.f32 %v8744_v46, %v2887_v16  ;;  %v8919_v45 = vadd.f32 %v8744_v46, %v2888_v21 }
 0x28f   :  { %v2910_v60 = vmul.f32 %v8736_v57, %v8719_v20  ;;  %v8924_v27 = vadd.f32 %v8744_v46, %v2890_v24  ;;  %v8927_v4 = vadd.f32 %v8744_v46, %v2891_v13  ;;  %v8930_v38 = vadd.f32 %v8744_v46, %v2892_v43 }
 0x290   :  { %11313 = vst [vmem:[#allocation35_spill] sm:$0xff] %v8919_v45  ;;  %v8933_v61 = vadd.f32 %v8744_v46, %v2893_v7  ;;  %v8936_v16 = vadd.f32 %v8744_v46, %v2894_v23  ;;  %v8939_v21 = vadd.f32 %v8744_v46, %v2895_v30  ;;  %v8942_v20 = vadd.f32 %v8744_v46, %v2896_v14 }
 0x291   :  { %11314 = vst [vmem:[#allocation44_spill] sm:$0xff] %v8930_v38  ;;  %v8945_v24 = vadd.f32 %v8744_v46, %v2897_v15  ;;  %v8948_v13 = vadd.f32 %v8744_v46, %v2898_v25  ;;  %v8951_v43 = vadd.f32 %v8744_v46, %v2899_v2  ;;  %v8954_v7 = vadd.f32 %v8744_v46, %v2900_v63  ;;  %v11317_v25 = vld [vmem:[#allocation28_spill] sm:$0xff] }
 0x292   :  { %11315 = vst [vmem:[#allocation58_spill] sm:$0xff] %v8942_v20  ;;  %v8957_v52 = vadd.f32 %v8744_v46, %v2901_v59  ;;  %v8960_v23 = vadd.f32 %v8744_v46, %v2902_v0  ;;  %v8963_v44 = vadd.f32 %v8744_v46, %v2903_v34  ;;  %v8966_v30 = vadd.f32 %v8744_v46, %v2904_v5  ;;  %v11319_v59 = vld [vmem:[#allocation60_spill] sm:$0xff] }
 0x293   :  { %11316 = vst [vmem:[#allocation40_spill] sm:$0xff] %v8954_v7  ;;  %v8969_v12 = vadd.f32 %v8744_v46, %v2905_v29  ;;  %v8972_v14 = vadd.f32 %v8744_v46, %v2906_v31  ;;  %v8975_v54 = vadd.f32 %v8744_v46, %v2909_v48  ;;  %v8978_v15 = vadd.f32 %v8744_v46, %v2910_v60  ;;  %v11320_v34 = vld [vmem:[#allocation4_spill] sm:$0xff]  ;;  %v11321_v29 = vld [vmem:[#allocation45_spill] sm:$0xff]  ;;  %v11322_v48 = vld [vmem:[#allocation3_spill] sm:$0xff] }
 0x294   :  { %v2879_v2 = vmul.f32 %v8736_v57, %v11317_v25  ;;  %v2881_v63 = vmul.f32 %v8736_v57, %v11318_v26  ;;  %v2882_v0 = vmul.f32 %v8736_v57, %v11319_v59  ;;  %v2883_v5 = vmul.f32 %v8736_v57, %v11320_v34  ;;  %v11323_v60 = vld [vmem:[#allocation14_spill] sm:$0xff] }
 0x295   :  { %v2885_v31 = vmul.f32 %v8736_v57, %v11321_v29  ;;  %v2886_v28 = vmul.f32 %v8736_v57, %v11322_v48  ;;  %v2889_v17 = vmul.f32 %v8736_v57, %v11323_v60  ;;  %v2914_v25 = vadd.f32 %v8744_v46, %v8772_v33 }
 0x296   :  { %v2915_v26 = vadd.f32 %v8744_v46, %v8776_v62  ;;  %v2916_v59 = vadd.f32 %v8744_v46, %v8782_v19  ;;  %v2918_v34 = vadd.f32 %v8744_v46, %v8788_v37  ;;  %v2919_v29 = vadd.f32 %v8744_v46, %v8792_v42 }
 0x297   :  { %v2920_v48 = vadd.f32 %v8744_v46, %v8796_v39  ;;  %v2922_v57 = vadd.f32 %v8744_v46, %v8802_v55  ;;  %v2923_v33 = vadd.f32 %v8744_v46, %v8806_v35  ;;  %v2924_v62 = vadd.f32 %v8744_v46, %v8810_v22 }
 0x298   :  { %v2926_v19 = vadd.f32 %v8744_v46, %v8816_v18  ;;  %v2927_v37 = vadd.f32 %v8744_v46, %v8820_v47  ;;  %v2928_v42 = vadd.f32 %v8744_v46, %v8824_v49  ;;  %v2930_v39 = vadd.f32 %v8744_v46, %v8830_v32 }
 0x299   :  { %v2931_v55 = vadd.f32 %v8744_v46, %v8834_v6  ;;  %v2932_v35 = vadd.f32 %v8744_v46, %v8838_v58  ;;  %v2934_v22 = vadd.f32 %v8744_v46, %v8844_v9  ;;  %v2935_v18 = vadd.f32 %v8744_v46, %v8848_v51 }
 0x29a   :  { %v2936_v47 = vadd.f32 %v8744_v46, %v2879_v2  ;;  %v2938_v60 = vadd.f32 %v8744_v46, %v2881_v63  ;;  %v2939_v49 = vadd.f32 %v8744_v46, %v2882_v0  ;;  %v2940_v32 = vadd.f32 %v8744_v46, %v2883_v5 }
 0x29b   :  { %v2942_v53 = vadd.f32 %v8744_v46, %v2885_v31  ;;  %v2943_v6 = vadd.f32 %v8744_v46, %v2886_v28  ;;  %v2946_v58 = vadd.f32 %v8744_v46, %v2889_v17  ;;  %v9035_v10 = vmax.f32 %v2914_v25, 0.0 }
 0x29c   :  { %v9037_v9 = vmax.f32 %v2915_v26, 0.0  ;;  %v9039_v36 = vmax.f32 %v2916_v59, 0.0  ;;  %v10729_v51 = vmax.f32 %v8855_v56, 0.0  ;;  %v9042_v2 = vmax.f32 %v2918_v34, 0.0 }
 0x29d   :  { %v9044_v63 = vmax.f32 %v2919_v29, 0.0  ;;  %v9046_v0 = vmax.f32 %v2920_v48, 0.0  ;;  %v9049_v31 = vmax.f32 %v2922_v57, 0.0  ;;  %v9051_v28 = vmax.f32 %v2923_v33, 0.0 }
 0x29e   :  { %v9053_v46 = vmax.f32 %v2924_v62, 0.0  ;;  %v9056_v25 = vmax.f32 %v2926_v19, 0.0  ;;  %v9058_v26 = vmax.f32 %v2927_v37, 0.0  ;;  %v9060_v59 = vmax.f32 %v2928_v42, 0.0 }
 0x29f   :  { %v9063_v29 = vmax.f32 %v2930_v39, 0.0  ;;  %v9065_v48 = vmax.f32 %v2931_v55, 0.0  ;;  %v9067_v57 = vmax.f32 %v2932_v35, 0.0  ;;  %v9070_v62 = vmax.f32 %v2934_v22, 0.0 }
 0x2a0   :  { %11324 = vst [vmem:[#allocation53_spill] sm:$0xff] %v9060_v59  ;;  %v9072_v5 = vmax.f32 %v2935_v18, 0.0  ;;  %v9074_v19 = vmax.f32 %v2936_v47, 0.0  ;;  %v9077_v42 = vmax.f32 %v2938_v60, 0.0  ;;  %v9079_v17 = vmax.f32 %v2939_v49, 0.0 }
 0x2a1   :  { %v9081_v39 = vmax.f32 %v2940_v32, 0.0  ;;  %v9084_v35 = vmax.f32 %v2942_v53, 0.0  ;;  %v9086_v34 = vmax.f32 %v2943_v6, 0.0  ;;  %v9089_v22 = vmax.f32 %v8916_v41, 0.0 }
 0x2a2   :  { %11325 = vst [vmem:[#allocation13_spill] sm:$0xff] %v9074_v19  ;;  %v9092_v47 = vmax.f32 %v2946_v58, 0.0  ;;  %v9095_v60 = vmax.f32 %v8924_v27, 0.0  ;;  %v9098_v49 = vmax.f32 %v8927_v4, 0.0  ;;  %v9102_v53 = vmax.f32 %v8933_v61, 0.0 }
 0x2a3   :  { %11326 = vst [vmem:[#allocation25_spill] sm:$0xff] %v9081_v39  ;;  %v9105_v6 = vmax.f32 %v8936_v16, 0.0  ;;  %v9108_v41 = vmax.f32 %v8939_v21, 0.0  ;;  %v9112_v18 = vmax.f32 %v8945_v24, 0.0  ;;  %v9115_v27 = vmax.f32 %v8948_v13, 0.0 }
 0x2a4   :  { %v9118_v4 = vmax.f32 %v8951_v43, 0.0  ;;  %v9122_v32 = vmax.f32 %v8957_v52, 0.0  ;;  %v9125_v16 = vmax.f32 %v8960_v23, 0.0  ;;  %v9128_v21 = vmax.f32 %v8963_v44, 0.0 }
 0x2a5   :  { %11327 = vst [vmem:[#allocation52_spill] sm:$0xff] %v9112_v18  ;;  %v9132_v58 = vmax.f32 %v8969_v12, 0.0  ;;  %v9135_v13 = vmax.f32 %v8972_v14, 0.0  ;;  %v9138_v43 = vmax.f32 %v8975_v54, 0.0  ;;  %v9141_v52 = vmax.f32 %v8978_v15, 0.0 }
 0x2a6   :  { %11328 = vst [vmem:[#allocation19_spill] sm:$0xff] %v9115_v27  ;;  %v9154_v15 = vrot.slane %v10729_v51, 2  ;;  %v11331_v51 = vmax.f32 %v8864_v11, 0.0  ;;  %v11333_v61 = vmax.f32 %v8882_v1, 0.0  ;;  %v11336_v59 = vmax.f32 %v8900_v50, 0.0 }
 0x2a7   :  { %11329 = vst [vmem:[#allocation61_spill] sm:$0xff] %v9118_v4  ;;  %v11337_v23 = vmax.f32 %v8909_v8, 0.0  ;;  %v11338_v37 = vmax.f32 %v8919_v45, 0.0  ;;  %v3363_v12 = vsel %vm3362_vm5, %v9035_v10, -inf  ;;  %v11346_v55 = vrot.slane %v9035_v10, 2 }
 0x2a8   :  { %11330 = vst [vmem:[#allocation48_spill] sm:$0xff] %v9141_v52  ;;  %v9167_v33 = vrot.slane %v11331_v51, 2  ;;  %v11332_v51 = vmax.f32 %v8873_v40, 0.0  ;;  %v9191_v44 = vrot.slane %v11333_v61, 2  ;;  %v11335_v61 = vmax.f32 %v8891_v3, 0.0 }
 0x2a9   :  { %v9226_v19 = vrot.slane %v11337_v23, 2  ;;  %v9237_v39 = vrot.slane %v11338_v37, 2  ;;  %v11340_v37 = vmax.f32 %v8930_v38, 0.0  ;;  %v3364_v14 = vsel %vm3362_vm5, %v11346_v55, -inf }
 0x2aa   :  { %v9180_v52 = vrot.slane %v11332_v51, 2  ;;  %11334 = vst [vmem:[#allocation2_spill] sm:$0xff] %v9191_v44  ;;  %v9204_v44 = vrot.slane %v11335_v61, 2  ;;  %v9215_v51 = vrot.slane %v11336_v59, 2  ;;  %v3365_v54 = vmax.f32 %v3363_v12, %v3364_v14 }
 0x2ab   :  { %11339 = vst [vmem:[#allocation8_spill] sm:$0xff] %v9237_v39  ;;  %v9250_v39 = vrot.slane %v11340_v37, 2  ;;  %v11342_v37 = vmax.f32 %v8942_v20, 0.0  ;;  %v3366_v45 = vsel %vm3362_vm5, %v9042_v2, -inf  ;;  %v11347_v23 = vrot.slane %v9035_v10, 4 }
 0x2ac   :  { %v11349_v24 = vrot.slane %v9042_v2, 2  ;;  %v3377_v55 = vsel %vm3362_vm5, %v9037_v9, -inf  ;;  %v11350_v12 = vrot.slane %v9037_v9, 2  ;;  %v3367_v4 = vmax.f32 %v3365_v54, %v3366_v45 }
 0x2ad   :  { %11341 = vst [vmem:[#allocation41_spill] sm:$0xff] %v9250_v39  ;;  %v9263_v39 = vrot.slane %v11342_v37, 2  ;;  %v11344_v37 = vmax.f32 %v8954_v7, 0.0  ;;  %v3370_v59 = vsel %vm3362_vm5, %v11347_v23, -inf  ;;  %v11351_v27 = vrot.slane %v9042_v2, 4 }
 0x2ae   :  { %v3378_v14 = vsel %vm3362_vm5, %v11350_v12, -inf  ;;  %v11354_v12 = vrot.slane %v9037_v9, 6 }
 0x2af   :  { %11343 = vst [vmem:[#allocation59_spill] sm:$0xff] %v9263_v39  ;;  %v9276_v39 = vrot.slane %v11344_v37, 2  ;;  %v11348_v37 = vrot.slane %v9035_v10, 6  ;;  %v3373_v23 = vsel %vm3362_vm5, %v11351_v27, -inf  ;;  %v11352_v10 = vrot.slane %v9042_v2, 6 }
 0x2b0   :  { %v3379_v20 = vmax.f32 %v3377_v55, %v3378_v14  ;;  %v3385_v45 = vsel %vm3362_vm5, %v11354_v12, -inf  ;;  %v11355_v27 = vrot.slane %v9044_v63, 2  ;;  %v11359_v12 = vrot.slane %v9039_v36, 4 }
 0x2b1   :  { %11345 = vst [vmem:[#allocation31_spill] sm:$0xff] %v9276_v39  ;;  %v3371_v61 = vsel %vm3362_vm5, %v11348_v37, -inf  ;;  %v3368_v39 = vsel %vm3362_vm5, %v11349_v24, -inf  ;;  %v3375_v37 = vsel %vm3362_vm5, %v11352_v10, -inf  ;;  %v3380_v24 = vsel %vm3362_vm5, %v9044_v63, -inf }
 0x2b2   :  { %v3372_v7 = vmax.f32 %v3370_v59, %v3371_v61  ;;  %v11353_v61 = vrot.slane %v9037_v9, 4  ;;  %v3369_v54 = vmax.f32 %v3367_v4, %v3368_v39  ;;  %v3381_v38 = vmax.f32 %v3379_v20, %v3380_v24 }
 0x2b3   :  { %v3382_v2 = vsel %vm3362_vm5, %v11355_v27, -inf  ;;  %v11357_v9 = vrot.slane %v9039_v36, 2  ;;  %v11360_v27 = vrot.slane %v9039_v36, 6 }
 0x2b4   :  { %v3374_v18 = vmax.f32 %v3372_v7, %v3373_v23  ;;  %v3384_v59 = vsel %vm3362_vm5, %v11353_v61, -inf  ;;  %v11356_v7 = vrot.slane %v9044_v63, 4  ;;  %v3391_v23 = vsel %vm3362_vm5, %v9039_v36, -inf  ;;  %3731 = vst [vmem:[#allocation1] ss:$4 sm:$0xff] %v3369_v54 }
 0x2b5   :  { %v3386_v10 = vmax.f32 %v3384_v59, %v3385_v45  ;;  %v3392_v61 = vsel %vm3362_vm5, %v11357_v9, -inf  ;;  %v9328_v39 = vmax.f32 %v3381_v38, %v3382_v2  ;;  %v3394_v59 = vsel %vm3362_vm5, %v9046_v0, -inf }
 0x2b6   :  { %v9317_v55 = vmax.f32 %v3374_v18, %v3375_v37  ;;  %v3387_v14 = vsel %vm3362_vm5, %v11356_v7, -inf  ;;  %v3393_v24 = vmax.f32 %v3391_v23, %v3392_v61  ;;  %v11358_v18 = vrot.slane %v9044_v63, 6 }
 0x2b7   :  { %v3388_v4 = vmax.f32 %v3386_v10, %v3387_v14  ;;  %v3398_v45 = vsel %vm3362_vm5, %v11359_v12, -inf  ;;  %v3399_v7 = vsel %vm3362_vm5, %v11360_v27, -inf  ;;  %v11361_v63 = vrot.slane %v9046_v0, 2  ;;  %3735 = vst [vmem:[#allocation1 + $0x2] ss:$4 sm:$0xff] %v9328_v39 }
 0x2b8   :  { %v3389_v37 = vsel %vm3362_vm5, %v11358_v18, -inf  ;;  %3733 = vst [vmem:[#allocation1 + $0x1] ss:$4 sm:$0xff] %v9317_v55  ;;  %v3395_v54 = vmax.f32 %v3393_v24, %v3394_v59  ;;  %v3400_v10 = vmax.f32 %v3398_v45, %v3399_v7  ;;  %v11362_v14 = vrot.slane %v9046_v0, 4 }
 0x2b9   :  { %v9342_v38 = vmax.f32 %v3388_v4, %v3389_v37  ;;  %v3396_v2 = vsel %vm3362_vm5, %v11361_v63, -inf  ;;  %v11363_v36 = vmax.f32 %v8855_v56, 0.0  ;;  %v3406_v61 = vsel %vm3362_vm5, %v9154_v15, -inf }
 0x2ba   :  { %v3401_v23 = vsel %vm3362_vm5, %v11362_v14, -inf  ;;  %v3412_v4 = vsel %vm3362_vm5, %v9049_v31, -inf  ;;  %v9358_v24 = vmax.f32 %v3395_v54, %v3396_v2  ;;  %v11364_v59 = vrot.slane %v9049_v31, 2 }
 0x2bb   :  { %v3405_v9 = vsel %vm3362_vm5, %v11363_v36, -inf  ;;  %v3402_v18 = vmax.f32 %v3400_v10, %v3401_v23  ;;  %3737 = vst [vmem:[#allocation1 + $0x3] ss:$4 sm:$0xff] %v9342_v38  ;;  %v11365_v56 = vrot.slane %v9046_v0, 6  ;;  %v11366_v27 = vmax.f32 %v8864_v11, 0.0 }
 0x2bc   :  { %v3407_v37 = vmax.f32 %v3405_v9, %v3406_v61  ;;  %v3413_v12 = vsel %vm3362_vm5, %v11364_v59, -inf  ;;  %v11367_v54 = vrot.slane %v9049_v31, 4  ;;  %v3415_v14 = vsel %vm3362_vm5, %v9056_v25, -inf  ;;  %3739 = vst [vmem:[#allocation1 + $0x20] ss:$4 sm:$0xff] %v9358_v24 }
 0x2bd   :  { %v3403_v45 = vsel %vm3362_vm5, %v11365_v56, -inf  ;;  %v3408_v15 = vsel %vm3362_vm5, %v11366_v27, -inf  ;;  %v3414_v7 = vmax.f32 %v3412_v4, %v3413_v12  ;;  %v11368_v0 = vrot.slane %v9049_v31, 6 }
 0x2be   :  { %v3419_v63 = vsel %vm3362_vm5, %v11367_v54, -inf  ;;  %v9373_v2 = vmax.f32 %v3402_v18, %v3403_v45  ;;  %v9375_v10 = vmax.f32 %v3407_v37, %v3408_v15  ;;  %v9385_v11 = vsel %vm3362_vm5, %v9167_v33, -inf }
 0x2bf   :  { %v3420_v23 = vsel %vm3362_vm5, %v11368_v0, -inf  ;;  %v3416_v36 = vmax.f32 %v3414_v7, %v3415_v14  ;;  %v11369_v9 = vrot.slane %v9056_v25, 2  ;;  %v11370_v37 = vrot.slane %v9056_v25, 4  ;;  %v11386_v7 = vld [vmem:[#allocation53_spill] sm:$0xff] }
 0x2c0   :  { %v3421_v4 = vmax.f32 %v3419_v63, %v3420_v23  ;;  %v3426_v59 = vsel %vm3362_vm5, %v9051_v28, -inf  ;;  %v11371_v12 = vrot.slane %v9051_v28, 2  ;;  %v11373_v63 = vrot.slane %v9056_v25, 6 }
 0x2c1   :  { %v3417_v61 = vsel %vm3362_vm5, %v11369_v9, -inf  ;;  %v3422_v31 = vsel %vm3362_vm5, %v11370_v37, -inf  ;;  %v3429_v0 = vsel %vm3362_vm5, %v9058_v26, -inf  ;;  %v3443_v56 = vsel %vm3362_vm5, %v11386_v7, -inf }
 0x2c2   :  { %v3427_v33 = vsel %vm3362_vm5, %v11371_v12, -inf  ;;  %v9401_v45 = vmax.f32 %v3416_v36, %v3417_v61  ;;  %v3423_v27 = vmax.f32 %v3421_v4, %v3422_v31  ;;  %v3424_v14 = vsel %vm3362_vm5, %v11373_v63, -inf }
 0x2c3   :  { %v3428_v15 = vmax.f32 %v3426_v59, %v3427_v33  ;;  %v11374_v4 = vrot.slane %v9058_v26, 2  ;;  %v11375_v31 = vrot.slane %v9051_v28, 4  ;;  %v11376_v12 = vrot.slane %v9051_v28, 6 }
 0x2c4   :  { %11372 = vst [vmem:[#allocation32_spill] sm:$0xff] %v9401_v45  ;;  %v9412_v37 = vmax.f32 %v3423_v27, %v3424_v14 }
 0x2c5   :  { %v3430_v36 = vmax.f32 %v3428_v15, %v3429_v0  ;;  %3741 = vst [vmem:[#allocation1 + $0x21] ss:$4 sm:$0xff] %v9401_v45  ;;  %v3431_v25 = vsel %vm3362_vm5, %v11374_v4, -inf  ;;  %v3433_v59 = vsel %vm3362_vm5, %v11375_v31, -inf  ;;  %v3434_v33 = vsel %vm3362_vm5, %v11376_v12, -inf  ;;  %v11414_v45 = vld [vmem:[#allocation25_spill] sm:$0xff] }
 0x2c6   :  { %v11377_v15 = vmax.f32 %v8966_v30, 0.0  ;;  %v11378_v0 = vrot.slane %v9053_v46, 2  ;;  %3743 = vst [vmem:[#allocation1 + $0x22] ss:$4 sm:$0xff] %v9412_v37  ;;  %v3435_v27 = vmax.f32 %v3433_v59, %v3434_v33  ;;  %v11380_v59 = vmax.f32 %v8882_v1, 0.0 }
 0x2c7   :  { %v9430_v14 = vmax.f32 %v3430_v36, %v3431_v25  ;;  %v11379_v36 = vmax.f32 %v8873_v40, 0.0  ;;  %v3461_v40 = vsel %vm3362_vm5, %v9063_v29, -inf  ;;  %v11383_v31 = vrot.slane %v9058_v26, 4 }
 0x2c8   :  { %v9428_v63 = vrot.slane %v11377_v15, 2  ;;  %v3441_v4 = vsel %vm3362_vm5, %v11378_v0, -inf  ;;  %v3440_v15 = vsel %vm3362_vm5, %v9053_v46, -inf  ;;  %v3455_v0 = vsel %vm3362_vm5, %v9180_v52, -inf }
 0x2c9   :  { %v3454_v25 = vsel %vm3362_vm5, %v11379_v36, -inf  ;;  %3745 = vst [vmem:[#allocation1 + $0x23] ss:$4 sm:$0xff] %v9430_v14  ;;  %v3442_v12 = vmax.f32 %v3440_v15, %v3441_v4  ;;  %v3457_v33 = vsel %vm3362_vm5, %v11380_v59, -inf  ;;  %v11381_v36 = vrot.slane %v9063_v29, 2 }
 0x2ca   :  { %v3456_v61 = vmax.f32 %v3454_v25, %v3455_v0  ;;  %v11382_v52 = vrot.slane %v9063_v29, 4  ;;  %v3436_v4 = vsel %vm3362_vm5, %v11383_v31, -inf  ;;  %v11384_v1 = vrot.slane %v9063_v29, 6 }
 0x2cb   :  { %v3462_v18 = vsel %vm3362_vm5, %v11381_v36, -inf  ;;  %v3437_v23 = vmax.f32 %v3435_v27, %v3436_v4  ;;  %v11385_v36 = vld [vmem:[#allocation2_spill] sm:$0xff] }
 0x2cc   :  { %v3468_v9 = vsel %vm3362_vm5, %v11382_v52, -inf  ;;  %v3458_v15 = vmax.f32 %v3456_v61, %v3457_v33  ;;  %v3463_v25 = vmax.f32 %v3461_v40, %v3462_v18  ;;  %v3469_v0 = vsel %vm3362_vm5, %v11384_v1, -inf  ;;  %v11388_v61 = vld [vmem:[#allocation48_spill] sm:$0xff] }
 0x2cd   :  { %v3459_v54 = vsel %vm3362_vm5, %v11385_v36, -inf  ;;  %v3470_v18 = vmax.f32 %v3468_v9, %v3469_v0  ;;  %v3444_v33 = vmax.f32 %v3442_v12, %v3443_v56  ;;  %v3464_v40 = vsel %vm3362_vm5, %v9070_v62, -inf }
 0x2ce   :  { %v9474_v31 = vmax.f32 %v3458_v15, %v3459_v54  ;;  %v11389_v1 = vrot.slane %v9065_v48, 2  ;;  %v11390_v52 = vrot.slane %v9058_v26, 6  ;;  %v3465_v15 = vmax.f32 %v3463_v25, %v3464_v40 }
 0x2cf   :  { %v11391_v56 = vrot.slane %v11386_v7, 2  ;;  %v11392_v0 = vrot.slane %v9070_v62, 4  ;;  %v11393_v26 = vrot.slane %v9065_v48, 4 }
 0x2d0   :  { %11387 = vst [vmem:[#allocation27_spill] sm:$0xff] %v9474_v31  ;;  %v3476_v27 = vsel %vm3362_vm5, %v11389_v1, -inf  ;;  %v3438_v54 = vsel %vm3362_vm5, %v11390_v52, -inf  ;;  %v3475_v1 = vsel %vm3362_vm5, %v9065_v48, -inf }
 0x2d1   :  { %v9487_v9 = vmax.f32 %v3437_v23, %v3438_v54  ;;  %v3445_v12 = vsel %vm3362_vm5, %v11391_v56, -inf  ;;  %v3471_v29 = vsel %vm3362_vm5, %v11392_v0, -inf  ;;  %v3477_v36 = vmax.f32 %v3475_v1, %v3476_v27 }
 0x2d2   :  { %v3472_v4 = vmax.f32 %v3470_v18, %v3471_v29  ;;  %v3482_v52 = vsel %vm3362_vm5, %v11393_v26, -inf  ;;  %v11394_v23 = vrot.slane %v9065_v48, 6  ;;  %v9503_v40 = vmax.f32 %v3444_v33, %v3445_v12 }
 0x2d3   :  { %v11395_v54 = vrot.slane %v9070_v62, 2  ;;  %v11396_v0 = vrot.slane %v9070_v62, 6  ;;  %v3478_v18 = vsel %vm3362_vm5, %v9072_v5, -inf  ;;  %v11397_v27 = vrot.slane %v9072_v5, 2 }
 0x2d4   :  { %v3483_v25 = vsel %vm3362_vm5, %v11394_v23, -inf  ;;  %v11398_v33 = vrot.slane %v9072_v5, 4  ;;  %v11399_v1 = vrot.slane %v9067_v57, 2  ;;  %v11400_v23 = vrot.slane %v9072_v5, 6 }
 0x2d5   :  { %v3466_v56 = vsel %vm3362_vm5, %v11395_v54, -inf  ;;  %v3473_v59 = vsel %vm3362_vm5, %v11396_v0, -inf  ;;  %v3480_v48 = vsel %vm3362_vm5, %v11397_v27, -inf  ;;  %v3484_v62 = vmax.f32 %v3482_v52, %v3483_v25 }
 0x2d6   :  { %v9513_v29 = vmax.f32 %v3465_v15, %v3466_v56  ;;  %v3485_v12 = vsel %vm3362_vm5, %v11398_v33, -inf  ;;  %v3490_v26 = vsel %vm3362_vm5, %v11399_v1, -inf  ;;  %v3487_v54 = vsel %vm3362_vm5, %v11400_v23, -inf }
 0x2d7   :  { %v11401_v15 = vmax.f32 %v8891_v3, 0.0  ;;  %v3504_v0 = vsel %vm3362_vm5, %v9204_v44, -inf  ;;  %v9532_v27 = vmax.f32 %v3472_v4, %v3473_v59  ;;  %v3479_v28 = vmax.f32 %v3477_v36, %v3478_v18  ;;  %v11404_v44 = vld [vmem:[#allocation13_spill] sm:$0xff] }
 0x2d8   :  { %v3489_v33 = vsel %vm3362_vm5, %v9067_v57, -inf  ;;  %v11402_v52 = vmax.f32 %v8900_v50, 0.0  ;;  %v3510_v3 = vsel %vm3362_vm5, %v9077_v42, -inf  ;;  %v11403_v25 = vrot.slane %v9077_v42, 2 }
 0x2d9   :  { %v3503_v56 = vsel %vm3362_vm5, %v11401_v15, -inf  ;;  %v3491_v1 = vmax.f32 %v3489_v33, %v3490_v26  ;;  %v3492_v59 = vsel %vm3362_vm5, %v11404_v44, -inf  ;;  %v11405_v18 = vrot.slane %v9077_v42, 4 }
 0x2da   :  { %v3505_v20 = vmax.f32 %v3503_v56, %v3504_v0  ;;  %v3506_v5 = vsel %vm3362_vm5, %v11402_v52, -inf  ;;  %v3511_v23 = vsel %vm3362_vm5, %v11403_v25, -inf  ;;  %v3486_v15 = vmax.f32 %v3484_v62, %v3485_v12 }
 0x2db   :  { %v3512_v36 = vmax.f32 %v3510_v3, %v3511_v23  ;;  %v3517_v26 = vsel %vm3362_vm5, %v11405_v18, -inf  ;;  %v11406_v50 = vrot.slane %v11404_v44, 2  ;;  %v3508_v0 = vsel %vm3362_vm5, %v9215_v51, -inf }
 0x2dc   :  { %v3507_v4 = vmax.f32 %v3505_v20, %v3506_v5  ;;  %v11407_v33 = vrot.slane %v9077_v42, 6  ;;  %v3524_v5 = vsel %vm3362_vm5, %v9079_v17, -inf  ;;  %v11408_v3 = vrot.slane %v9079_v17, 2 }
 0x2dd   :  { %v3494_v56 = vsel %vm3362_vm5, %v11406_v50, -inf  ;;  %v3493_v62 = vmax.f32 %v3491_v1, %v3492_v59  ;;  %v3513_v23 = vsel %vm3362_vm5, %v9084_v35, -inf  ;;  %v11409_v51 = vrot.slane %v9079_v17, 4 }
 0x2de   :  { %v3518_v52 = vsel %vm3362_vm5, %v11407_v33, -inf  ;;  %v9557_v25 = vmax.f32 %v3507_v4, %v3508_v0  ;;  %v3525_v12 = vsel %vm3362_vm5, %v11408_v3, -inf  ;;  %v11410_v4 = vrot.slane %v9067_v57, 4 }
 0x2df   :  { %v3519_v20 = vmax.f32 %v3517_v26, %v3518_v52  ;;  %v3526_v18 = vmax.f32 %v3524_v5, %v3525_v12  ;;  %v3531_v42 = vsel %vm3362_vm5, %v11409_v51, -inf  ;;  %v3514_v50 = vmax.f32 %v3512_v36, %v3513_v23 }
 0x2e0   :  { %v9572_v26 = vsel %vm3362_vm5, %v11410_v4, -inf  ;;  %v11411_v0 = vrot.slane %v9084_v35, 4  ;;  %v11412_v1 = vrot.slane %v9079_v17, 6  ;;  %v9580_v52 = vmax.f32 %v3479_v28, %v3480_v48 }
 0x2e1   :  { %v3527_v3 = vsel %vm3362_vm5, %v9086_v34, -inf  ;;  %v9584_v51 = vmax.f32 %v3486_v15, %v3487_v54  ;;  %v11413_v36 = vrot.slane %v9086_v34, 4  ;;  %v9592_v31 = vmax.f32 %v3493_v62, %v3494_v56 }
 0x2e2   :  { %v3520_v33 = vsel %vm3362_vm5, %v11411_v0, -inf  ;;  %v3532_v59 = vsel %vm3362_vm5, %v11412_v1, -inf  ;;  %v3528_v4 = vmax.f32 %v3526_v18, %v3527_v3  ;;  %v11415_v0 = vrot.slane %v11414_v45, 2 }
 0x2e3   :  { %v3521_v5 = vmax.f32 %v3519_v20, %v3520_v33  ;;  %v3533_v12 = vmax.f32 %v3531_v42, %v3532_v59  ;;  %v3534_v23 = vsel %vm3362_vm5, %v11413_v36, -inf  ;;  %v11416_v28 = vrot.slane %v9084_v35, 2 }
 0x2e4   :  { %v3539_v17 = vsel %vm3362_vm5, %v11415_v0, -inf  ;;  %v3538_v54 = vsel %vm3362_vm5, %v11414_v45, -inf  ;;  %v11418_v18 = vrot.slane %v9084_v35, 6  ;;  %v11419_v33 = vrot.slane %v9086_v34, 2 }
 0x2e5   :  { %v3515_v48 = vsel %vm3362_vm5, %v11416_v28, -inf  ;;  %v3535_v20 = vmax.f32 %v3533_v12, %v3534_v23  ;;  %v3540_v56 = vmax.f32 %v3538_v54, %v3539_v17  ;;  %v11420_v59 = vrot.slane %v9086_v34, 6  ;;  %v11423_v28 = vld [vmem:[#allocation35_spill] sm:$0xff] }
 0x2e6   :  { %v9599_v15 = vmax.f32 %v3514_v50, %v3515_v48  ;;  %v3522_v42 = vsel %vm3362_vm5, %v11418_v18, -inf  ;;  %v3529_v1 = vsel %vm3362_vm5, %v11419_v33, -inf  ;;  %v11421_v12 = vmax.f32 %v8909_v8, 0.0 }
 0x2e7   :  { %v9607_v62 = vmax.f32 %v3521_v5, %v3522_v42  ;;  %v3536_v3 = vsel %vm3362_vm5, %v11420_v59, -inf  ;;  %v3553_v35 = vsel %vm3362_vm5, %v9226_v19, -inf  ;;  %v9617_v36 = vmax.f32 %v3528_v4, %v3529_v1 }
 0x2e8   :  { %11417 = vst [vmem:[#allocation21_spill] sm:$0xff] %v9599_v15  ;;  %v3552_v50 = vsel %vm3362_vm5, %v11421_v12, -inf  ;;  %v3541_v23 = vsel %vm3362_vm5, %v9089_v22, -inf  ;;  %v11422_v0 = vrot.slane %v9089_v22, 2  ;;  %v9624_v34 = vmax.f32 %v3535_v20, %v3536_v3  ;;  %v11427_v20 = vld [vmem:[#allocation8_spill] sm:$0xff] }
 0x2e9   :  { %v3554_v17 = vmax.f32 %v3552_v50, %v3553_v35  ;;  %v11424_v48 = vmax.f32 %v11423_v28, 0.0  ;;  %v3559_v54 = vsel %vm3362_vm5, %v9092_v47, -inf  ;;  %v11425_v19 = vrot.slane %v9092_v47, 2 }
 0x2ea   :  { %v3543_v5 = vsel %vm3362_vm5, %v11422_v0, -inf  ;;  %v3542_v18 = vmax.f32 %v3540_v56, %v3541_v23  ;;  %v11426_v1 = vrot.slane %v9092_v47, 4  ;;  %v3557_v3 = vsel %vm3362_vm5, %v11427_v20, -inf }
 0x2eb   :  { %v3555_v8 = vsel %vm3362_vm5, %v11424_v48, -inf  ;;  %v3560_v4 = vsel %vm3362_vm5, %v11425_v19, -inf  ;;  %v3562_v12 = vsel %vm3362_vm5, %v9102_v53, -inf  ;;  %v11428_v50 = vrot.slane %v9102_v53, 2 }
 0x2ec   :  { %v3556_v42 = vmax.f32 %v3554_v17, %v3555_v8  ;;  %v3561_v33 = vmax.f32 %v3559_v54, %v3560_v4  ;;  %v3566_v59 = vsel %vm3362_vm5, %v11426_v1, -inf  ;;  %v11429_v0 = vrot.slane %v9092_v47, 6  ;;  %v9652_v54 = vld.sshfl [vmem:[#allocation1] sm:$0xff pattern:$0x73625140] }
 0x2ed   :  { %v3564_v35 = vsel %vm3362_vm5, %v11428_v50, -inf  ;;  %v11430_v48 = vrot.slane %v9102_v53, 4  ;;  %v11431_v19 = vrot.slane %v9102_v53, 6  ;;  %v3573_v1 = vsel %vm3362_vm5, %v9095_v60, -inf  ;;  %3748 = vst [vmem:[#allocation1] ss:$4 sm:$0xff] %v9487_v9 }
 0x2ee   :  { %v3567_v56 = vsel %vm3362_vm5, %v11429_v0, -inf  ;;  %v9647_v23 = vmax.f32 %v3556_v42, %v3557_v3  ;;  %v3563_v17 = vmax.f32 %v3561_v33, %v3562_v12  ;;  %v11432_v47 = vrot.slane %v9095_v60, 2  ;;  %v9671_v0 = vld.sshfl [vmem:[#allocation1 + $0x20] sm:$0xff pattern:$0x73625140] }
 0x2ef   :  { %v3568_v28 = vmax.f32 %v3566_v59, %v3567_v56  ;;  %v3569_v8 = vsel %vm3362_vm5, %v11430_v48, -inf  ;;  %v3571_v4 = vsel %vm3362_vm5, %v11431_v19, -inf  ;;  %v11433_v33 = vrot.slane %v9095_v60, 4  ;;  %3749 = vst [vmem:[#allocation1 + $0x1] ss:$4 sm:$0xff] %v9503_v40 }
 0x2f0   :  { %v3574_v42 = vsel %vm3362_vm5, %v11432_v47, -inf  ;;  %v9666_v20 = vmax.f32 %v3542_v18, %v3543_v5  ;;  %v11434_v53 = vrot.slane %v9095_v60, 6  ;;  %v9674_v56 = vmax.f32 %v3563_v17, %v3564_v35  ;;  %3750 = vst [vmem:[#allocation1 + $0x2] ss:$4 sm:$0xff] %v9513_v29 }
 0x2f1   :  { %v3580_v59 = vsel %vm3362_vm5, %v11433_v33, -inf  ;;  %v3570_v3 = vmax.f32 %v3568_v28, %v3569_v8  ;;  %v3575_v12 = vmax.f32 %v3573_v1, %v3574_v42  ;;  %v3576_v48 = vsel %vm3362_vm5, %v9105_v6, -inf  ;;  %3751 = vst [vmem:[#allocation1 + $0x3] ss:$4 sm:$0xff] %v9532_v27 }
 0x2f2   :  { %v3581_v50 = vsel %vm3362_vm5, %v11434_v53, -inf  ;;  %v11435_v19 = vrot.slane %v9105_v6, 2  ;;  %v11436_v60 = vrot.slane %v9105_v6, 4  ;;  %v3587_v1 = vsel %vm3362_vm5, %v9098_v49, -inf  ;;  %3752 = vst [vmem:[#allocation1 + $0x20] ss:$4 sm:$0xff] %v9580_v52 }
 0x2f3   :  { %v3582_v18 = vmax.f32 %v3580_v59, %v3581_v50  ;;  %v3577_v28 = vmax.f32 %v3575_v12, %v3576_v48  ;;  %v11437_v35 = vrot.slane %v9098_v49, 2  ;;  %v11438_v42 = vrot.slane %v9105_v6, 6  ;;  %3753 = vst [vmem:[#allocation1 + $0x21] ss:$4 sm:$0xff] %v9584_v51 }
 0x2f4   :  { %v3578_v5 = vsel %vm3362_vm5, %v11435_v19, -inf  ;;  %v3583_v8 = vsel %vm3362_vm5, %v11436_v60, -inf  ;;  %v11439_v12 = vrot.slane %v9098_v49, 4  ;;  %v9698_v50 = vmax.f32 %v3570_v3, %v3571_v4  ;;  %3754 = vst [vmem:[#allocation1 + $0x22] ss:$4 sm:$0xff] %v9592_v31 }
 0x2f5   :  { %v3588_v17 = vsel %vm3362_vm5, %v11437_v35, -inf  ;;  %v3584_v47 = vmax.f32 %v3582_v18, %v3583_v8  ;;  %v3585_v33 = vsel %vm3362_vm5, %v11438_v42, -inf  ;;  %v9700_v48 = vmax.f32 %v3577_v28, %v3578_v5  ;;  %v11443_v28 = vld [vmem:[#allocation44_spill] sm:$0xff]  ;;  %v11445_v42 = vld [vmem:[#allocation41_spill] sm:$0xff]  ;;  %3755 = vst [vmem:[#allocation1 + $0x23] ss:$4 sm:$0xff] %v9599_v15 }
 0x2f6   :  { %v3589_v59 = vmax.f32 %v3587_v1, %v3588_v17  ;;  %v3594_v53 = vsel %vm3362_vm5, %v11439_v12, -inf  ;;  %v3590_v19 = vsel %vm3362_vm5, %v9108_v41, -inf  ;;  %v11440_v18 = vrot.slane %v9098_v49, 6 }
 0x2f7   :  { %v9708_v60 = vmax.f32 %v3584_v47, %v3585_v33  ;;  %v11441_v1 = vrot.slane %v9108_v41, 2  ;;  %v11442_v3 = vrot.slane %v9108_v41, 4  ;;  %v11444_v49 = vmax.f32 %v11443_v28, 0.0  ;;  %v11446_v33 = vld [vmem:[#allocation52_spill] sm:$0xff] }
 0x2f8   :  { %v3595_v6 = vsel %vm3362_vm5, %v11440_v18, -inf  ;;  %v3591_v8 = vmax.f32 %v3589_v59, %v3590_v19  ;;  %v3602_v47 = vsel %vm3362_vm5, %v11445_v42, -inf  ;;  %v3608_v59 = vsel %vm3362_vm5, %v11446_v33, -inf }
 0x2f9   :  { %v3592_v35 = vsel %vm3362_vm5, %v11441_v1, -inf  ;;  %v3596_v4 = vmax.f32 %v3594_v53, %v3595_v6  ;;  %v3597_v5 = vsel %vm3362_vm5, %v11442_v3, -inf  ;;  %v3601_v17 = vsel %vm3362_vm5, %v11444_v49, -inf  ;;  %v5700_v1 = vld [vmem:[%s10550_s2 + $0x38] sm:$0xff]  ;;  %v11449_v49 = vld [vmem:[#allocation58_spill] sm:$0xff] }
 0x2fa   :  { %v9725_v12 = vmax.f32 %v3591_v8, %v3592_v35  ;;  %v3603_v19 = vmax.f32 %v3601_v17, %v3602_v47  ;;  %v11447_v18 = vrot.slane %v11446_v33, 2  ;;  %v11448_v3 = vrot.slane %v9108_v41, 6  ;;  %5006 = vmatpush.bf16.msra.mxu0 %v5700_v1  ;;  %5765 = vmatpush.bf16.msra.mxu1 %v5700_v1 }
 0x2fb   :  { %v3598_v53 = vmax.f32 %v3596_v4, %v3597_v5  ;;  %v11450_v42 = vmax.f32 %v11449_v49, 0.0  ;;  %v11451_v35 = vrot.slane %v11446_v33, 4  ;;  %v3611_v47 = vsel %vm3362_vm5, %v9122_v32, -inf  ;;  %v11453_v49 = vld [vmem:[#allocation59_spill] sm:$0xff] }
 0x2fc   :  { %v3609_v6 = vsel %vm3362_vm5, %v11447_v18, -inf  ;;  %v3599_v28 = vsel %vm3362_vm5, %v11448_v3, -inf  ;;  %v11452_v18 = vrot.slane %v11446_v33, 6  ;;  %v9749_v3 = vld.sshfl [vmem:[#allocation1] sm:$0xff pattern:$0x73625140] }
 0x2fd   :  { %v3604_v15 = vsel %vm3362_vm5, %v11450_v42, -inf  ;;  %v3610_v8 = vmax.f32 %v3608_v59, %v3609_v6  ;;  %v3615_v4 = vsel %vm3362_vm5, %v11451_v35, -inf  ;;  %v9742_v5 = vmax.f32 %v3598_v53, %v3599_v28  ;;  %3758 = vst [vmem:[#allocation1] ss:$4 sm:$0xff] %v9607_v62  ;;  %v11457_v35 = vld [vmem:[#allocation19_spill] sm:$0xff] }
 0x2fe   :  { %v3605_v17 = vmax.f32 %v3603_v19, %v3604_v15  ;;  %v3616_v41 = vsel %vm3362_vm5, %v11452_v18, -inf  ;;  %v3606_v59 = vsel %vm3362_vm5, %v11453_v49, -inf  ;;  %v11454_v42 = vrot.slane %v9122_v32, 2  ;;  %3759 = vst [vmem:[#allocation1 + $0x1] ss:$4 sm:$0xff] %v9617_v36 }
 0x2ff   :  { %v3612_v6 = vmax.f32 %v3610_v8, %v3611_v47  ;;  %v3617_v15 = vmax.f32 %v3615_v4, %v3616_v41  ;;  %v11456_v33 = vrot.slane %v9122_v32, 4  ;;  %v3622_v1 = vsel %vm3362_vm5, %v11457_v35, -inf  ;;  %3760 = vst [vmem:[#allocation1 + $0x2] ss:$4 sm:$0xff] %v9624_v34 }
 0x300   :  { %v3613_v53 = vsel %vm3362_vm5, %v11454_v42, -inf  ;;  %v9757_v19 = vmax.f32 %v3605_v17, %v3606_v59  ;;  %v11458_v18 = vrot.slane %v11457_v35, 2  ;;  %v11460_v17 = vrot.slane %v11457_v35, 4  ;;  %3761 = vst [vmem:[#allocation1 + $0x3] ss:$4 sm:$0xff] %v9666_v20 }
 0x301   :  { %v3618_v28 = vsel %vm3362_vm5, %v11456_v33, -inf  ;;  %v9768_v47 = vmax.f32 %v3612_v6, %v3613_v53  ;;  %v11461_v59 = vrot.slane %v9122_v32, 6  ;;  %v3625_v33 = vsel %vm3362_vm5, %v9125_v16, -inf  ;;  %v11463_v53 = vld [vmem:[#allocation61_spill] sm:$0xff] }
 0x302   :  { %11455 = vst [vmem:[#allocation15_spill] sm:$0xff] %v9757_v19  ;;  %v3623_v8 = vsel %vm3362_vm5, %v11458_v18, -inf  ;;  %v3619_v4 = vmax.f32 %v3617_v15, %v3618_v28  ;;  %v3629_v49 = vsel %vm3362_vm5, %v11460_v17, -inf  ;;  %v11462_v18 = vrot.slane %v11457_v35, 6  ;;  %v5699_v35 = vld [vmem:[%s10550_s2 + $0x30] sm:$0xff] }
 0x303   :  { %11459 = vst [vmem:[#allocation5_spill] sm:$0xff] %v9768_v47  ;;  %v3624_v41 = vmax.f32 %v3622_v1, %v3623_v8  ;;  %v3620_v42 = vsel %vm3362_vm5, %v11461_v59, -inf  ;;  %v3636_v15 = vsel %vm3362_vm5, %v11463_v53, -inf  ;;  %v11465_v32 = vrot.slane %v11463_v53, 2  ;;  %5007 = vmatpush.bf16.msra.mxu0 %v5699_v35  ;;  %5766 = vmatpush.bf16.msra.mxu1 %v5699_v35 }
 0x304   :  { %v3630_v6 = vsel %vm3362_vm5, %v11462_v18, -inf  ;;  %v9785_v28 = vmax.f32 %v3619_v4, %v3620_v42  ;;  %v9790_v59 = vld.sshfl [vmem:[#allocation1 + $0x20] sm:$0xff pattern:$0x73625140]  ;;  %v11466_v18 = vrot.slane %v9125_v16, 2  ;;  %v11467_v19 = vrot.slane %v9125_v16, 4 }
 0x305   :  { %v3626_v1 = vmax.f32 %v3624_v41, %v3625_v33  ;;  %v3631_v8 = vmax.f32 %v3629_v49, %v3630_v6  ;;  %v3637_v17 = vsel %vm3362_vm5, %v11465_v32, -inf  ;;  %v11468_v49 = vrot.slane %v11463_v53, 4  ;;  %3762 = vst [vmem:[#allocation1 + $0x20] ss:$4 sm:$0xff] %v9674_v56 }
 0x306   :  { %11464 = vst [vmem:[#allocation39_spill] sm:$0xff] %v9785_v28  ;;  %v3627_v47 = vsel %vm3362_vm5, %v11466_v18, -inf  ;;  %v3632_v4 = vsel %vm3362_vm5, %v11467_v19, -inf  ;;  %v3638_v41 = vmax.f32 %v3636_v15, %v3637_v17  ;;  %v3639_v32 = vsel %vm3362_vm5, %v9128_v21, -inf }
 0x307   :  { %v3643_v42 = vsel %vm3362_vm5, %v11468_v49, -inf  ;;  %v9805_v33 = vmax.f32 %v3626_v1, %v3627_v47  ;;  %v3633_v6 = vmax.f32 %v3631_v8, %v3632_v4  ;;  %v11469_v28 = vrot.slane %v11463_v53, 6  ;;  %3763 = vst [vmem:[#allocation1 + $0x21] ss:$4 sm:$0xff] %v9698_v50  ;;  %v5698_v53 = vld [vmem:[%s10550_s2 + $0x28] sm:$0xff]  ;;  %v11474_v4 = vld [vmem:[#allocation40_spill] sm:$0xff] }
 0x308   :  { %v11470_v19 = vrot.slane %v9125_v16, 6  ;;  %v3640_v17 = vmax.f32 %v3638_v41, %v3639_v32  ;;  %v11471_v47 = vrot.slane %v9128_v21, 2  ;;  %3764 = vst [vmem:[#allocation1 + $0x22] ss:$4 sm:$0xff] %v9700_v48  ;;  %v11473_v35 = vrot.slane %v9128_v21, 4  ;;  %v11476_v32 = vld [vmem:[#allocation31_spill] sm:$0xff]  ;;  %5008 = vmatpush.bf16.msra.mxu0 %v5698_v53  ;;  %5767 = vmatpush.bf16.msra.mxu1 %v5698_v53 }
 0x309   :  { %v3644_v18 = vsel %vm3362_vm5, %v11469_v28, -inf  ;;  %v11475_v49 = vmax.f32 %v11474_v4, 0.0  ;;  %3765 = vst [vmem:[#allocation1 + $0x23] ss:$4 sm:$0xff] %v9708_v60  ;;  %v3657_v4 = vsel %vm3362_vm5, %v9132_v58, -inf  ;;  %v3660_v53 = vsel %vm3362_vm5, %v9138_v43, -inf }
 0x30a   :  { %v3634_v15 = vsel %vm3362_vm5, %v11470_v19, -inf  ;;  %v3641_v1 = vsel %vm3362_vm5, %v11471_v47, -inf  ;;  %v3645_v8 = vmax.f32 %v3643_v42, %v3644_v18  ;;  %v3646_v16 = vsel %vm3362_vm5, %v11473_v35, -inf }
 0x30b   :  { %v9823_v28 = vmax.f32 %v3633_v6, %v3634_v15  ;;  %v3650_v41 = vsel %vm3362_vm5, %v11475_v49, -inf  ;;  %v3651_v19 = vsel %vm3362_vm5, %v11476_v32, -inf  ;;  %v9834_v42 = vmax.f32 %v3640_v17, %v3641_v1 }
 0x30c   :  { %v3647_v18 = vmax.f32 %v3645_v8, %v3646_v16  ;;  %v11477_v47 = vrot.slane %v9128_v21, 6  ;;  %v3652_v15 = vmax.f32 %v3650_v41, %v3651_v19  ;;  %v11479_v49 = vrot.slane %v9132_v58, 2  ;;  %v9855_v41 = vld.sshfl [vmem:[#allocation1] sm:$0xff pattern:$0x73625140] }
 0x30d   :  { %11472 = vst [vmem:[#allocation6_spill] sm:$0xff] %v9823_v28  ;;  %v11478_v28 = vmax.f32 %v8966_v30, 0.0  ;;  %v11480_v17 = vrot.slane %v9132_v58, 4  ;;  %v11481_v30 = vrot.slane %v9132_v58, 6  ;;  %v5697_v19 = vld [vmem:[%s10550_s2 + $0x20] sm:$0xff] }
 0x30e   :  { %v3648_v6 = vsel %vm3362_vm5, %v11477_v47, -inf  ;;  %v3658_v32 = vsel %vm3362_vm5, %v11479_v49, -inf  ;;  %v3655_v47 = vsel %vm3362_vm5, %v9428_v63, -inf  ;;  %3768 = vst [vmem:[#allocation1] ss:$4 sm:$0xff] %v9725_v12  ;;  %v11483_v49 = vrot.slane %v9135_v13, 2  ;;  %5009 = vmatpush.bf16.msra.mxu0 %v5697_v19  ;;  %5768 = vmatpush.bf16.msra.mxu1 %v5697_v19 }
 0x30f   :  { %v3653_v35 = vsel %vm3362_vm5, %v11478_v28, -inf  ;;  %v3664_v1 = vsel %vm3362_vm5, %v11480_v17, -inf  ;;  %v9850_v21 = vmax.f32 %v3647_v18, %v3648_v6  ;;  %v3659_v16 = vmax.f32 %v3657_v4, %v3658_v32 }
 0x310   :  { %v3654_v8 = vmax.f32 %v3652_v15, %v3653_v35  ;;  %v3665_v28 = vsel %vm3362_vm5, %v11481_v30, -inf  ;;  %v11482_v6 = vrot.slane %v9138_v43, 4  ;;  %v3671_v4 = vsel %vm3362_vm5, %v9135_v13, -inf }
 0x311   :  { %v3666_v18 = vmax.f32 %v3664_v1, %v3665_v28  ;;  %v9870_v35 = vmax.f32 %v3659_v16, %v3660_v53  ;;  %v3672_v63 = vsel %vm3362_vm5, %v11483_v49, -inf  ;;  %v11484_v32 = vrot.slane %v9138_v43, 2 }
 0x312   :  { %v3667_v15 = vsel %vm3362_vm5, %v11482_v6, -inf  ;;  %v9868_v58 = vmax.f32 %v3654_v8, %v3655_v47  ;;  %v3673_v30 = vmax.f32 %v3671_v4, %v3672_v63  ;;  %v11485_v28 = vrot.slane %v9135_v13, 4 }
 0x313   :  { %v9880_v17 = vsel %vm3362_vm5, %v11484_v32, -inf  ;;  %v3668_v1 = vmax.f32 %v3666_v18, %v3667_v15  ;;  %v11486_v47 = vrot.slane %v9138_v43, 6  ;;  %v3674_v6 = vsel %vm3362_vm5, %v11388_v61, -inf  ;;  %v9895_v15 = vld.sshfl [vmem:[#allocation1 + $0x20] sm:$0xff pattern:$0x73625140] }
 0x314   :  { %v3678_v8 = vsel %vm3362_vm5, %v11485_v28, -inf  ;;  %v11487_v49 = vrot.slane %v9135_v13, 6  ;;  %v11488_v4 = vrot.slane %v9067_v57, 6  ;;  %v3675_v32 = vmax.f32 %v3673_v30, %v3674_v6  ;;  %3797 = vst [vmem:[#allocation1 + $0x20] ss:$4 sm:$0xff] %v9373_v2  ;;  %v5696_v43 = vld [vmem:[%s10550_s2 + $0x18] sm:$0xff] }
 0x315   :  { %v3669_v53 = vsel %vm3362_vm5, %v11486_v47, -inf  ;;  %v3139_v13 = vrot.slane %v11404_v44, 4  ;;  %v11489_v47 = vrot.slane %v9053_v46, 4  ;;  %v11490_v57 = vrot.slane %v11388_v61, 2  ;;  %3799 = vst [vmem:[#allocation1 + $0x21] ss:$4 sm:$0xff] %v9412_v37  ;;  %5010 = vmatpush.bf16.msra.mxu0 %v5696_v43  ;;  %5769 = vmatpush.bf16.msra.mxu1 %v5696_v43 }
 0x316   :  { %v3679_v18 = vsel %vm3362_vm5, %v11487_v49, -inf  ;;  %v3497_v19 = vsel %vm3362_vm5, %v11488_v4, -inf  ;;  %v9900_v63 = vmax.f32 %v3668_v1, %v3669_v53  ;;  %v11491_v1 = vrot.slane %v11388_v61, 4  ;;  %3801 = vst [vmem:[#allocation1 + $0x22] ss:$4 sm:$0xff] %v9430_v14 }
 0x317   :  { %v3680_v28 = vmax.f32 %v3678_v8, %v3679_v18  ;;  %v3447_v49 = vsel %vm3362_vm5, %v11489_v47, -inf  ;;  %v3676_v4 = vsel %vm3362_vm5, %v11490_v57, -inf  ;;  %v11492_v8 = vrot.slane %v9053_v46, 6  ;;  %3803 = vst [vmem:[#allocation1 + $0x23] ss:$4 sm:$0xff] %v9487_v9  ;;  %v5695_v46 = vld [vmem:[%s10550_s2 + $0x10] sm:$0xff] }
 0x318   :  { %v3681_v30 = vsel %vm3362_vm5, %v11491_v1, -inf  ;;  %v9920_v6 = vmax.f32 %v3675_v32, %v3676_v4  ;;  %v11493_v16 = vrot.slane %v11388_v61, 6  ;;  %v3498_v57 = vmax.f32 %v9572_v26, %v3497_v19  ;;  %v9927_v1 = vld.sshfl [vmem:[#allocation1] sm:$0xff pattern:$0x73625140] }
 0x319   :  { %v3448_v53 = vsel %vm3362_vm5, %v11492_v8, -inf  ;;  %v3682_v18 = vmax.f32 %v3680_v28, %v3681_v30  ;;  %3789 = vst [vmem:[#allocation1] ss:$4 sm:$0xff] %v9317_v55  ;;  %v3119_v61 = vrot.slane %v11386_v7, 4  ;;  %v3499_v26 = vsel %vm3362_vm5, %v3139_v13, -inf  ;;  %5011 = vmatpush.bf16.msra.mxu0 %v5695_v46  ;;  %5770 = vmatpush.bf16.msra.mxu1 %v5695_v46  ;;  %v5694_v55 = vld [vmem:[%s10550_s2 + $0x8] sm:$0xff] }
 0x31a   :  { %v3683_v47 = vsel %vm3362_vm5, %v11493_v16, -inf  ;;  %3791 = vst [vmem:[#allocation1 + $0x1] ss:$4 sm:$0xff] %v9328_v39  ;;  %v3140_v16 = vrot.slane %v11404_v44, 6  ;;  %v3449_v28 = vmax.f32 %v3447_v49, %v3448_v53  ;;  %v3500_v19 = vmax.f32 %v3498_v57, %v3499_v26 }
 0x31b   :  { %v9933_v32 = vmax.f32 %v3682_v18, %v3683_v47  ;;  %3793 = vst [vmem:[#allocation1 + $0x2] ss:$4 sm:$0xff] %v9342_v38  ;;  %v3120_v43 = vrot.slane %v11386_v7, 6  ;;  %v3450_v4 = vsel %vm3362_vm5, %v3119_v61, -inf  ;;  %v3777_v13 = vpack.c.bf16 %v9652_v54, %v9652_v54  ;;  %v5693_v7 = vld [vmem:[%s10550_s2] sm:$0xff] }
 0x31c   :  { %3795 = vst [vmem:[#allocation1 + $0x3] ss:$4 sm:$0xff] %v9358_v24  ;;  %v3451_v30 = vmax.f32 %v3449_v28, %v3450_v4  ;;  %v3501_v44 = vsel %vm3362_vm5, %v3140_v16, -inf  ;;  %v3778_v8 = vpack.c.bf16 %v9671_v0, %v9671_v0  ;;  %v3149_v18 = vrot.slane %v11414_v45, 4 }
 0x31d   :  { %5012 = vmatpush.bf16.msra.mxu0 %v5694_v55  ;;  %5771 = vmatpush.bf16.msra.mxu1 %v5694_v55  ;;  %v9954_v53 = vmax.f32 %v3500_v19, %v3501_v44  ;;  %v3150_v47 = vrot.slane %v11414_v45, 6  ;;  %v4239_v57 = vunpack.c.l.b16 %v3777_v13  ;;  %v3452_v46 = vsel %vm3362_vm5, %v3120_v43, -inf }
 0x31e   :  { %v9948_v49 = vld.sshfl [vmem:[#allocation1 + $0x20] sm:$0xff pattern:$0x73625140]  ;;  %v4240_v54 = vunpack.c.l.b16 %v3778_v8  ;;  %v9965_v0 = vmax.f32 %v3451_v30, %v3452_v46  ;;  %v3545_v45 = vsel %vm3362_vm5, %v3149_v18, -inf  ;;  %v3159_v26 = vrot.slane %v9089_v22, 4 }
 0x31f   :  { %3810 = vst [vmem:[#allocation1 + $0x20] ss:$4 sm:$0xff] %v9584_v51  ;;  %v3546_v28 = vsel %vm3362_vm5, %v3150_v47, -inf  ;;  %v3160_v43 = vrot.slane %v9089_v22, 6  ;;  %v3779_v44 = vpack.c.bf16 %v9749_v3, %v9749_v3  ;;  %v3780_v13 = vpack.c.bf16 %v9790_v59, %v9790_v59 }
 0x320   :  { %3811 = vst [vmem:[#allocation1 + $0x21] ss:$4 sm:$0xff] %v9592_v31  ;;  %v4246_v16 = vpack.c.b16 %v4240_v54, %v4239_v57  ;;  %v3547_v19 = vmax.f32 %v3545_v45, %v3546_v28  ;;  %v3548_v4 = vsel %vm3362_vm5, %v3159_v26, -inf  ;;  %v3782_v18 = vpack.c.bf16 %v9895_v15, %v9895_v15  ;;  %v5707_v28 = vld [vmem:[%s10550_s2 + $0x70] sm:$0xff] }
 0x321   :  { %3812 = vst [vmem:[#allocation1 + $0x22] ss:$4 sm:$0xff] %v9954_v53  ;;  %5013 = vmatpush.bf16.msra.mxu0 %v5693_v7  ;;  %5772 = vmatpush.bf16.msra.mxu1 %v5693_v7  ;;  %v3550_v22 = vsel %vm3362_vm5, %v3160_v43, -inf  ;;  %v3781_v7 = vpack.c.bf16 %v9855_v41, %v9855_v41  ;;  %v4241_v59 = vunpack.c.l.b16 %v3779_v44  ;;  %v4242_v47 = vunpack.c.l.b16 %v3780_v13  ;;  %v5708_v41 = vld [vmem:[%s10550_s2 + $0x78] sm:$0xff] }
 0x322   :  { %3813 = vst [vmem:[#allocation1 + $0x23] ss:$4 sm:$0xff] %v9607_v62  ;;  %v3549_v30 = vmax.f32 %v3547_v19, %v3548_v4  ;;  %v4244_v54 = vunpack.c.l.b16 %v3782_v18  ;;  %v11494_v15 = vmax.f32 %v9375_v10, %v9385_v11  ;;  %v3783_v10 = vpack.c.bf16 %v9927_v1, %v9927_v1  ;;  %v5706_v11 = vld [vmem:[%s10550_s2 + $0x68] sm:$0xff]  ;;  %v5705_v4 = vld [vmem:[%s10550_s2 + $0x60] sm:$0xff]  ;;  %v5704_v44 = vld [vmem:[%s10550_s2 + $0x58] sm:$0xff] }
 0x323   :  { %v9967_v61 = vld.sshfl [vmem:[#allocation1] sm:$0xff pattern:$0x73625140]  ;;  %v4243_v57 = vunpack.c.l.b16 %v3781_v7  ;;  %v5716_v13 = vld [vmem:[%s10550_s2 + $0xb8] sm:$0xff]  ;;  %v5714_v7 = vld [vmem:[%s10550_s2 + $0xa8] sm:$0xff]  ;;  %v3836_v18 = vpack.c.bf16 %v9948_v49, %v9948_v49 }
 0x324   :  { %3806 = vst [vmem:[#allocation1] ss:$4 sm:$0xff] %v9503_v40  ;;  %5014 = vmatmul.bf16.vlgmr.msra.gmra.mxu0 %v4246_v16  ;;  %v9997_v3 = vmax.f32 %v3549_v30, %v3550_v22  ;;  %v4247_v16 = vpack.c.b16 %v4242_v47, %v4241_v59  ;;  %v4245_v19 = vunpack.c.l.b16 %v3783_v10  ;;  %5062 = vmatpush.bf16.msra.mxu2 %v5716_v13  ;;  %v5702_v22 = vld [vmem:[%s10550_s2 + $0x48] sm:$0xff]  ;;  %v11495_v59 = vld [vmem:[#allocation27_spill] sm:$0xff] }
 0x325   :  { %3807 = vst [vmem:[#allocation1 + $0x1] ss:$4 sm:$0xff] %v9965_v0  ;;  %v4248_v46 = vpack.c.b16 %v4244_v54, %v4243_v57  ;;  %5034 = vmatpush.bf16.msrb.mxu1 %v5708_v41  ;;  %v5701_v57 = vld [vmem:[%s10550_s2 + $0x40] sm:$0xff]  ;;  %v4262_v49 = vunpack.c.l.b16 %v3836_v18  ;;  %v5723_v18 = vld [vmem:[%s10550_s2 + $0xf0] sm:$0xff] }
 0x326   :  { %3808 = vst [vmem:[#allocation1 + $0x2] ss:$4 sm:$0xff] %v9532_v27  ;;  %v4249_v1 = vpack.c.b16 %v4245_v19, %v4245_v19  ;;  %v5713_v54 = vld [vmem:[%s10550_s2 + $0xa0] sm:$0xff] }
 0x327   :  { %3809 = vst [vmem:[#allocation1 + $0x3] ss:$4 sm:$0xff] %v9580_v52  ;;  %5024 = vmatmul.bf16.vlgmr.msra.gmra.mxu1 %v4248_v46 }
 0x329   :  { %v9977_v55 = vld.sshfl [vmem:[#allocation1 + $0x20] sm:$0xff pattern:$0x73625140]  ;;  %5035 = vmatpush.bf16.msrb.mxu1 %v5707_v28 }
 0x32a   :  { %3820 = vst [vmem:[#allocation1 + $0x20] ss:$4 sm:$0xff] %v9698_v50  ;;  %v3838_v19 = vpack.c.bf16 %v9977_v55, %v9977_v55  ;;  %v11496_v55 = vld [vmem:[#allocation15_spill] sm:$0xff] }
 0x32b   :  { %3821 = vst [vmem:[#allocation1 + $0x21] ss:$4 sm:$0xff] %v9700_v48 }
 0x32c   :  { %3822 = vst [vmem:[#allocation1 + $0x22] ss:$4 sm:$0xff] %v9708_v60  ;;  %v4264_v13 = vunpack.c.l.b16 %v3838_v19 }
 0x32d   :  { %3823 = vst [vmem:[#allocation1 + $0x23] ss:$4 sm:$0xff] %v9725_v12  ;;  %5036 = vmatpush.bf16.msrb.mxu1 %v5706_v11  ;;  %v5710_v11 = vld [vmem:[%s10550_s2 + $0x88] sm:$0xff] }
 0x32e   :  { %v9988_v8 = vld.sshfl [vmem:[#allocation1] sm:$0xff pattern:$0x73625140] }
 0x32f   :  { %3816 = vst [vmem:[#allocation1] ss:$4 sm:$0xff] %v9617_v36  ;;  %v3837_v10 = vpack.c.bf16 %v9988_v8, %v9988_v8 }
 0x330   :  { %3817 = vst [vmem:[#allocation1 + $0x1] ss:$4 sm:$0xff] %v9624_v34 }
 0x331   :  { %3818 = vst [vmem:[#allocation1 + $0x2] ss:$4 sm:$0xff] %v9666_v20  ;;  %5037 = vmatpush.bf16.msrb.mxu1 %v5705_v4  ;;  %v4263_v8 = vunpack.c.l.b16 %v3837_v10 }
 0x332   :  { %3819 = vst [vmem:[#allocation1 + $0x3] ss:$4 sm:$0xff] %v9997_v3 }
 0x334   :  { %v10005_v45 = vld.sshfl [vmem:[#allocation1 + $0x20] sm:$0xff pattern:$0x73625140]  ;;  %5019 = vmatmul.bf16.gmra.mxu0 %v4247_v16  ;;  %v5712_v16 = vld [vmem:[%s10550_s2 + $0x98] sm:$0xff] }
 0x335   :  { %3855 = vst [vmem:[#allocation1 + $0x20] ss:$4 sm:$0xff] %v11494_v15  ;;  %5038 = vmatpush.bf16.msrb.mxu1 %v5704_v44  ;;  %v5711_v15 = vld [vmem:[%s10550_s2 + $0x90] sm:$0xff]  ;;  %v5709_v44 = vld [vmem:[%s10550_s2 + $0x80] sm:$0xff] }
 0x336   :  { %3857 = vst [vmem:[#allocation1 + $0x21] ss:$4 sm:$0xff] %v9430_v14 }
 0x337   :  { %3859 = vst [vmem:[#allocation1 + $0x22] ss:$4 sm:$0xff] %v9487_v9  ;;  %5029 = vmatmul.bf16.gmra.mxu1 %v4249_v1 }
 0x338   :  { %3861 = vst [vmem:[#allocation1 + $0x23] ss:$4 sm:$0xff] %v9503_v40 }
 0x339   :  { %v10015_v26 = vld.sshfl [vmem:[#allocation1] sm:$0xff pattern:$0x73625140] }
 0x33a   :  { %3826 = vst [vmem:[#allocation1] ss:$4 sm:$0xff] %v9742_v5 }
 0x33f   :  { %v10024_v43 = vld.sshfl [vmem:[#allocation1 + $0x20] sm:$0xff pattern:$0x73625140] }
 0x340   :  { %3868 = vst [vmem:[#allocation1 + $0x20] ss:$4 sm:$0xff] %v9592_v31  ;;  %v3894_v4 = vpack.c.bf16 %v10024_v43, %v10024_v43 }
 0x341   :  { %v10029_v30 = vld.sshfl [vmem:[#allocation1] sm:$0xff pattern:$0x73625140]  ;;  %3869 = vst [vmem:[#allocation1 + $0x21] ss:$4 sm:$0xff] %v9954_v53 }
 0x342   :  { %3847 = vst [vmem:[#allocation1] ss:$4 sm:$0xff] %v9328_v39  ;;  %v5703_v39 = vld [vmem:[%s10550_s2 + $0x50] sm:$0xff] }
 0x343   :  { %3849 = vst [vmem:[#allocation1 + $0x1] ss:$4 sm:$0xff] %v9342_v38  ;;  %v5715_v38 = vld [vmem:[%s10550_s2 + $0xb0] sm:$0xff]  ;;  %5039 = vmatpush.bf16.msrb.mxu1 %v5703_v39 }
 0x344   :  { %3851 = vst [vmem:[#allocation1 + $0x2] ss:$4 sm:$0xff] %v9358_v24  ;;  %5063 = vmatpush.bf16.msra.mxu2 %v5715_v38  ;;  %v3835_v24 = vpack.c.bf16 %v9967_v61, %v9967_v61  ;;  %v4284_v38 = vunpack.c.l.b16 %v3894_v4 }
 0x345   :  { %3853 = vst [vmem:[#allocation1 + $0x3] ss:$4 sm:$0xff] %v9373_v2 }
 0x346   :  { %3870 = vst [vmem:[#allocation1 + $0x22] ss:$4 sm:$0xff] %v9557_v25  ;;  %v4261_v47 = vunpack.c.l.b16 %v3835_v24 }
 0x347   :  { %3871 = vst [vmem:[#allocation1 + $0x23] ss:$4 sm:$0xff] %v9617_v36  ;;  %5040 = vmatpush.bf16.msrb.mxu1 %v5702_v22  ;;  %v4269_v22 = vpack.c.b16 %v4264_v13, %v4263_v8  ;;  %v11498_v8 = vld [vmem:[#allocation5_spill] sm:$0xff] }
 0x348   :  { %5064 = vmatpush.bf16.msra.mxu2 %v5714_v7  ;;  %v4268_v46 = vpack.c.b16 %v4262_v49, %v4261_v47  ;;  %v5724_v7 = vld [vmem:[%s10550_s2 + $0xf8] sm:$0xff] }
 0x349   :  { %5090 = vmatpush.bf16.msra.mxu3 %v5724_v7 }
 0x34b   :  { %5041 = vmatpush.bf16.msrb.mxu1 %v5701_v57  ;;  %v11497_v57 = vld [vmem:[#allocation32_spill] sm:$0xff] }
 0x34c   :  { %v3862_v2 = vld.sshfl [vmem:[#allocation1] sm:$0xff pattern:$0x73625140]  ;;  %5065 = vmatpush.bf16.msra.mxu2 %v5713_v54  ;;  %v3839_v54 = vpack.c.bf16 %v10015_v26, %v10015_v26 }
 0x34d   :  { %3864 = vst [vmem:[#allocation1] ss:$4 sm:$0xff] %v9965_v0  ;;  %v3893_v1 = vpack.c.bf16 %v3862_v2, %v3862_v2  ;;  %5091 = vmatpush.bf16.msra.mxu3 %v5723_v18 }
 0x34e   :  { %3865 = vst [vmem:[#allocation1 + $0x1] ss:$4 sm:$0xff] %v11495_v59  ;;  %v10064_v61 = vld.sshfl [vmem:[#allocation1 + $0x20] sm:$0xff pattern:$0x73625140]  ;;  %5042 = vmatmul.bf16.vlgmr.msrb.gmra.mxu1 %v4268_v46  ;;  %v5722_v46 = vld [vmem:[%s10550_s2 + $0xe8] sm:$0xff]  ;;  %v4265_v10 = vunpack.c.l.b16 %v3839_v54 }
 0x34f   :  { %3866 = vst [vmem:[#allocation1 + $0x2] ss:$4 sm:$0xff] %v9580_v52  ;;  %v4283_v39 = vunpack.c.l.b16 %v3893_v1 }
 0x350   :  { %3867 = vst [vmem:[#allocation1 + $0x3] ss:$4 sm:$0xff] %v9584_v51  ;;  %5066 = vmatpush.bf16.msra.mxu2 %v5712_v16  ;;  %v3840_v16 = vpack.c.bf16 %v10005_v45, %v10005_v45  ;;  %v11499_v45 = vld [vmem:[#allocation39_spill] sm:$0xff] }
 0x351   :  { %3878 = vst [vmem:[#allocation1 + $0x20] ss:$4 sm:$0xff] %v9700_v48  ;;  %v4290_v43 = vpack.c.b16 %v4284_v38, %v4283_v39  ;;  %5092 = vmatpush.bf16.msra.mxu3 %v5722_v46  ;;  %v11500_v39 = vld [vmem:[#allocation6_spill] sm:$0xff]  ;;  %v11501_v38 = vld [vmem:[#allocation21_spill] sm:$0xff] }
 0x352   :  { %3879 = vst [vmem:[#allocation1 + $0x21] ss:$4 sm:$0xff] %v9708_v60  ;;  %v4266_v19 = vunpack.c.l.b16 %v3840_v16 }
 0x353   :  { %3880 = vst [vmem:[#allocation1 + $0x22] ss:$4 sm:$0xff] %v9725_v12 }
 0x354   :  { %3881 = vst [vmem:[#allocation1 + $0x23] ss:$4 sm:$0xff] %v9742_v5  ;;  %5067 = vmatpush.bf16.msra.mxu2 %v5711_v15  ;;  %v3896_v15 = vpack.c.bf16 %v10064_v61, %v10064_v61  ;;  %v4270_v1 = vpack.c.b16 %v4266_v19, %v4265_v10 }
 0x356   :  { %v4286_v4 = vunpack.c.l.b16 %v3896_v15  ;;  %v5717_v15 = vld [vmem:[%s10550_s2 + $0xc0] sm:$0xff] }
 0x357   :  { %v3872_v41 = vld.sshfl [vmem:[#allocation1] sm:$0xff pattern:$0x73625140] }
 0x358   :  { %3874 = vst [vmem:[#allocation1] ss:$4 sm:$0xff] %v9624_v34  ;;  %5068 = vmatpush.bf16.msra.mxu2 %v5710_v11  ;;  %v3895_v49 = vpack.c.bf16 %v3872_v41, %v3872_v41  ;;  %v5721_v41 = vld [vmem:[%s10550_s2 + $0xe0] sm:$0xff] }
 0x359   :  { %3875 = vst [vmem:[#allocation1 + $0x1] ss:$4 sm:$0xff] %v9666_v20  ;;  %5093 = vmatpush.bf16.msra.mxu3 %v5721_v41 }
 0x35a   :  { %3876 = vst [vmem:[#allocation1 + $0x2] ss:$4 sm:$0xff] %v9997_v3  ;;  %v4285_v26 = vunpack.c.l.b16 %v3895_v49 }
 0x35b   :  { %3877 = vst [vmem:[#allocation1 + $0x3] ss:$4 sm:$0xff] %v9647_v23  ;;  %v10087_v28 = vld.sshfl [vmem:[#allocation1 + $0x20] sm:$0xff pattern:$0x73625140] }
 0x35c   :  { %3913 = vst [vmem:[#allocation1 + $0x20] ss:$4 sm:$0xff] %v9503_v40  ;;  %5069 = vmatpush.bf16.msra.mxu2 %v5709_v44  ;;  %v4291_v61 = vpack.c.b16 %v4286_v4, %v4285_v26  ;;  %v5720_v44 = vld [vmem:[%s10550_s2 + $0xd8] sm:$0xff]  ;;  %v3898_v54 = vpack.c.bf16 %v10087_v28, %v10087_v28 }
 0x35d   :  { %3915 = vst [vmem:[#allocation1 + $0x21] ss:$4 sm:$0xff] %v9513_v29  ;;  %5094 = vmatpush.bf16.msra.mxu3 %v5720_v44  ;;  %v5732_v4 = vld [vmem:[%s10550_s2 + $0x138] sm:$0xff] }
 0x35e   :  { %3917 = vst [vmem:[#allocation1 + $0x22] ss:$4 sm:$0xff] %v9532_v27  ;;  %5047 = vmatmul.bf16.gmra.mxu1 %v4269_v22  ;;  %v5719_v22 = vld [vmem:[%s10550_s2 + $0xd0] sm:$0xff]  ;;  %v4288_v10 = vunpack.c.l.b16 %v3898_v54  ;;  %5118 = vmatpush.bf16.msrb.mxu0 %v5732_v4  ;;  %v5729_v54 = vld [vmem:[%s10550_s2 + $0x120] sm:$0xff] }
 0x35f   :  { %3919 = vst [vmem:[#allocation1 + $0x23] ss:$4 sm:$0xff] %v9580_v52  ;;  %5070 = vmatmul.bf16.vlgmr.msra.gmra.mxu2 %v4290_v43  ;;  %v3841_v43 = vpack.c.bf16 %v10029_v30, %v10029_v30 }
 0x361   :  { %5095 = vmatpush.bf16.msra.mxu3 %v5719_v22  ;;  %v4267_v46 = vunpack.c.l.b16 %v3841_v43  ;;  %v5730_v22 = vld [vmem:[%s10550_s2 + $0x128] sm:$0xff] }
 0x362   :  { %v3882_v24 = vld.sshfl [vmem:[#allocation1] sm:$0xff pattern:$0x73625140] }
 0x363   :  { %3884 = vst [vmem:[#allocation1] ss:$4 sm:$0xff] %v11496_v55  ;;  %v3897_v7 = vpack.c.bf16 %v3882_v24, %v3882_v24  ;;  %v4271_v26 = vpack.c.b16 %v4267_v46, %v4267_v46 }
 0x365   :  { %v4287_v30 = vunpack.c.l.b16 %v3897_v7 }
 0x366   :  { %v3921_v2 = vld.sshfl [vmem:[#allocation1 + $0x20] sm:$0xff pattern:$0x73625140] }
 0x367   :  { %3926 = vst [vmem:[#allocation1 + $0x20] ss:$4 sm:$0xff] %v9617_v36  ;;  %v3952_v49 = vpack.c.bf16 %v3921_v2, %v3921_v2  ;;  %v4292_v41 = vpack.c.b16 %v4288_v10, %v4287_v30 }
 0x368   :  { %3927 = vst [vmem:[#allocation1 + $0x21] ss:$4 sm:$0xff] %v9624_v34 }
 0x369   :  { %3928 = vst [vmem:[#allocation1 + $0x22] ss:$4 sm:$0xff] %v9666_v20  ;;  %v4306_v2 = vunpack.c.l.b16 %v3952_v49 }
 0x36a   :  { %v10115_v47 = vld.sshfl [vmem:[#allocation1] sm:$0xff pattern:$0x73625140]  ;;  %3929 = vst [vmem:[#allocation1 + $0x23] ss:$4 sm:$0xff] %v9674_v56 }
 0x36b   :  { %3905 = vst [vmem:[#allocation1] ss:$4 sm:$0xff] %v11497_v57  ;;  %v5718_v57 = vld [vmem:[%s10550_s2 + $0xc8] sm:$0xff] }
 0x36c   :  { %3907 = vst [vmem:[#allocation1 + $0x1] ss:$4 sm:$0xff] %v9412_v37  ;;  %5096 = vmatpush.bf16.msra.mxu3 %v5718_v57 }
 0x36d   :  { %3909 = vst [vmem:[#allocation1 + $0x2] ss:$4 sm:$0xff] %v9430_v14 }
 0x36e   :  { %3911 = vst [vmem:[#allocation1 + $0x3] ss:$4 sm:$0xff] %v9487_v9  ;;  %5052 = vmatmul.bf16.gmra.mxu1 %v4270_v1 }
 0x36f   :  { %5075 = vmatmul.bf16.gmra.mxu2 %v4291_v61  ;;  %v5731_v61 = vld [vmem:[%s10550_s2 + $0x130] sm:$0xff] }
 0x370   :  { %5097 = vmatpush.bf16.msra.mxu3 %v5717_v15  ;;  %5119 = vmatpush.bf16.msrb.mxu0 %v5731_v61  ;;  %v5726_v15 = vld [vmem:[%s10550_s2 + $0x108] sm:$0xff] }
 0x371   :  { %v10134_v11 = vld.sshfl [vmem:[#allocation1 + $0x20] sm:$0xff pattern:$0x73625140] }
 0x372   :  { %3936 = vst [vmem:[#allocation1 + $0x20] ss:$4 sm:$0xff] %v11498_v8  ;;  %v3954_v7 = vpack.c.bf16 %v10134_v11, %v10134_v11  ;;  %v5728_v11 = vld [vmem:[%s10550_s2 + $0x118] sm:$0xff] }
 0x373   :  { %3937 = vst [vmem:[#allocation1 + $0x21] ss:$4 sm:$0xff] %v11499_v45 }
 0x374   :  { %3938 = vst [vmem:[#allocation1 + $0x22] ss:$4 sm:$0xff] %v9805_v33  ;;  %5120 = vmatpush.bf16.msrb.mxu0 %v5730_v22 }
 0x375   :  { %v3920_v13 = vld.sshfl [vmem:[#allocation1] sm:$0xff pattern:$0x73625140]  ;;  %3939 = vst [vmem:[#allocation1 + $0x23] ss:$4 sm:$0xff] %v11500_v39 }
 0x376   :  { %3922 = vst [vmem:[#allocation1] ss:$4 sm:$0xff] %v9584_v51  ;;  %v3951_v24 = vpack.c.bf16 %v3920_v13, %v3920_v13  ;;  %v3899_v13 = vpack.c.bf16 %v10115_v47, %v10115_v47  ;;  %v4308_v47 = vunpack.c.l.b16 %v3954_v7  ;;  %v5739_v7 = vld [vmem:[%s10550_s2 + $0x170] sm:$0xff] }
 0x377   :  { %3923 = vst [vmem:[#allocation1 + $0x1] ss:$4 sm:$0xff] %v9592_v31 }
 0x378   :  { %3924 = vst [vmem:[#allocation1 + $0x2] ss:$4 sm:$0xff] %v11501_v38  ;;  %v4305_v28 = vunpack.c.l.b16 %v3951_v24  ;;  %v4289_v57 = vunpack.c.l.b16 %v3899_v13  ;;  %5121 = vmatpush.bf16.msrb.mxu0 %v5729_v54  ;;  %v5738_v54 = vld [vmem:[%s10550_s2 + $0x168] sm:$0xff] }
 0x379   :  { %3925 = vst [vmem:[#allocation1 + $0x3] ss:$4 sm:$0xff] %v9607_v62 }
 0x37a   :  { %v4312_v19 = vpack.c.b16 %v4306_v2, %v4305_v28  ;;  %v4293_v24 = vpack.c.b16 %v4289_v57, %v4289_v57 }
 0x37c   :  { %v10152_v18 = vld.sshfl [vmem:[#allocation1 + $0x20] sm:$0xff pattern:$0x73625140]  ;;  %5098 = vmatmul.bf16.vlgmr.msra.gmra.mxu3 %v4312_v19  ;;  %5122 = vmatpush.bf16.msrb.mxu0 %v5728_v11 }
 0x37d   :  { %3967 = vst [vmem:[#allocation1 + $0x20] ss:$4 sm:$0xff] %v9965_v0  ;;  %v5725_v19 = vld [vmem:[%s10550_s2 + $0x100] sm:$0xff] }
 0x37e   :  { %3969 = vst [vmem:[#allocation1 + $0x21] ss:$4 sm:$0xff] %v9532_v27  ;;  %5057 = vmatmul.bf16.gmra.mxu1 %v4271_v26  ;;  %v3956_v26 = vpack.c.bf16 %v10152_v18, %v10152_v18  ;;  %v5737_v11 = vld [vmem:[%s10550_s2 + $0x160] sm:$0xff] }
 0x37f   :  { %3971 = vst [vmem:[#allocation1 + $0x22] ss:$4 sm:$0xff] %v9580_v52  ;;  %5080 = vmatmul.bf16.gmra.mxu2 %v4292_v41 }
 0x380   :  { %v3930_v16 = vld.sshfl [vmem:[#allocation1] sm:$0xff pattern:$0x73625140]  ;;  %3973 = vst [vmem:[#allocation1 + $0x23] ss:$4 sm:$0xff] %v9584_v51  ;;  %v4310_v18 = vunpack.c.l.b16 %v3956_v26  ;;  %v5735_v26 = vld [vmem:[%s10550_s2 + $0x150] sm:$0xff] }
 0x381   :  { %3932 = vst [vmem:[#allocation1] ss:$4 sm:$0xff] %v9698_v50  ;;  %v3953_v43 = vpack.c.bf16 %v3930_v16, %v3930_v16 }
 0x382   :  { %3933 = vst [vmem:[#allocation1 + $0x1] ss:$4 sm:$0xff] %v9700_v48 }
 0x383   :  { %3934 = vst [vmem:[#allocation1 + $0x2] ss:$4 sm:$0xff] %v9708_v60  ;;  %v4307_v49 = vunpack.c.l.b16 %v3953_v43  ;;  %v5740_v43 = vld [vmem:[%s10550_s2 + $0x178] sm:$0xff] }
 0x384   :  { %3935 = vst [vmem:[#allocation1 + $0x3] ss:$4 sm:$0xff] %v9725_v12  ;;  %5146 = vmatpush.bf16.msra.mxu1 %v5740_v43  ;;  %v5746_v43 = vld [vmem:[%s10550_s2 + $0x1a8] sm:$0xff] }
 0x385   :  { %v4313_v16 = vpack.c.b16 %v4308_v47, %v4307_v49 }
 0x387   :  { %v3975_v1 = vld.sshfl [vmem:[#allocation1 + $0x20] sm:$0xff pattern:$0x73625140] }
 0x388   :  { %3980 = vst [vmem:[#allocation1 + $0x20] ss:$4 sm:$0xff] %v9624_v34  ;;  %v4006_v28 = vpack.c.bf16 %v3975_v1, %v3975_v1  ;;  %5147 = vmatpush.bf16.msra.mxu1 %v5739_v7  ;;  %v5733_v7 = vld [vmem:[%s10550_s2 + $0x140] sm:$0xff] }
 0x389   :  { %3981 = vst [vmem:[#allocation1 + $0x21] ss:$4 sm:$0xff] %v9666_v20 }
 0x38a   :  { %3982 = vst [vmem:[#allocation1 + $0x22] ss:$4 sm:$0xff] %v9997_v3 }
 0x38b   :  { %v3940_v44 = vld.sshfl [vmem:[#allocation1] sm:$0xff pattern:$0x73625140]  ;;  %3983 = vst [vmem:[#allocation1 + $0x23] ss:$4 sm:$0xff] %v9698_v50 }
 0x38c   :  { %3942 = vst [vmem:[#allocation1] ss:$4 sm:$0xff] %v9834_v42  ;;  %5103 = vmatmul.bf16.gmra.mxu3 %v4313_v16  ;;  %v3955_v10 = vpack.c.bf16 %v3940_v44, %v3940_v44  ;;  %v4328_v44 = vunpack.c.l.b16 %v4006_v28  ;;  %5148 = vmatpush.bf16.msra.mxu1 %v5738_v54 }
 0x38e   :  { %v4309_v4 = vunpack.c.l.b16 %v3955_v10 }
 0x38f   :  { %5085 = vmatmul.bf16.gmra.mxu2 %v4293_v24 }
 0x390   :  { %v4314_v22 = vpack.c.b16 %v4310_v18, %v4309_v4  ;;  %5149 = vmatpush.bf16.msra.mxu1 %v5737_v11  ;;  %v5747_v4 = vld [vmem:[%s10550_s2 + $0x1b0] sm:$0xff] }
 0x392   :  { %v10191_v46 = vld.sshfl [vmem:[#allocation1 + $0x20] sm:$0xff pattern:$0x73625140] }
 0x393   :  { %v10193_v30 = vld.sshfl [vmem:[#allocation1] sm:$0xff pattern:$0x73625140]  ;;  %3990 = vst [vmem:[#allocation1 + $0x20] ss:$4 sm:$0xff] %v11499_v45  ;;  %v4008_v24 = vpack.c.bf16 %v10191_v46, %v10191_v46 }
 0x394   :  { %3959 = vst [vmem:[#allocation1] ss:$4 sm:$0xff] %v9412_v37  ;;  %v5727_v37 = vld [vmem:[%s10550_s2 + $0x110] sm:$0xff]  ;;  %v3957_v49 = vpack.c.bf16 %v10193_v30, %v10193_v30 }
 0x395   :  { %3961 = vst [vmem:[#allocation1 + $0x1] ss:$4 sm:$0xff] %v9430_v14  ;;  %5123 = vmatpush.bf16.msrb.mxu0 %v5727_v37  ;;  %v4330_v37 = vunpack.c.l.b16 %v4008_v24 }
 0x396   :  { %3963 = vst [vmem:[#allocation1 + $0x2] ss:$4 sm:$0xff] %v9487_v9  ;;  %v4311_v30 = vunpack.c.l.b16 %v3957_v49 }
 0x397   :  { %3965 = vst [vmem:[#allocation1 + $0x3] ss:$4 sm:$0xff] %v9503_v40 }
 0x398   :  { %3991 = vst [vmem:[#allocation1 + $0x21] ss:$4 sm:$0xff] %v9805_v33  ;;  %v4315_v28 = vpack.c.b16 %v4311_v30, %v4311_v30 }
 0x399   :  { %3992 = vst [vmem:[#allocation1 + $0x22] ss:$4 sm:$0xff] %v11500_v39  ;;  %5124 = vmatpush.bf16.msrb.mxu0 %v5726_v15 }
 0x39a   :  { %3993 = vst [vmem:[#allocation1 + $0x23] ss:$4 sm:$0xff] %v9834_v42 }
 0x39c   :  { %5108 = vmatmul.bf16.gmra.mxu3 %v4314_v22 }
 0x39d   :  { %5125 = vmatpush.bf16.msrb.mxu0 %v5725_v19 }
 0x39e   :  { %v3974_v2 = vld.sshfl [vmem:[#allocation1] sm:$0xff pattern:$0x73625140] }
 0x39f   :  { %3976 = vst [vmem:[#allocation1] ss:$4 sm:$0xff] %v9592_v31  ;;  %v4005_v41 = vpack.c.bf16 %v3974_v2, %v3974_v2  ;;  %v5736_v2 = vld [vmem:[%s10550_s2 + $0x158] sm:$0xff] }
 0x3a0   :  { %3977 = vst [vmem:[#allocation1 + $0x1] ss:$4 sm:$0xff] %v9954_v53  ;;  %5150 = vmatpush.bf16.msra.mxu1 %v5736_v2  ;;  %v5742_v2 = vld [vmem:[%s10550_s2 + $0x188] sm:$0xff] }
 0x3a1   :  { %3978 = vst [vmem:[#allocation1 + $0x2] ss:$4 sm:$0xff] %v9607_v62  ;;  %v10220_v61 = vld.sshfl [vmem:[#allocation1 + $0x20] sm:$0xff pattern:$0x73625140]  ;;  %v4327_v1 = vunpack.c.l.b16 %v4005_v41  ;;  %v5748_v41 = vld [vmem:[%s10550_s2 + $0x1b8] sm:$0xff] }
 0x3a2   :  { %3979 = vst [vmem:[#allocation1 + $0x3] ss:$4 sm:$0xff] %v9617_v36  ;;  %5174 = vmatpush.bf16.msrb.mxu2 %v5748_v41  ;;  %v4010_v22 = vpack.c.bf16 %v10220_v61, %v10220_v61  ;;  %v5755_v61 = vld [vmem:[%s10550_s2 + $0x1f0] sm:$0xff] }
 0x3a3   :  { %4021 = vst [vmem:[#allocation1 + $0x20] ss:$4 sm:$0xff] %v11495_v59  ;;  %v4334_v13 = vpack.c.b16 %v4328_v44, %v4327_v1  ;;  %v5734_v44 = vld [vmem:[%s10550_s2 + $0x148] sm:$0xff] }
 0x3a4   :  { %4023 = vst [vmem:[#allocation1 + $0x21] ss:$4 sm:$0xff] %v9580_v52  ;;  %v10253_v15 = vpop.f32.mrf.mxu1  ;;  %5151 = vmatpush.bf16.msra.mxu1 %v5735_v26 }
 0x3a5   :  { %4025 = vst [vmem:[#allocation1 + $0x22] ss:$4 sm:$0xff] %v9584_v51  ;;  %5126 = vmatmul.bf16.vlgmr.msrb.gmra.mxu0 %v4334_v13 }
 0x3a6   :  { %4027 = vst [vmem:[#allocation1 + $0x23] ss:$4 sm:$0xff] %v9592_v31  ;;  %5175 = vmatpush.bf16.msrb.mxu2 %v5747_v4  ;;  %v5741_v4 = vld [vmem:[%s10550_s2 + $0x180] sm:$0xff] }
 0x3a8   :  { %5152 = vmatpush.bf16.msra.mxu1 %v5734_v44 }
 0x3a9   :  { %v3984_v59 = vld.sshfl [vmem:[#allocation1] sm:$0xff pattern:$0x73625140] }
 0x3aa   :  { %3986 = vst [vmem:[#allocation1] ss:$4 sm:$0xff] %v9700_v48  ;;  %v4007_v57 = vpack.c.bf16 %v3984_v59, %v3984_v59  ;;  %v5756_v59 = vld [vmem:[%s10550_s2 + $0x1f8] sm:$0xff]  ;;  %5176 = vmatpush.bf16.msrb.mxu2 %v5746_v43 }
 0x3ab   :  { %3987 = vst [vmem:[#allocation1 + $0x1] ss:$4 sm:$0xff] %v9708_v60  ;;  %5202 = vmatpush.bf16.msrb.mxu3 %v5756_v59 }
 0x3ac   :  { %3988 = vst [vmem:[#allocation1 + $0x2] ss:$4 sm:$0xff] %v9725_v12  ;;  %v4329_v16 = vunpack.c.l.b16 %v4007_v57  ;;  %5113 = vmatmul.bf16.gmra.mxu3 %v4315_v28  ;;  %v10272_v1 = vpop.f32.mrf.mxu1  ;;  %v5745_v57 = vld [vmem:[%s10550_s2 + $0x1a0] sm:$0xff]  ;;  %5153 = vmatpush.bf16.msra.mxu1 %v5733_v7 }
 0x3ad   :  { %3989 = vst [vmem:[#allocation1 + $0x3] ss:$4 sm:$0xff] %v9742_v5  ;;  %v10242_v47 = vld.sshfl [vmem:[#allocation1 + $0x20] sm:$0xff pattern:$0x73625140] }
 0x3ae   :  { %4034 = vst [vmem:[#allocation1 + $0x20] ss:$4 sm:$0xff] %v9666_v20  ;;  %v4335_v46 = vpack.c.b16 %v4330_v37, %v4329_v16  ;;  %5177 = vmatpush.bf16.msrb.mxu2 %v5745_v57  ;;  %v4060_v24 = vpack.c.bf16 %v10242_v47, %v10242_v47  ;;  %v5753_v57 = vld [vmem:[%s10550_s2 + $0x1e0] sm:$0xff] }
 0x3af   :  { %4035 = vst [vmem:[#allocation1 + $0x21] ss:$4 sm:$0xff] %v9997_v3  ;;  %5203 = vmatpush.bf16.msrb.mxu3 %v5755_v61 }
 0x3b0   :  { %4036 = vst [vmem:[#allocation1 + $0x22] ss:$4 sm:$0xff] %v9647_v23  ;;  %v4350_v37 = vunpack.c.l.b16 %v4060_v24  ;;  %v11502_v24 = vmax.f32 %v9870_v35, %v9880_v17 }
 0x3b1   :  { %4037 = vst [vmem:[#allocation1 + $0x23] ss:$4 sm:$0xff] %v9700_v48 }
 0x3b4   :  { %v3994_v10 = vld.sshfl [vmem:[#allocation1] sm:$0xff pattern:$0x73625140]  ;;  %v10300_v54 = vpop.f32.mrf.mxu1 }
 0x3b5   :  { %3996 = vst [vmem:[#allocation1] ss:$4 sm:$0xff] %v9850_v21  ;;  %5131 = vmatmul.bf16.gmra.mxu0 %v4335_v46  ;;  %v4009_v18 = vpack.c.bf16 %v3994_v10, %v3994_v10  ;;  %v5015_v10 = vpop.f32.mrf.mxu0 }
 0x3b8   :  { %v10265_v19 = vld.sshfl [vmem:[#allocation1 + $0x20] sm:$0xff pattern:$0x73625140] }
 0x3b9   :  { %4044 = vst [vmem:[#allocation1 + $0x20] ss:$4 sm:$0xff] %v9805_v33  ;;  %v4062_v59 = vpack.c.bf16 %v10265_v19, %v10265_v19 }
 0x3ba   :  { %4045 = vst [vmem:[#allocation1 + $0x21] ss:$4 sm:$0xff] %v11500_v39 }
 0x3bb   :  { %4046 = vst [vmem:[#allocation1 + $0x22] ss:$4 sm:$0xff] %v9834_v42 }
 0x3bc   :  { %v3997_v13 = vld.sshfl [vmem:[#allocation1] sm:$0xff pattern:$0x73625140]  ;;  %4047 = vst [vmem:[#allocation1 + $0x23] ss:$4 sm:$0xff] %v9850_v21  ;;  %v5032_v46 = vpop.f32.mrf.mxu1 }
 0x3bd   :  { %4013 = vst [vmem:[#allocation1] ss:$4 sm:$0xff] %v9430_v14  ;;  %v4331_v14 = vunpack.c.l.b16 %v4009_v18  ;;  %v4011_v47 = vpack.c.bf16 %v3997_v13, %v3997_v13  ;;  %v5017_v7 = vpop.f32.mrf.mxu0 }
 0x3be   :  { %4015 = vst [vmem:[#allocation1 + $0x1] ss:$4 sm:$0xff] %v9487_v9  ;;  %v4332_v9 = vunpack.c.l.b16 %v4010_v22 }
 0x3bf   :  { %4017 = vst [vmem:[#allocation1 + $0x2] ss:$4 sm:$0xff] %v9503_v40  ;;  %v4333_v41 = vunpack.c.l.b16 %v4011_v47 }
 0x3c0   :  { %4019 = vst [vmem:[#allocation1 + $0x3] ss:$4 sm:$0xff] %v9965_v0  ;;  %v4336_v40 = vpack.c.b16 %v4332_v9, %v4331_v14  ;;  %v5744_v0 = vld [vmem:[%s10550_s2 + $0x198] sm:$0xff]  ;;  %v5754_v14 = vld [vmem:[%s10550_s2 + $0x1e8] sm:$0xff]  ;;  %v5763_v9 = vld [vmem:[%s10550_s2 + $0x230] sm:$0xff] }
 0x3c1   :  { %5178 = vmatpush.bf16.msrb.mxu2 %v5744_v0  ;;  %v4337_v22 = vpack.c.b16 %v4333_v41, %v4333_v41  ;;  %5204 = vmatpush.bf16.msrb.mxu3 %v5754_v14 }
 0x3c3   :  { %v10302_v49 = vld.sshfl [vmem:[#allocation1 + $0x20] sm:$0xff pattern:$0x73625140] }
 0x3c4   :  { %4079 = vst [vmem:[#allocation1 + $0x20] ss:$4 sm:$0xff] %v9592_v31 }
 0x3c5   :  { %4081 = vst [vmem:[#allocation1 + $0x21] ss:$4 sm:$0xff] %v11501_v38  ;;  %5136 = vmatmul.bf16.gmra.mxu0 %v4336_v40  ;;  %v5743_v38 = vld [vmem:[%s10550_s2 + $0x190] sm:$0xff]  ;;  %v4352_v40 = vunpack.c.l.b16 %v4062_v59  ;;  %5205 = vmatpush.bf16.msrb.mxu3 %v5753_v57  ;;  %v5750_v59 = vld [vmem:[%s10550_s2 + $0x1c8] sm:$0xff]  ;;  %v5749_v57 = vld [vmem:[%s10550_s2 + $0x1c0] sm:$0xff] }
 0x3c6   :  { %4083 = vst [vmem:[#allocation1 + $0x22] ss:$4 sm:$0xff] %v9607_v62  ;;  %5179 = vmatpush.bf16.msrb.mxu2 %v5743_v38 }
 0x3c7   :  { %v4028_v16 = vld.sshfl [vmem:[#allocation1] sm:$0xff pattern:$0x73625140]  ;;  %4085 = vst [vmem:[#allocation1 + $0x23] ss:$4 sm:$0xff] %v9617_v36 }
 0x3c8   :  { %4030 = vst [vmem:[#allocation1] ss:$4 sm:$0xff] %v9954_v53  ;;  %v4059_v11 = vpack.c.bf16 %v4028_v16, %v4028_v16 }
 0x3c9   :  { %4031 = vst [vmem:[#allocation1 + $0x1] ss:$4 sm:$0xff] %v9557_v25 }
 0x3ca   :  { %4033 = vst [vmem:[#allocation1 + $0x3] ss:$4 sm:$0xff] %v9624_v34  ;;  %v4349_v30 = vunpack.c.l.b16 %v4059_v11  ;;  %5180 = vmatpush.bf16.msrb.mxu2 %v5742_v2  ;;  %v5752_v2 = vld [vmem:[%s10550_s2 + $0x1d8] sm:$0xff] }
 0x3cb   :  { %4032 = vst [vmem:[#allocation1 + $0x2] ss:$4 sm:$0xff] %v9617_v36  ;;  %v5043_v18 = vpop.f32.mrf.mxu1  ;;  %5206 = vmatpush.bf16.msrb.mxu3 %v5752_v2 }
 0x3cc   :  { %v4356_v28 = vpack.c.b16 %v4350_v37, %v4349_v30  ;;  %v5044_v13 = vadd.f32 %v5043_v18, %v5015_v10  ;;  %v5020_v30 = vpop.f32.mrf.mxu0  ;;  %v4064_v10 = vpack.c.bf16 %v10302_v49, %v10302_v49  ;;  %v5761_v49 = vld [vmem:[%s10550_s2 + $0x220] sm:$0xff] }
 0x3ce   :  { %5154 = vmatmul.bf16.vlgmr.msra.gmra.mxu1 %v4356_v28  ;;  %v10323_v26 = vld.sshfl [vmem:[#allocation1 + $0x20] sm:$0xff pattern:$0x73625140]  ;;  %5181 = vmatpush.bf16.msrb.mxu2 %v5741_v4  ;;  %v5762_v28 = vld [vmem:[%s10550_s2 + $0x228] sm:$0xff] }
 0x3cf   :  { %4092 = vst [vmem:[#allocation1 + $0x20] ss:$4 sm:$0xff] %v9700_v48 }
 0x3d0   :  { %4093 = vst [vmem:[#allocation1 + $0x21] ss:$4 sm:$0xff] %v9708_v60 }
 0x3d1   :  { %4094 = vst [vmem:[#allocation1 + $0x22] ss:$4 sm:$0xff] %v9725_v12 }
 0x3d2   :  { %v4038_v44 = vld.sshfl [vmem:[#allocation1] sm:$0xff pattern:$0x73625140]  ;;  %4095 = vst [vmem:[#allocation1 + $0x23] ss:$4 sm:$0xff] %v11498_v8  ;;  %v5764_v8 = vld [vmem:[%s10550_s2 + $0x238] sm:$0xff] }
 0x3d3   :  { %4040 = vst [vmem:[#allocation1] ss:$4 sm:$0xff] %v9708_v60  ;;  %v4061_v43 = vpack.c.bf16 %v4038_v44, %v4038_v44  ;;  %5230 = vmatpush.bf16.msra.mxu0 %v5764_v8  ;;  %v5045_v0 = vpop.f32.mrf.mxu1  ;;  %5773 = vmatpush.bf16.msra.mxu2 %v5764_v8  ;;  %v4118_v8 = vpack.c.bf16 %v10323_v26, %v10323_v26 }
 0x3d4   :  { %4041 = vst [vmem:[#allocation1 + $0x1] ss:$4 sm:$0xff] %v9725_v12  ;;  %v5046_v16 = vadd.f32 %v5045_v0, %v5017_v7  ;;  %v5022_v18 = vpop.f32.mrf.mxu0 }
 0x3d5   :  { %4042 = vst [vmem:[#allocation1 + $0x2] ss:$4 sm:$0xff] %v9742_v5  ;;  %5141 = vmatmul.bf16.gmra.mxu0 %v4337_v22  ;;  %v4351_v61 = vunpack.c.l.b16 %v4061_v43  ;;  %v4354_v22 = vunpack.c.l.b16 %v4064_v10 }
 0x3d6   :  { %4043 = vst [vmem:[#allocation1 + $0x3] ss:$4 sm:$0xff] %v11496_v55 }
 0x3d7   :  { %v4357_v11 = vpack.c.b16 %v4352_v40, %v4351_v61  ;;  %5231 = vmatpush.bf16.msra.mxu0 %v5763_v9  ;;  %5774 = vmatpush.bf16.msra.mxu2 %v5763_v9 }
 0x3d9   :  { %v10350_v19 = vld.sshfl [vmem:[#allocation1 + $0x20] sm:$0xff pattern:$0x73625140] }
 0x3da   :  { %4102 = vst [vmem:[#allocation1 + $0x20] ss:$4 sm:$0xff] %v11502_v24  ;;  %v4372_v24 = vunpack.c.l.b16 %v4118_v8  ;;  %v4120_v2 = vpack.c.bf16 %v10350_v19, %v10350_v19  ;;  %v5759_v19 = vld [vmem:[%s10550_s2 + $0x210] sm:$0xff] }
 0x3db   :  { %4103 = vst [vmem:[#allocation1 + $0x21] ss:$4 sm:$0xff] %v9900_v63  ;;  %v5048_v37 = vpop.f32.mrf.mxu1  ;;  %5232 = vmatpush.bf16.msra.mxu0 %v5762_v28  ;;  %5775 = vmatpush.bf16.msra.mxu2 %v5762_v28 }
 0x3dc   :  { %4104 = vst [vmem:[#allocation1 + $0x22] ss:$4 sm:$0xff] %v9920_v6  ;;  %v5049_v35 = vadd.f32 %v5048_v37, %v5020_v30 }
 0x3dd   :  { %v4048_v38 = vld.sshfl [vmem:[#allocation1] sm:$0xff pattern:$0x73625140]  ;;  %4105 = vst [vmem:[#allocation1 + $0x23] ss:$4 sm:$0xff] %v9933_v32 }
 0x3de   :  { %5159 = vmatmul.bf16.gmra.mxu1 %v4357_v11  ;;  %4050 = vst [vmem:[#allocation1] ss:$4 sm:$0xff] %v9868_v58  ;;  %v4063_v17 = vpack.c.bf16 %v4048_v38, %v4048_v38 }
 0x3df   :  { %5233 = vmatpush.bf16.msra.mxu0 %v5761_v49  ;;  %5776 = vmatpush.bf16.msra.mxu2 %v5761_v49  ;;  %v4374_v49 = vunpack.c.l.b16 %v4120_v2 }
 0x3e0   :  { %v4353_v41 = vunpack.c.l.b16 %v4063_v17 }
 0x3e2   :  { %v5071_v4 = vpop.f32.mrf.mxu2 }
 0x3e3   :  { %v10374_v44 = vadd.f32 %v5071_v4, %v5044_v13  ;;  %v5050_v43 = vpop.f32.mrf.mxu1  ;;  %v4358_v13 = vpack.c.b16 %v4354_v22, %v4353_v41  ;;  %v11503_v22 = vld [vmem:[#allocation20_spill] sm:$0xff] }
 0x3e4   :  { %v10359_v46 = vld.sshfl [vmem:[#allocation1 + $0x20] sm:$0xff pattern:$0x73625140]  ;;  %v5051_v7 = vadd.f32 %v5050_v43, %v5022_v18 }
 0x3e5   :  { %v4051_v47 = vld.sshfl [vmem:[#allocation1] sm:$0xff pattern:$0x73625140]  ;;  %4133 = vst [vmem:[#allocation1 + $0x20] ss:$4 sm:$0xff] %v9954_v53 }
 0x3e6   :  { %4071 = vst [vmem:[#allocation1] ss:$4 sm:$0xff] %v9513_v29  ;;  %v5751_v29 = vld [vmem:[%s10550_s2 + $0x1d0] sm:$0xff] }
 0x3e7   :  { %4073 = vst [vmem:[#allocation1 + $0x1] ss:$4 sm:$0xff] %v9532_v27  ;;  %5207 = vmatpush.bf16.msrb.mxu3 %v5751_v29 }
 0x3e8   :  { %4075 = vst [vmem:[#allocation1 + $0x2] ss:$4 sm:$0xff] %v9580_v52 }
 0x3e9   :  { %4077 = vst [vmem:[#allocation1 + $0x3] ss:$4 sm:$0xff] %v9584_v51 }
 0x3ea   :  { %4135 = vst [vmem:[#allocation1 + $0x21] ss:$4 sm:$0xff] %v9607_v62  ;;  %v5073_v62 = vpop.f32.mrf.mxu2 }
 0x3eb   :  { %4137 = vst [vmem:[#allocation1 + $0x22] ss:$4 sm:$0xff] %v9617_v36  ;;  %v10391_v9 = vadd.f32 %v5073_v62, %v5046_v16  ;;  %5208 = vmatpush.bf16.msrb.mxu3 %v5750_v59  ;;  %v5053_v40 = vpop.f32.mrf.mxu1  ;;  %v4065_v16 = vpack.c.bf16 %v4051_v47, %v4051_v47 }
 0x3ec   :  { %4139 = vst [vmem:[#allocation1 + $0x23] ss:$4 sm:$0xff] %v9624_v34  ;;  %v5054_v26 = vadd.f32 %v5053_v40, %v10253_v15 }
 0x3ed   :  { %v4355_v30 = vunpack.c.l.b16 %v4065_v16 }
 0x3ee   :  { %5164 = vmatmul.bf16.gmra.mxu1 %v4358_v13 }
 0x3ef   :  { %5209 = vmatpush.bf16.msrb.mxu3 %v5749_v57  ;;  %v4359_v47 = vpack.c.b16 %v4355_v30, %v4355_v30  ;;  %v4122_v57 = vpack.c.bf16 %v10359_v46, %v10359_v46 }
 0x3f0   :  { %v4086_v14 = vld.sshfl [vmem:[#allocation1] sm:$0xff pattern:$0x73625140] }
 0x3f1   :  { %v4117_v61 = vpack.c.bf16 %v4086_v14, %v4086_v14  ;;  %4088 = vst [vmem:[#allocation1] ss:$4 sm:$0xff] %v9624_v34  ;;  %v4376_v46 = vunpack.c.l.b16 %v4122_v57 }
 0x3f2   :  { %4089 = vst [vmem:[#allocation1 + $0x1] ss:$4 sm:$0xff] %v9666_v20  ;;  %v5076_v37 = vpop.f32.mrf.mxu2 }
 0x3f3   :  { %v4371_v0 = vunpack.c.l.b16 %v4117_v61  ;;  %4090 = vst [vmem:[#allocation1 + $0x2] ss:$4 sm:$0xff] %v9674_v56  ;;  %v10399_v11 = vld.sshfl [vmem:[#allocation1 + $0x20] sm:$0xff pattern:$0x73625140]  ;;  %v10406_v56 = vadd.f32 %v5076_v37, %v5049_v35  ;;  %v5055_v15 = vpop.f32.mrf.mxu1 }
 0x3f4   :  { %4091 = vst [vmem:[#allocation1 + $0x3] ss:$4 sm:$0xff] %v9698_v50  ;;  %v5056_v10 = vadd.f32 %v5055_v15, %v10272_v1  ;;  %v5760_v1 = vld [vmem:[%s10550_s2 + $0x218] sm:$0xff] }
 0x3f5   :  { %v4378_v38 = vpack.c.b16 %v4372_v24, %v4371_v0  ;;  %4146 = vst [vmem:[#allocation1 + $0x20] ss:$4 sm:$0xff] %v9708_v60  ;;  %5234 = vmatpush.bf16.msra.mxu0 %v5760_v1  ;;  %5777 = vmatpush.bf16.msra.mxu2 %v5760_v1  ;;  %v11504_v1 = vld [vmem:[#allocation43_spill] sm:$0xff] }
 0x3f6   :  { %4147 = vst [vmem:[#allocation1 + $0x21] ss:$4 sm:$0xff] %v9725_v12 }
 0x3f7   :  { %5182 = vmatmul.bf16.vlgmr.msrb.gmra.mxu2 %v4378_v38  ;;  %4148 = vst [vmem:[#allocation1 + $0x22] ss:$4 sm:$0xff] %v9742_v5 }
 0x3f8   :  { %4149 = vst [vmem:[#allocation1 + $0x23] ss:$4 sm:$0xff] %v11499_v45 }
 0x3f9   :  { %5235 = vmatpush.bf16.msra.mxu0 %v5759_v19  ;;  %5778 = vmatpush.bf16.msra.mxu2 %v5759_v19 }
 0x3fa   :  { %v5078_v41 = vpop.f32.mrf.mxu2 }
 0x3fb   :  { %v4096_v17 = vld.sshfl [vmem:[#allocation1] sm:$0xff pattern:$0x73625140]  ;;  %v10421_v4 = vadd.f32 %v5078_v41, %v5051_v7  ;;  %v5058_v29 = vpop.f32.mrf.mxu1 }
 0x3fc   :  { %4098 = vst [vmem:[#allocation1] ss:$4 sm:$0xff] %v11499_v45  ;;  %v4119_v28 = vpack.c.bf16 %v4096_v17, %v4096_v17  ;;  %v5059_v18 = vadd.f32 %v5058_v29, %v10300_v54 }
 0x3fd   :  { %4099 = vst [vmem:[#allocation1 + $0x1] ss:$4 sm:$0xff] %v9805_v33 }
 0x3fe   :  { %5169 = vmatmul.bf16.gmra.mxu1 %v4359_v47  ;;  %4100 = vst [vmem:[#allocation1 + $0x2] ss:$4 sm:$0xff] %v11500_v39  ;;  %v4373_v45 = vunpack.c.l.b16 %v4119_v28 }
 0x3ff   :  { %4101 = vst [vmem:[#allocation1 + $0x3] ss:$4 sm:$0xff] %v9834_v42  ;;  %v10415_v35 = vld.sshfl [vmem:[#allocation1 + $0x20] sm:$0xff pattern:$0x73625140]  ;;  %v5099_v59 = vpop.f32.mrf.mxu3 }
 0x400   :  { %4156 = vst [vmem:[#allocation1 + $0x20] ss:$4 sm:$0xff] %v9900_v63  ;;  %v4379_v63 = vpack.c.b16 %v4374_v49, %v4373_v45  ;;  %v5100_v8 = vadd.f32 %v5099_v59, %v10374_v44 }
 0x401   :  { %4157 = vst [vmem:[#allocation1 + $0x21] ss:$4 sm:$0xff] %v9920_v6 }
 0x402   :  { %4158 = vst [vmem:[#allocation1 + $0x22] ss:$4 sm:$0xff] %v9933_v32  ;;  %v5081_v7 = vpop.f32.mrf.mxu2 }
 0x403   :  { %4159 = vst [vmem:[#allocation1 + $0x23] ss:$4 sm:$0xff] %v11503_v22  ;;  %v10431_v13 = vadd.f32 %v5081_v7, %v5054_v26  ;;  %v5060_v14 = vpop.f32.mrf.mxu1 }
 0x406   :  { %v4106_v43 = vld.sshfl [vmem:[#allocation1] sm:$0xff pattern:$0x73625140] }
 0x407   :  { %5187 = vmatmul.bf16.gmra.mxu2 %v4379_v63  ;;  %4108 = vst [vmem:[#allocation1] ss:$4 sm:$0xff] %v11503_v22  ;;  %v4121_v54 = vpack.c.bf16 %v4106_v43, %v4106_v43 }
 0x409   :  { %v4375_v40 = vunpack.c.l.b16 %v4121_v54 }
 0x40a   :  { %v10434_v62 = vld.sshfl [vmem:[#allocation1 + $0x20] sm:$0xff pattern:$0x73625140]  ;;  %v5083_v44 = vpop.f32.mrf.mxu2 }
 0x40b   :  { %4187 = vst [vmem:[#allocation1 + $0x20] ss:$4 sm:$0xff] %v9557_v25  ;;  %v5758_v25 = vld [vmem:[%s10550_s2 + $0x208] sm:$0xff]  ;;  %v4380_v24 = vpack.c.b16 %v4376_v46, %v4375_v40  ;;  %v4176_v54 = vpack.c.bf16 %v10434_v62, %v10434_v62 }
 0x40c   :  { %4189 = vst [vmem:[#allocation1 + $0x21] ss:$4 sm:$0xff] %v9617_v36  ;;  %v10448_v36 = vadd.f32 %v5083_v44, %v5056_v10  ;;  %5236 = vmatpush.bf16.msra.mxu0 %v5758_v25  ;;  %5779 = vmatpush.bf16.msra.mxu2 %v5758_v25 }
 0x40d   :  { %4191 = vst [vmem:[#allocation1 + $0x22] ss:$4 sm:$0xff] %v9624_v34  ;;  %v5101_v34 = vpop.f32.mrf.mxu3  ;;  %v4398_v40 = vunpack.c.l.b16 %v4176_v54 }
 0x40e   :  { %v4109_v61 = vld.sshfl [vmem:[#allocation1] sm:$0xff pattern:$0x73625140]  ;;  %4193 = vst [vmem:[#allocation1 + $0x23] ss:$4 sm:$0xff] %v9666_v20  ;;  %v5102_v0 = vadd.f32 %v5101_v34, %v10391_v9  ;;  %v4172_v9 = vpack.c.bf16 %v10399_v11, %v10399_v11 }
 0x40f   :  { %4125 = vst [vmem:[#allocation1] ss:$4 sm:$0xff] %v9532_v27  ;;  %v5757_v27 = vld [vmem:[%s10550_s2 + $0x200] sm:$0xff]  ;;  %v4123_v11 = vpack.c.bf16 %v4109_v61, %v4109_v61 }
 0x410   :  { %4127 = vst [vmem:[#allocation1 + $0x1] ss:$4 sm:$0xff] %v9580_v52  ;;  %5237 = vmatpush.bf16.msra.mxu0 %v5757_v27  ;;  %5780 = vmatpush.bf16.msra.mxu2 %v5757_v27 }
 0x411   :  { %4129 = vst [vmem:[#allocation1 + $0x2] ss:$4 sm:$0xff] %v9584_v51  ;;  %v4377_v28 = vunpack.c.l.b16 %v4123_v11 }
 0x412   :  { %4131 = vst [vmem:[#allocation1 + $0x3] ss:$4 sm:$0xff] %v9592_v31  ;;  %v5086_v16 = vpop.f32.mrf.mxu2 }
 0x413   :  { %v5087_v30 = vadd.f32 %v5086_v16, %v5059_v18  ;;  %v4381_v45 = vpack.c.b16 %v4377_v28, %v4377_v28 }
 0x415   :  { %v10455_v26 = vld.sshfl [vmem:[#allocation1 + $0x20] sm:$0xff pattern:$0x73625140]  ;;  %v5104_v37 = vpop.f32.mrf.mxu3 }
 0x416   :  { %4200 = vst [vmem:[#allocation1 + $0x20] ss:$4 sm:$0xff] %v9725_v12  ;;  %v5105_v12 = vadd.f32 %v5104_v37, %v10406_v56  ;;  %v4226_v34 = vpack.c.bf16 %v10455_v26, %v10455_v26 }
 0x417   :  { %5192 = vmatmul.bf16.gmra.mxu2 %v4380_v24  ;;  %4201 = vst [vmem:[#allocation1 + $0x21] ss:$4 sm:$0xff] %v9742_v5  ;;  %v4394_v5 = vunpack.c.l.b16 %v4172_v9 }
 0x418   :  { %4202 = vst [vmem:[#allocation1 + $0x22] ss:$4 sm:$0xff] %v11496_v55 }
 0x419   :  { %v4140_v38 = vld.sshfl [vmem:[#allocation1] sm:$0xff pattern:$0x73625140]  ;;  %4203 = vst [vmem:[#allocation1 + $0x23] ss:$4 sm:$0xff] %v9805_v33 }
 0x41a   :  { %v4171_v15 = vpack.c.bf16 %v4140_v38, %v4140_v38  ;;  %4142 = vst [vmem:[#allocation1] ss:$4 sm:$0xff] %v9666_v20  ;;  %v5088_v10 = vpop.f32.mrf.mxu2 }
 0x41b   :  { %4143 = vst [vmem:[#allocation1 + $0x1] ss:$4 sm:$0xff] %v9997_v3  ;;  %v11506_v10 = vld [vmem:[#allocation46_spill] sm:$0xff] }
 0x41c   :  { %v4393_v17 = vunpack.c.l.b16 %v4171_v15  ;;  %4144 = vst [vmem:[#allocation1 + $0x2] ss:$4 sm:$0xff] %v9698_v50 }
 0x41d   :  { %4145 = vst [vmem:[#allocation1 + $0x3] ss:$4 sm:$0xff] %v9700_v48  ;;  %v5106_v2 = vpop.f32.mrf.mxu3 }
 0x41e   :  { %v4400_v55 = vpack.c.b16 %v4394_v5, %v4393_v17  ;;  %v5107_v20 = vadd.f32 %v5106_v2, %v10421_v4 }
 0x420   :  { %5210 = vmatmul.bf16.vlgmr.msrb.gmra.mxu3 %v4400_v55  ;;  %v10468_v47 = vld.sshfl [vmem:[#allocation1 + $0x20] sm:$0xff pattern:$0x73625140] }
 0x421   :  { %4210 = vst [vmem:[#allocation1 + $0x20] ss:$4 sm:$0xff] %v9920_v6  ;;  %v4174_v6 = vpack.c.bf16 %v10415_v35, %v10415_v35 }
 0x422   :  { %v5127_v56 = vpop.f32.mrf.mxu0  ;;  %4211 = vst [vmem:[#allocation1 + $0x21] ss:$4 sm:$0xff] %v9933_v32 }
 0x423   :  { %v5128_v41 = vadd.f32 %v5127_v56, %v5100_v8  ;;  %4212 = vst [vmem:[#allocation1 + $0x22] ss:$4 sm:$0xff] %v11503_v22  ;;  %v4396_v22 = vunpack.c.l.b16 %v4174_v6 }
 0x424   :  { %v4150_v50 = vld.sshfl [vmem:[#allocation1] sm:$0xff pattern:$0x73625140]  ;;  %4213 = vst [vmem:[#allocation1 + $0x23] ss:$4 sm:$0xff] %v11504_v1 }
 0x425   :  { %4152 = vst [vmem:[#allocation1] ss:$4 sm:$0xff] %v9805_v33  ;;  %v4173_v29 = vpack.c.bf16 %v4150_v50, %v4150_v50  ;;  %v5109_v32 = vpop.f32.mrf.mxu3 }
 0x426   :  { %4153 = vst [vmem:[#allocation1 + $0x1] ss:$4 sm:$0xff] %v11500_v39  ;;  %v5110_v19 = vadd.f32 %v5109_v32, %v10431_v13 }
 0x427   :  { %5197 = vmatmul.bf16.gmra.mxu2 %v4381_v45  ;;  %4154 = vst [vmem:[#allocation1 + $0x2] ss:$4 sm:$0xff] %v9834_v42  ;;  %v4395_v4 = vunpack.c.l.b16 %v4173_v29 }
 0x428   :  { %4155 = vst [vmem:[#allocation1 + $0x3] ss:$4 sm:$0xff] %v9850_v21 }
 0x429   :  { %v4401_v63 = vpack.c.b16 %v4396_v22, %v4395_v4 }
 0x42a   :  { %v5129_v49 = vpop.f32.mrf.mxu0 }
 0x42b   :  { %v5130_v18 = vadd.f32 %v5129_v49, %v5102_v0 }
 0x42d   :  { %v5111_v43 = vpop.f32.mrf.mxu3 }
 0x42e   :  { %v5112_v7 = vadd.f32 %v5111_v43, %v10448_v36 }
 0x42f   :  { %v4160_v33 = vld.sshfl [vmem:[#allocation1] sm:$0xff pattern:$0x73625140] }
 0x430   :  { %5215 = vmatmul.bf16.gmra.mxu3 %v4401_v63  ;;  %4162 = vst [vmem:[#allocation1] ss:$4 sm:$0xff] %v11504_v1  ;;  %v4175_v35 = vpack.c.bf16 %v4160_v33, %v4160_v33 }
 0x432   :  { %v5132_v59 = vpop.f32.mrf.mxu0  ;;  %v4397_v61 = vunpack.c.l.b16 %v4175_v35 }
 0x433   :  { %v5133_v8 = vadd.f32 %v5132_v59, %v5105_v12 }
 0x434   :  { %v4402_v36 = vpack.c.b16 %v4398_v40, %v4397_v61 }
 0x435   :  { %v5114_v13 = vpop.f32.mrf.mxu3 }
 0x436   :  { %v5115_v57 = vadd.f32 %v5114_v13, %v5087_v30 }
 0x437   :  { %v4163_v14 = vld.sshfl [vmem:[#allocation1] sm:$0xff pattern:$0x73625140] }
 0x438   :  { %4179 = vst [vmem:[#allocation1] ss:$4 sm:$0xff] %v9580_v52 }
 0x439   :  { %4181 = vst [vmem:[#allocation1 + $0x1] ss:$4 sm:$0xff] %v9584_v51 }
 0x43a   :  { %4183 = vst [vmem:[#allocation1 + $0x2] ss:$4 sm:$0xff] %v9592_v31  ;;  %v5134_v44 = vpop.f32.mrf.mxu0  ;;  %v4416_v31 = vunpack.c.l.b16 %v4226_v34 }
 0x43b   :  { %4185 = vst [vmem:[#allocation1 + $0x3] ss:$4 sm:$0xff] %v9954_v53  ;;  %v5135_v25 = vadd.f32 %v5134_v44, %v5107_v20  ;;  %v4177_v53 = vpack.c.bf16 %v4163_v14, %v4163_v14  ;;  %v4215_v20 = vld.sshfl [vmem:[#allocation1 + $0x20] sm:$0xff pattern:$0x73625140] }
 0x43c   :  { %v4230_v50 = vpack.c.bf16 %v4215_v20, %v4215_v20 }
 0x43d   :  { %v5116_v62 = vpop.f32.mrf.mxu3  ;;  %v4399_v9 = vunpack.c.l.b16 %v4177_v53 }
 0x43e   :  { %v4420_v4 = vunpack.c.l.b16 %v4230_v50 }
 0x43f   :  { %v4403_v30 = vpack.c.b16 %v4399_v9, %v4399_v9 }
 0x440   :  { %5220 = vmatmul.bf16.gmra.mxu3 %v4402_v36 }
 0x442   :  { %v4194_v0 = vld.sshfl [vmem:[#allocation1] sm:$0xff pattern:$0x73625140]  ;;  %v5137_v46 = vpop.f32.mrf.mxu0 }
 0x443   :  { %v4225_v52 = vpack.c.bf16 %v4194_v0, %v4194_v0  ;;  %4196 = vst [vmem:[#allocation1] ss:$4 sm:$0xff] %v9997_v3  ;;  %v5138_v24 = vadd.f32 %v5137_v46, %v5110_v19 }
 0x444   :  { %4197 = vst [vmem:[#allocation1 + $0x1] ss:$4 sm:$0xff] %v9647_v23 }
 0x445   :  { %v4415_v51 = vunpack.c.l.b16 %v4225_v52  ;;  %4198 = vst [vmem:[#allocation1 + $0x2] ss:$4 sm:$0xff] %v9700_v48 }
 0x446   :  { %4199 = vst [vmem:[#allocation1 + $0x3] ss:$4 sm:$0xff] %v9708_v60  ;;  %v4228_v60 = vpack.c.bf16 %v10468_v47, %v10468_v47 }
 0x447   :  { %v4422_v27 = vpack.c.b16 %v4416_v31, %v4415_v51 }
 0x448   :  { %v4418_v17 = vunpack.c.l.b16 %v4228_v60 }
 0x449   :  { %5238 = vmatmul.bf16.vlgmr.msra.gmra.mxu0 %v4422_v27 }
 0x44a   :  { %v5139_v23 = vpop.f32.mrf.mxu0 }
 0x44b   :  { %v5155_v26 = vpop.f32.mrf.mxu1  ;;  %v5140_v48 = vadd.f32 %v5139_v23, %v5112_v7 }
 0x44c   :  { %v5156_v16 = vadd.f32 %v5155_v26, %v5128_v41 }
 0x44d   :  { %v4204_v38 = vld.sshfl [vmem:[#allocation1] sm:$0xff pattern:$0x73625140] }
 0x44e   :  { %4206 = vst [vmem:[#allocation1] ss:$4 sm:$0xff] %v11500_v39  ;;  %v4227_v3 = vpack.c.bf16 %v4204_v38, %v4204_v38 }
 0x44f   :  { %4207 = vst [vmem:[#allocation1 + $0x1] ss:$4 sm:$0xff] %v9834_v42  ;;  %v11505_v42 = vld [vmem:[#allocation22_spill] sm:$0xff] }
 0x450   :  { %5225 = vmatmul.bf16.gmra.mxu3 %v4403_v30  ;;  %4208 = vst [vmem:[#allocation1 + $0x2] ss:$4 sm:$0xff] %v9850_v21  ;;  %v4417_v37 = vunpack.c.l.b16 %v4227_v3  ;;  %v11507_v28 = vmax.f32 %v11505_v42, %v11506_v10 }
 0x451   :  { %4209 = vst [vmem:[#allocation1 + $0x3] ss:$4 sm:$0xff] %v9868_v58 }
 0x452   :  { %v4423_v5 = vpack.c.b16 %v4418_v17, %v4417_v37  ;;  %v5142_v11 = vpop.f32.mrf.mxu0 }
 0x453   :  { %v5157_v15 = vpop.f32.mrf.mxu1  ;;  %v5143_v55 = vadd.f32 %v5142_v11, %v5115_v57 }
 0x454   :  { %v5158_v12 = vadd.f32 %v5157_v15, %v5130_v18 }
 0x458   :  { %v4214_v39 = vld.sshfl [vmem:[#allocation1] sm:$0xff pattern:$0x73625140] }
 0x459   :  { %5243 = vmatmul.bf16.gmra.mxu0 %v4423_v5  ;;  %4216 = vst [vmem:[#allocation1] ss:$4 sm:$0xff] %v11507_v28  ;;  %v4229_v56 = vpack.c.bf16 %v4214_v39, %v4214_v39 }
 0x45a   :  { %v5144_v47 = vpop.f32.mrf.mxu0 }
 0x45b   :  { %v5160_v21 = vpop.f32.mrf.mxu1  ;;  %v4419_v45 = vunpack.c.l.b16 %v4229_v56 }
 0x45c   :  { %v5161_v2 = vadd.f32 %v5160_v21, %v5133_v8 }
 0x45d   :  { %v4424_v19 = vpack.c.b16 %v4420_v4, %v4419_v45 }
 0x460   :  { %v4217_v41 = vld.sshfl [vmem:[#allocation1] sm:$0xff pattern:$0x73625140] }
 0x461   :  { %v4231_v58 = vpack.c.bf16 %v4217_v41, %v4217_v41 }
 0x463   :  { %v4421_v1 = vunpack.c.l.b16 %v4231_v58  ;;  %v5162_v29 = vpop.f32.mrf.mxu1 }
 0x464   :  { %v5163_v6 = vadd.f32 %v5162_v29, %v5135_v25 }
 0x465   :  { %v4425_v32 = vpack.c.b16 %v4421_v1, %v4421_v1 }
 0x467   :  { %5253 = vmatmul.bf16.vlgmr.msra.gmra.mxu2 %v4425_v32 }
 0x469   :  { %5248 = vmatmul.bf16.gmra.mxu0 %v4424_v19 }
 0x46b   :  { %v5165_v49 = vpop.f32.mrf.mxu1 }
 0x46c   :  { %v5166_v18 = vadd.f32 %v5165_v49, %v5138_v24 }
 0x473   :  { %v5167_v22 = vpop.f32.mrf.mxu1 }
 0x474   :  { %v5168_v63 = vadd.f32 %v5167_v22, %v5140_v48 }
 0x47a   :  { %v5183_v33 = vpop.f32.mrf.mxu2 }
 0x47b   :  { %v5184_v43 = vadd.f32 %v5183_v33, %v5156_v16  ;;  %v5170_v7 = vpop.f32.mrf.mxu1 }
 0x47c   :  { %v5171_v59 = vadd.f32 %v5170_v7, %v5143_v55 }
 0x482   :  { %v5185_v8 = vpop.f32.mrf.mxu2 }
 0x483   :  { %v5186_v35 = vadd.f32 %v5185_v8, %v5158_v12  ;;  %v5172_v14 = vpop.f32.mrf.mxu1 }
 0x48a   :  { %v5188_v54 = vpop.f32.mrf.mxu2 }
 0x48b   :  { %v5189_v13 = vadd.f32 %v5188_v54, %v5161_v2 }
 0x492   :  { %v5190_v61 = vpop.f32.mrf.mxu2 }
 0x493   :  { %v5191_v57 = vadd.f32 %v5190_v61, %v5163_v6 }
 0x49a   :  { %v5193_v44 = vpop.f32.mrf.mxu2 }
 0x49b   :  { %v5194_v25 = vadd.f32 %v5193_v44, %v5166_v18 }
 0x4a2   :  { %v5195_v40 = vpop.f32.mrf.mxu2 }
 0x4a3   :  { %v5211_v36 = vpop.f32.mrf.mxu3  ;;  %v5196_v34 = vadd.f32 %v5195_v40, %v5168_v63 }
 0x4a4   :  { %v5212_v62 = vadd.f32 %v5211_v36, %v5184_v43 }
 0x4aa   :  { %v5198_v0 = vpop.f32.mrf.mxu2 }
 0x4ab   :  { %v5213_v52 = vpop.f32.mrf.mxu3  ;;  %v5199_v51 = vadd.f32 %v5198_v0, %v5171_v59 }
 0x4ac   :  { %v5214_v26 = vadd.f32 %v5213_v52, %v5186_v35 }
 0x4b2   :  { %v5200_v31 = vpop.f32.mrf.mxu2 }
 0x4b3   :  { %v5216_v53 = vpop.f32.mrf.mxu3 }
 0x4b4   :  { %v5217_v15 = vadd.f32 %v5216_v53, %v5189_v13 }
 0x4bb   :  { %v5218_v27 = vpop.f32.mrf.mxu3 }
 0x4bc   :  { %v5219_v42 = vadd.f32 %v5218_v27, %v5191_v57 }
 0x4c3   :  { %v5221_v46 = vpop.f32.mrf.mxu3 }
 0x4c4   :  { %v5222_v56 = vadd.f32 %v5221_v46, %v5194_v25 }
 0x4c6   :  { %v5239_v24 = vpop.f32.mrf.mxu0 }
 0x4c7   :  { %v10505_v16 = vadd.f32 %v5239_v24, %v5212_v62 }
 0x4c9   :  { %v5271_v3 = vmul.f32 %v10505_v16, %v10505_v16 }
 0x4cb   :  { %v5223_v9 = vpop.f32.mrf.mxu3 }
 0x4cc   :  { %v5224_v32 = vadd.f32 %v5223_v9, %v5196_v34 }
 0x4ce   :  { %v5241_v38 = vpop.f32.mrf.mxu0 }
 0x4cf   :  { %v10507_v30 = vadd.f32 %v5241_v38, %v5214_v26 }
 0x4d1   :  { %v5258_v23 = vadd.f32 %v10507_v30, %v10505_v16  ;;  %v5272_v48 = vmul.f32 %v10507_v30, %v10507_v30 }
 0x4d3   :  { %v5278_v60 = vadd.f32 %v5272_v48, %v5271_v3  ;;  %v5226_v37 = vpop.f32.mrf.mxu3  ;;  %v5789_v48 = vld [vmem:[%s10549_s3] sm:$0xf] }
 0x4d4   :  { %v5227_v1 = vadd.f32 %v5226_v37, %v5199_v51 }
 0x4d6   :  { %v5244_v12 = vpop.f32.mrf.mxu0 }
 0x4d7   :  { %v10515_v17 = vadd.f32 %v5244_v12, %v5217_v15 }
 0x4d9   :  { %v5259_v5 = vadd.f32 %v5258_v23, %v10515_v17  ;;  %v5273_v11 = vmul.f32 %v10515_v17, %v10515_v17 }
 0x4db   :  { %v5279_v39 = vadd.f32 %v5278_v60, %v5273_v11  ;;  %v5228_v55 = vpop.f32.mrf.mxu3 }
 0x4de   :  { %v5246_v10 = vpop.f32.mrf.mxu0 }
 0x4df   :  { %v5247_v28 = vadd.f32 %v5246_v10, %v5219_v42 }
 0x4e1   :  { %v5260_v21 = vadd.f32 %v5259_v5, %v5247_v28  ;;  %v5274_v2 = vmul.f32 %v5247_v28, %v5247_v28 }
 0x4e3   :  { %v5280_v20 = vadd.f32 %v5279_v39, %v5274_v2 }
 0x4e6   :  { %v5249_v47 = vpop.f32.mrf.mxu0 }
 0x4e7   :  { %v5250_v41 = vadd.f32 %v5249_v47, %v5222_v56 }
 0x4e9   :  { %v5275_v58 = vmul.f32 %v5250_v41, %v5250_v41  ;;  %v5261_v50 = vadd.f32 %v5260_v21, %v5250_v41 }
 0x4ea   :  { %v5254_v45 = vpop.f32.mrf.mxu2 }
 0x4eb   :  { %v5281_v29 = vadd.f32 %v5280_v20, %v5275_v58  ;;  %v5255_v6 = vadd.f32 %v5254_v45, %v5227_v1 }
 0x4ed   :  { %v5277_v49 = vmul.f32 %v5255_v6, %v5255_v6  ;;  %v5263_v63 = vsel %vm3362_vm5, %v5255_v6, 0.0 }
 0x4ee   :  { %v5251_v4 = vpop.f32.mrf.mxu0 }
 0x4ef   :  { %v5252_v19 = vadd.f32 %v5251_v4, %v5224_v32  ;;  %v5283_v59 = vsel %vm3362_vm5, %v5277_v49, 0.0 }
 0x4f1   :  { %v5262_v18 = vadd.f32 %v5261_v50, %v5252_v19  ;;  %v5276_v22 = vmul.f32 %v5252_v19, %v5252_v19 }
 0x4f2   :  { %v5256_v33 = vpop.f32.mrf.mxu2 }
 0x4f3   :  { %v5264_v43 = vadd.f32 %v5263_v63, %v5262_v18  ;;  %v5282_v7 = vadd.f32 %v5281_v29, %v5276_v22 }
 0x4f5   :  { %v5265_v8 = vrot.slane %v5264_v43, 4  ;;  %v5284_v35 = vadd.f32 %v5283_v59, %v5282_v7 }
 0x4f7   :  { %v5266_v14 = vadd.f32 %v5265_v8, %v5264_v43  ;;  %v5285_v54 = vrot.slane %v5284_v35, 4 }
 0x4f9   :  { %v5267_v13 = vrot.slane %v5266_v14, 2  ;;  %v5286_v61 = vadd.f32 %v5285_v54, %v5284_v35 }
 0x4fb   :  { %v5268_v57 = vadd.f32 %v5267_v13, %v5266_v14  ;;  %v5287_v44 = vrot.slane %v5286_v61, 2 }
 0x4fd   :  { %v5269_v25 = vrot.slane %v5268_v57, 1  ;;  %v5288_v40 = vadd.f32 %v5287_v44, %v5286_v61 }
 0x4ff   :  { %v5270_v36 = vadd.f32 %v5269_v25, %v5268_v57  ;;  %v5289_v34 = vrot.slane %v5288_v40, 1 }
 0x501   :  { %v5290_v62 = vadd.f32 %v5289_v34, %v5288_v40  ;;  %v5291_v0 = vmul.f32 0.02, %v5270_v36 }
 0x503   :  { %v5292_v52 = vmul.f32 0.02, %v5290_v62  ;;  %v5293_v51 = vmul.f32 %v5291_v0, %v5291_v0 }
 0x505   :  { %v5294_v31 = vsub.f32 %v5292_v52, %v5293_v51 }
 0x507   :  { %v5295_v53 = vmax.f32 %v5294_v31, 0.0 }
 0x509   :  { %v5296_v27 = vadd.f32 1e-05, %v5295_v53 }
 0x50b   :  { %5787 = vrsqrt.f32 %v5296_v27  ;;  %vm5303_vm7 = vweird.f32 %v5296_v27 }
 0x511   :  { %v5788_v46 = vpop.eup %5787 }
 0x512   :  { %v5298_v24 = vmul.f32 %v5788_v46, %v5296_v27  ;;  %vm5304_vm6 = vweird.f32 %v5788_v46 }
 0x513   :  { %vm5305_vm8 = vmor %vm5303_vm7, %vm5304_vm6 }
 0x514   :  { %v5299_v9 = vmul.f32 %v5788_v46, %v5298_v24 }
 0x516   :  { %v5300_v26 = vmul.f32 0.5, %v5299_v9 }
 0x518   :  { %v5301_v38 = vsub.f32 1.5, %v5300_v26 }
 0x51a   :  { %v5302_v3 = vmul.f32 %v5788_v46, %v5301_v38 }
 0x51c   :  { %v5306_v23 = vsel %vm5305_vm8, %v5788_v46, %v5302_v3 }
 0x51d   :  { %v5307_v60 = vmul.f32 %v5789_v48, %v5306_v23 }
 0x51f   :  { %v5308_v37 = vmul.f32 %v5307_v60, %v5291_v0  ;;  %v5313_v15 = vperm.slane %v5307_v60, 2 }
 0x521   :  { %v5310_v12 = vrot.slane %v5308_v37, 7  ;;  %v5314_v5 = vmul.f32 %v5313_v15, %v10505_v16  ;;  %v5315_v11 = vmul.f32 %v5313_v15, %v10507_v30  ;;  %v5316_v39 = vmul.f32 %v5313_v15, %v10515_v17 }
 0x522   :  { %v5317_v55 = vmul.f32 %v5313_v15, %v5247_v28  ;;  %v5318_v42 = vmul.f32 %v5313_v15, %v5250_v41 }
 0x523   :  { %v5312_v10 = vsub.f32 %v5789_v48, %v5310_v12 }
 0x525   :  { %v5319_v21 = vperm.slane %v5312_v10, 3 }
 0x527   :  { %v5320_v2 = vadd.f32 %v5319_v21, %v5314_v5  ;;  %v5321_v20 = vadd.f32 %v5319_v21, %v5315_v11  ;;  %v5322_v56 = vadd.f32 %v5319_v21, %v5316_v39  ;;  %v5323_v47 = vadd.f32 %v5319_v21, %v5317_v55 }
 0x528   :  { %v5324_v58 = vadd.f32 %v5319_v21, %v5318_v42 }
 0x529   :  { %v5325_v50 = vmax.f32 %v5320_v2, 0.0  ;;  %v5326_v1 = vmax.f32 %v5321_v20, 0.0  ;;  %v5327_v45 = vmax.f32 %v5322_v56, 0.0  ;;  %v5328_v29 = vmax.f32 %v5323_v47, 0.0 }
 0x52a   :  { %v5329_v6 = vmax.f32 %v5324_v58, 0.0 }
 0x52b   :  { %v5335_v32 = vrot.slane %v5325_v50, 2  ;;  %v5336_v16 = vrot.slane %v5325_v50, 4  ;;  %v5337_v4 = vrot.slane %v5325_v50, 6  ;;  %v5338_v30 = vrot.slane %v5326_v1, 2 }
 0x52c   :  { %v5341_v19 = vrot.slane %v5327_v45, 4  ;;  %v5342_v17 = vrot.slane %v5327_v45, 6  ;;  %v5339_v28 = vrot.slane %v5326_v1, 4  ;;  %v5340_v41 = vrot.slane %v5326_v1, 6 }
 0x52d   :  { %v5343_v49 = vrot.slane %v5328_v29, 2  ;;  %v5344_v18 = vrot.slane %v5328_v29, 6  ;;  %v5345_v22 = vrot.slane %v5329_v6, 2  ;;  %v5359_v63 = vsel %vm3362_vm5, %v5325_v50, -inf }
 0x52e   :  { %v5360_v33 = vsel %vm3362_vm5, %v5335_v32, -inf  ;;  %v5346_v43 = vrot.slane %v5329_v6, 4  ;;  %v5366_v59 = vsel %vm3362_vm5, %v5336_v16, -inf  ;;  %v5367_v8 = vsel %vm3362_vm5, %v5337_v4, -inf }
 0x52f   :  { %v5361_v7 = vmax.f32 %v5359_v63, %v5360_v33  ;;  %v5362_v35 = vsel %vm3362_vm5, %v5338_v30, -inf  ;;  %v5368_v14 = vmax.f32 %v5366_v59, %v5367_v8  ;;  %v5373_v54 = vsel %vm3362_vm5, %v5341_v19, -inf }
 0x530   :  { %v5374_v13 = vsel %vm3362_vm5, %v5342_v17, -inf  ;;  %v5364_v57 = vsel %vm3362_vm5, %v5339_v28, -inf  ;;  %v5369_v44 = vsel %vm3362_vm5, %v5340_v41, -inf  ;;  %v5376_v36 = vsel %vm3362_vm5, %v5344_v18, -inf }
 0x531   :  { %v5363_v61 = vmax.f32 %v5361_v7, %v5362_v35  ;;  %v5375_v25 = vmax.f32 %v5373_v54, %v5374_v13  ;;  %v5370_v40 = vmax.f32 %v5368_v14, %v5369_v44  ;;  %v5380_v34 = vsel %vm3362_vm5, %v5328_v29, -inf }
 0x532   :  { %v5381_v62 = vsel %vm3362_vm5, %v5343_v49, -inf  ;;  %v5371_v52 = vsel %vm3362_vm5, %v5327_v45, -inf  ;;  %v5378_v27 = vsel %vm3362_vm5, %v5329_v6, -inf  ;;  %v5383_v46 = vsel %vm3362_vm5, %v5345_v22, -inf }
 0x533   :  { %v5365_v0 = vmax.f32 %v5363_v61, %v5364_v57  ;;  %v5377_v51 = vmax.f32 %v5375_v25, %v5376_v36  ;;  %v5382_v31 = vmax.f32 %v5380_v34, %v5381_v62  ;;  %v5372_v53 = vmax.f32 %v5370_v40, %v5371_v52 }
 0x534   :  { %v5385_v26 = vsel %vm3362_vm5, %v5346_v43, -inf }
 0x535   :  { %v5379_v24 = vmax.f32 %v5377_v51, %v5378_v27  ;;  %v5384_v9 = vmax.f32 %v5382_v31, %v5383_v46  ;;  %5391 = vst [vmem:[#allocation1] ss:$4 sm:$0xff] %v5365_v0 }
 0x536   :  { %5393 = vst [vmem:[#allocation1 + $0x1] ss:$4 sm:$0xff] %v5372_v53 }
 0x537   :  { %v5386_v38 = vmax.f32 %v5384_v9, %v5385_v26  ;;  %5395 = vst [vmem:[#allocation1 + $0x2] ss:$4 sm:$0xff] %v5379_v24 }
 0x539   :  { %5397 = vst [vmem:[#allocation1 + $0x3] ss:$4 sm:$0xff] %v5386_v38 }
 0x540   :  { %v5398_v3 = vld.sshfl [vmem:[#allocation1] sm:$0xff pattern:$0x73625140] }
 0x541   :  { %5400 = vst [vmem:[%s10551_s4] sm:$0xff] %v5398_v3 }

</bundles_post_ra>
